<compile_context>
chip_gen: v7x
topology: tpu7x:2x2x1
jax: 0.10.0
libtpu: 0.0.40
codegen_flags: <defaults>
</compile_context>

<pallas_src>
import functools

import jax
import jax.numpy as jnp
from jax import lax
from jax.experimental import pallas as pl
from jax.experimental.pallas import tpu as pltpu

EPS = 1e-3                        # BaseConv uses nn.BatchNorm2d(out_ch, eps=0.001)
VMEM_LIMIT = 48 * 1024 * 1024     # <= v7x's 64 MiB/TC; generous on v5e/v6e (128 MiB)
PW_TILE = 1024                    # row-tile target for the pointwise (1x1) kernel
TR_BUDGET = 20 * 1024 * 1024      # per-step working-set budget for the fused kernel


def _silu(y):
    # SiLU in f32: x * sigmoid(x) (same formula in kernels and reference).
    return y * (1.0 / (1.0 + jnp.exp(-y)))


def _fold_bn(gamma, beta, mean, var, eps=EPS):
    std = jnp.sqrt(var + eps)
    scale = gamma / std
    bias = beta - mean * scale
    return scale, bias


def _round_up(x, m):
    return (x + m - 1) // m * m


# ----------------------------- pointwise (conv1 + conv2) -----------------------------

def _pw_dual_kernel(x_ref, w1_ref, b1_ref, w2_ref, b2_ref, o1_ref, o2_ref):
    # Fused conv1 / conv2: the input tile is loaded once; two 1x1 convs
    # (bf16 matmuls, f32 accumulate) + folded-BN bias + SiLU.
    x = x_ref[...]
    y1 = jnp.dot(x, w1_ref[...], preferred_element_type=jnp.float32) + b1_ref[...]
    y2 = jnp.dot(x, w2_ref[...], preferred_element_type=jnp.float32) + b2_ref[...]
    o1_ref[...] = _silu(y1).astype(o1_ref.dtype)
    o2_ref[...] = _silu(y2).astype(o2_ref.dtype)


def pointwise_dual(xf, w1, b1, w2, b2):
    M, Cin = xf.shape
    c1, c2 = w1.shape[1], w2.shape[1]
    tm = min(PW_TILE, _round_up(M, 8))
    Mp = _round_up(M, tm)
    if Mp != M:                       # robust tail: pad rows, slice the result back
        xf = jnp.pad(xf, ((0, Mp - M), (0, 0)))
    o1, o2 = pl.pallas_call(
        _pw_dual_kernel,
        out_shape=(jax.ShapeDtypeStruct((Mp, c1), jnp.bfloat16),
                   jax.ShapeDtypeStruct((Mp, c2), jnp.bfloat16)),
        grid=(Mp // tm,),
        in_specs=[pl.BlockSpec((tm, Cin), lambda i: (i, 0)),
                  pl.BlockSpec((Cin, c1), lambda i: (0, 0)),
                  pl.BlockSpec((1, c1), lambda i: (0, 0)),
                  pl.BlockSpec((Cin, c2), lambda i: (0, 0)),
                  pl.BlockSpec((1, c2), lambda i: (0, 0))],
        out_specs=(pl.BlockSpec((tm, c1), lambda i: (i, 0)),
                   pl.BlockSpec((tm, c2), lambda i: (i, 0))),
        compiler_params=pltpu.CompilerParams(
            dimension_semantics=("parallel",), vmem_limit_bytes=VMEM_LIMIT),
    )(xf, w1, b1, w2, b2)
    return o1[:M], o2[:M]


# ----------------------------- fused Bottleneck kernel -----------------------------

def _bottleneck_compute(body, top, bot, w1, b1, w9, b9, *, tr, W, C):
    """h = SiLU(x1 @ w1 + b1) on body+halo rows; y = SiLU(conv3x3(h) + b9) + x1.

    body: (tr, W, C) bf16 x1 rows; top/bot: (1, W, C) halo rows (clamped copies at
    image borders — their h rows are zero-masked below, which reproduces the
    zero-padding of the 3x3 conv input). Returns (tr*W, C) f32.
    """
    r = pl.program_id(1)
    nr = pl.num_programs(1)

    x1_rows = jnp.concatenate([top, body, bot], axis=0)            # (tr+2, W, C)

    # Fused 1x1 conv (BN folded) + SiLU, computed on body + halo rows.
    lin = jnp.dot(x1_rows.reshape((tr + 2) * W, C), w1,
                  preferred_element_type=jnp.float32) + b1
    h = _silu(lin).astype(jnp.bfloat16).reshape(tr + 2, W, C)

    # Zero the halo rows of h at the image top/bottom (3x3 conv zero-padding of h).
    row = lax.broadcasted_iota(jnp.int32, (tr + 2, W, C), 0)
    pad_row = ((row == 0) & (r == 0)) | ((row == tr + 1) & (r == nr - 1))
    h = jnp.where(pad_row, jnp.zeros_like(h), h)

    # dx = -1 / +1 taps as width-aligned shifted copies (zero at left/right borders).
    zc = jnp.zeros((tr + 2, 1, C), h.dtype)
    h_left = jnp.concatenate([zc, h[:, :W - 1, :]], axis=1)        # value at col w-1
    h_right = jnp.concatenate([h[:, 1:, :], zc], axis=1)           # value at col w+1

    # 3x3 conv as 9 accumulating MXU dots (K = C each); w9 is (9, C, C), tap-major.
    acc = jnp.zeros((tr * W, C), jnp.float32)
    taps = (h_left, h, h_right)                                    # kx = 0, 1, 2
    for ky in range(3):
        for kx in range(3):
            op = taps[kx][ky:ky + tr].reshape(tr * W, C)
            acc = acc + jnp.dot(op, w9[ky * 3 + kx],
                                preferred_element_type=jnp.float32)

    # SiLU + residual (shortcut adds the original x1 rows).
    return _silu(acc + b9) + body.reshape(tr * W, C).astype(jnp.float32)


def _bneck_kernel(body_ref, top_ref, bot_ref, w1_ref, b1_ref, w9_ref, b9_ref,
                  o_ref, *, tr, W, C):
    y = _bottleneck_compute(body_ref[...].reshape(tr, W, C),
                            top_ref[...].reshape(1, W, C),
                            bot_ref[...].reshape(1, W, C),
                            w1_ref[...], b1_ref[...], w9_ref[...], b9_ref[...],
                            tr=tr, W=W, C=C)
    o_ref[...] = y.reshape(1, tr, W, C).astype(o_ref.dtype)


def _bneck_csp_tail_kernel(body_ref, top_ref, bot_ref, x2_ref,
                           w1_ref, b1_ref, w9_ref, b9_ref,
                           w3a_ref, w3b_ref, b3_ref, o_ref, *, tr, W, C):
    y = _bottleneck_compute(body_ref[...].reshape(tr, W, C),
                            top_ref[...].reshape(1, W, C),
                            bot_ref[...].reshape(1, W, C),
                            w1_ref[...], b1_ref[...], w9_ref[...], b9_ref[...],
                            tr=tr, W=W, C=C)
    # Fused concat + conv3 epilogue: SiLU(y @ W3[:c_] + x2 @ W3[c_:] + b3).
    x2 = x2_ref[...].reshape(tr * W, C)
    out = (jnp.dot(y.astype(jnp.bfloat16), w3a_ref[...],
                   preferred_element_type=jnp.float32)
           + jnp.dot(x2, w3b_ref[...], preferred_element_type=jnp.float32)
           + b3_ref[...])
    cout = w3a_ref.shape[1]
    o_ref[...] = _silu(out).reshape(1, tr, W, cout).astype(o_ref.dtype)


def _pick_tr(H, W, C, Cout):
    # Largest row block whose per-step working set (block buffers + in-kernel
    # intermediates, roughly 40*C + 8*Cout bytes per pixel) fits the budget.
    est = lambda t: t * W * (C * 40 + Cout * 8)
    divs = [t for t in (64, 32, 16, 8) if H % t == 0]
    for t in divs:
        if est(t) <= TR_BUDGET:
            return t
    return divs[-1] if divs else H


def bottleneck_fused(x1, w1, b1, w9, b9, tail=None):
    """One CSP Bottleneck (1x1 -> 3x3 -> +x1) fused into a single pallas_call.

    tail=(x2, w3_top, w3_bot, b3) additionally fuses conv3(cat([y, x2])) into the
    epilogue (used for the last bottleneck); otherwise returns the new x1.
    """
    N, H, W, C = x1.shape
    Cout = tail[1].shape[1] if tail is not None else C
    tr = _pick_tr(H, W, C, Cout)
    R = H // tr

    body_spec = pl.BlockSpec((1, tr, W, C), lambda n, r: (n, r, 0, 0))
    # 1-row halos, clamped at the image borders (their h rows are masked in-kernel).
    top_spec = pl.BlockSpec((1, 1, W, C),
                            lambda n, r: (n, jnp.maximum(r * tr - 1, 0), 0, 0))
    bot_spec = pl.BlockSpec((1, 1, W, C),
                            lambda n, r: (n, jnp.minimum(r * tr + tr, H - 1), 0, 0))

    def w_spec(shape):
        return pl.BlockSpec(tuple(shape), lambda n, r: (0,) * len(shape))

    in_specs = [body_spec, top_spec, bot_spec]
    args = [x1, x1, x1]
    if tail is not None:
        x2, w3a, w3b, b3 = tail
        in_specs.append(body_spec)
        args.append(x2)
    in_specs += [w_spec(w1.shape), w_spec(b1.shape),
                 w_spec(w9.shape), w_spec(b9.shape)]
    args += [w1, b1, w9, b9]
    if tail is not None:
        in_specs += [w_spec(w3a.shape), w_spec(w3b.shape), w_spec(b3.shape)]
        args += [w3a, w3b, b3]
        kernel = functools.partial(_bneck_csp_tail_kernel, tr=tr, W=W, C=C)
    else:
        kernel = functools.partial(_bneck_kernel, tr=tr, W=W, C=C)

    return pl.pallas_call(
        kernel,
        out_shape=jax.ShapeDtypeStruct((N, H, W, Cout), jnp.bfloat16),
        grid=(N, R),
        in_specs=in_specs,
        out_specs=pl.BlockSpec((1, tr, W, Cout), lambda n, r: (n, r, 0, 0)),
        compiler_params=pltpu.CompilerParams(
            dimension_semantics=("parallel", "parallel"),
            vmem_limit_bytes=VMEM_LIMIT),
    )(*args)


# ----------------------------- parameter setup -----------------------------

def _bn_stats(key, ch):
    k1, k2, k3, k4 = jax.random.split(key, 4)
    gamma = jax.random.uniform(k1, (ch,), minval=0.5, maxval=1.5)
    beta = 0.1 * jax.random.normal(k2, (ch,))
    mean = 0.1 * jax.random.normal(k3, (ch,))
    var = jax.random.uniform(k4, (ch,), minval=0.5, maxval=1.5)
    return gamma, beta, mean, var


def _conv1x1_params(key, cin, cout):
    kw, kb = jax.random.split(key)
    w = 0.1 * jax.random.normal(kw, (cout, cin))                  # torch OI
    scale, bias = _fold_bn(*_bn_stats(kb, cout))
    wf = jnp.transpose(w * scale[:, None], (1, 0))                # [Cin, Cout]
    return wf.astype(jnp.bfloat16), bias.reshape(1, cout).astype(jnp.float32)


def _conv3x3_params(key, cin, cout):
    kw, kb = jax.random.split(key)
    w = 0.1 * jax.random.normal(kw, (cout, cin, 3, 3))            # torch OIHW
    scale, bias = _fold_bn(*_bn_stats(kb, cout))
    wf = w * scale[:, None, None, None]
    w9 = jnp.transpose(wf, (2, 3, 1, 0)).reshape(9, cin, cout)    # [ky*3+kx, ci, co]
    return w9.astype(jnp.bfloat16), bias.reshape(1, cout).astype(jnp.float32)


def init_csplayer_params(key, in_ch, out_ch, n=1, expansion=0.5):
    c_ = int(out_ch * expansion)
    keys = jax.random.split(key, 3 + 2 * n)
    cv1_w, cv1_b = _conv1x1_params(keys[0], in_ch, c_)
    cv2_w, cv2_b = _conv1x1_params(keys[1], in_ch, c_)
    cv3_w, cv3_b = _conv1x1_params(keys[2], 2 * c_, out_ch)
    bottlenecks = []
    for i in range(n):
        w1, b1 = _conv1x1_params(keys[3 + 2 * i], c_, c_)
        w9, b9 = _conv3x3_params(keys[4 + 2 * i], c_, c_)
        bottlenecks.append({"w1": w1, "b1": b1, "w9": w9, "b9": b9})
    # cv3 weight split for the fused concat: torch.cat((x_1, x_2), dim=1)
    # => rows [:c_] multiply the m branch, rows [c_:] multiply conv2's output.
    return {
        "cv1_w": cv1_w, "cv1_b": cv1_b,
        "cv2_w": cv2_w, "cv2_b": cv2_b,
        "cv3_w_top": cv3_w[:c_], "cv3_w_bot": cv3_w[c_:], "cv3_b": cv3_b,
        "bottlenecks": bottlenecks,
    }


# ----------------------------- CSPLayer forward -----------------------------

def csplayer_forward(x_nchw, params):
    x = jnp.transpose(x_nchw, (0, 2, 3, 1)).astype(jnp.bfloat16)   # NCHW -> NHWC
    N, H, W, Cin = x.shape
    M = N * H * W

    # conv1 and conv2 share the input -> one fused pointwise kernel.
    x1f, x2f = pointwise_dual(x.reshape(M, Cin), params["cv1_w"], params["cv1_b"],
                              params["cv2_w"], params["cv2_b"])
    c_ = x1f.shape[1]
    x1 = x1f.reshape(N, H, W, c_)
    x2 = x2f.reshape(N, H, W, c_)

    bns = params["bottlenecks"]
    assert len(bns) >= 1, "CSPLayer kernel expects n >= 1 bottlenecks"
    # All but the last bottleneck: fused 1x1 + 3x3 + SiLU + residual.
    for bn in bns[:-1]:
        x1 = bottleneck_fused(x1, bn["w1"], bn["b1"], bn["w9"], bn["b9"])
    # Last bottleneck also fuses cat([x1, x2]) + conv3 in the epilogue.
    bn = bns[-1]
    out = bottleneck_fused(x1, bn["w1"], bn["b1"], bn["w9"], bn["b9"],
                           tail=(x2, params["cv3_w_top"], params["cv3_w_bot"],
                                 params["cv3_b"]))
    return jnp.transpose(out, (0, 3, 1, 2))                        # NHWC -> NCHW, bf16


# ----------------------------- pure-JAX reference -----------------------------

def _pw_ref(x, w, b):
    y = jnp.einsum("...c,cd->...d", x.astype(jnp.bfloat16), w,
                   preferred_element_type=jnp.float32)
    return _silu(y + b.reshape(-1))


def _conv3x3_ref(h, w9, b):
    N, H, W, C = h.shape
    hp = jnp.pad(h, ((0, 0), (1, 1), (1, 1), (0, 0)))
    acc = jnp.zeros((N, H, W, w9.shape[-1]), jnp.float32)
    for ky in range(3):
        for kx in range(3):
            tap = hp[:, ky:ky + H, kx:kx + W, :]
            acc = acc + jnp.einsum("nhwc,cd->nhwd", tap, w9[ky * 3 + kx],
                                   preferred_element_type=jnp.float32)
    return _silu(acc + b.reshape(-1))


def csplayer_ref(x_nchw, params):
    x = jnp.transpose(x_nchw, (0, 2, 3, 1)).astype(jnp.bfloat16)
    x1 = _pw_ref(x, params["cv1_w"], params["cv1_b"]).astype(jnp.bfloat16)
    x2 = _pw_ref(x, params["cv2_w"], params["cv2_b"]).astype(jnp.bfloat16)
    for bn in params["bottlenecks"]:
        h = _pw_ref(x1, bn["w1"], bn["b1"]).astype(jnp.bfloat16)
        y = _conv3x3_ref(h, bn["w9"], bn["b9"]) + x1.astype(jnp.float32)
        x1 = y.astype(jnp.bfloat16)
    w3 = jnp.concatenate([params["cv3_w_top"], params["cv3_w_bot"]], axis=0)
    cat = jnp.concatenate([x1, x2], axis=-1)
    out = _silu(jnp.einsum("...c,cd->...d", cat, w3,
                           preferred_element_type=jnp.float32)
                + params["cv3_b"].reshape(-1)).astype(jnp.bfloat16)
    return jnp.transpose(out, (0, 3, 1, 2))


# ----------------------------- main -----------------------------

if __name__ == "__main__":
    key = jax.random.PRNGKey(0)
    kx, kp = jax.random.split(key)

    N, IN_CH, OUT_CH, H, W = 2, 8, 16, 16, 16
    x = jax.random.normal(kx, (N, IN_CH, H, W), dtype=jnp.float32)   # NCHW input

    for n in (1, 2):               # n=1: default (fully fused); n=2 also runs the non-tail kernel
        params = init_csplayer_params(jax.random.fold_in(kp, n), IN_CH, OUT_CH, n=n)
        out = jax.block_until_ready(jax.jit(csplayer_forward)(x, params))
        ref = jax.block_until_ready(csplayer_ref(x, params))
        assert out.shape == (N, OUT_CH, H, W), out.shape
        max_err = float(jnp.max(jnp.abs(out.astype(jnp.float32)
                                        - ref.astype(jnp.float32))))
        assert max_err < 3e-2, f"n={n}: mismatch vs reference: {max_err}"

    print("KERNEL_OK")
</pallas_src>

<mosaic_0001>
module attributes {stable_mosaic.version = 11 : i64} {
  func.func @_pw_dual_kernel(%arg0: i32, %arg1: memref<512x8xbf16, #tpu.memory_space<vmem>>, %arg2: memref<8x8xbf16, #tpu.memory_space<vmem>>, %arg3: memref<1x8xf32, #tpu.memory_space<vmem>>, %arg4: memref<8x8xbf16, #tpu.memory_space<vmem>>, %arg5: memref<1x8xf32, #tpu.memory_space<vmem>>, %arg6: memref<512x8xbf16, #tpu.memory_space<vmem>>, %arg7: memref<512x8xbf16, #tpu.memory_space<vmem>>) attributes {dimension_semantics = [#tpu.dimension_semantics<parallel>], iteration_bounds = array<i64: 1>, scalar_prefetch = 0 : i64, scratch_operands = 0 : i64, tpu.core_type = #tpu.core_type<tc>, window_params = [{transform_indices = @transform_0, window_bounds = array<i64: 512, 8>}, {pipeline_mode = #tpu.pipeline_mode<synchronous>, transform_indices = @transform_1, window_bounds = array<i64: 8, 8>}, {pipeline_mode = #tpu.pipeline_mode<synchronous>, transform_indices = @transform_2, window_bounds = array<i64: 1, 8>}, {pipeline_mode = #tpu.pipeline_mode<synchronous>, transform_indices = @transform_3, window_bounds = array<i64: 8, 8>}, {pipeline_mode = #tpu.pipeline_mode<synchronous>, transform_indices = @transform_4, window_bounds = array<i64: 1, 8>}, {transform_indices = @transform_5, window_bounds = array<i64: 512, 8>}, {transform_indices = @transform_6, window_bounds = array<i64: 512, 8>}]} {
    %c0 = arith.constant 0 : index
    %c0_0 = arith.constant 0 : index
    %0 = vector.load %arg1[%c0, %c0_0] : memref<512x8xbf16, #tpu.memory_space<vmem>>, vector<512x8xbf16>
    %c0_1 = arith.constant 0 : index
    %c0_2 = arith.constant 0 : index
    %1 = vector.load %arg2[%c0_1, %c0_2] : memref<8x8xbf16, #tpu.memory_space<vmem>>, vector<8x8xbf16>
    %cst = arith.constant dense<0.000000e+00> : vector<512x8xf32>
    %2 = tpu.matmul %0, %1, %cst {dimension_numbers = #tpu.dot_dimension_numbers<[1], [0], [0], [1], [0, 0, 1, 1], [], []>} : vector<512x8xbf16>, vector<8x8xbf16>, vector<512x8xf32> -> vector<512x8xf32>
    %c0_3 = arith.constant 0 : index
    %c0_4 = arith.constant 0 : index
    %3 = vector.load %arg3[%c0_3, %c0_4] : memref<1x8xf32, #tpu.memory_space<vmem>>, vector<1x8xf32>
    %4 = vector.broadcast %3 : vector<1x8xf32> to vector<512x8xf32>
    %5 = arith.addf %2, %4 : vector<512x8xf32>
    %c0_5 = arith.constant 0 : index
    %c0_6 = arith.constant 0 : index
    %6 = vector.load %arg4[%c0_5, %c0_6] : memref<8x8xbf16, #tpu.memory_space<vmem>>, vector<8x8xbf16>
    %cst_7 = arith.constant dense<0.000000e+00> : vector<512x8xf32>
    %7 = tpu.matmul %0, %6, %cst_7 {dimension_numbers = #tpu.dot_dimension_numbers<[1], [0], [0], [1], [0, 0, 1, 1], [], []>} : vector<512x8xbf16>, vector<8x8xbf16>, vector<512x8xf32> -> vector<512x8xf32>
    %c0_8 = arith.constant 0 : index
    %c0_9 = arith.constant 0 : index
    %8 = vector.load %arg5[%c0_8, %c0_9] : memref<1x8xf32, #tpu.memory_space<vmem>>, vector<1x8xf32>
    %9 = vector.broadcast %8 : vector<1x8xf32> to vector<512x8xf32>
    %10 = arith.addf %7, %9 : vector<512x8xf32>
    %cst_10 = arith.constant 0.000000e+00 : f32
    %11 = vector.broadcast %cst_10 : f32 to vector<512x8xf32>
    %12 = arith.subf %11, %5 : vector<512x8xf32>
    %13 = math.exp %12 : vector<512x8xf32>
    %cst_11 = arith.constant 1.000000e+00 : f32
    %14 = vector.broadcast %cst_11 : f32 to vector<512x8xf32>
    %15 = arith.addf %14, %13 : vector<512x8xf32>
    %cst_12 = arith.constant 1.000000e+00 : f32
    %16 = vector.broadcast %cst_12 : f32 to vector<512x8xf32>
    %17 = arith.divf %16, %15 : vector<512x8xf32>
    %18 = arith.mulf %5, %17 : vector<512x8xf32>
    %19 = arith.truncf %18 : vector<512x8xf32> to vector<512x8xbf16>
    %c0_13 = arith.constant 0 : index
    %c0_14 = arith.constant 0 : index
    %20 = vector.load %arg6[%c0_13, %c0_14] : memref<512x8xbf16, #tpu.memory_space<vmem>>, vector<512x8xbf16>
    tpu.vector_store %arg6[%c0_13, %c0_14], %19 {strides = array<i32>} : memref<512x8xbf16, #tpu.memory_space<vmem>>, vector<512x8xbf16>,
    %cst_15 = arith.constant 0.000000e+00 : f32
    %21 = vector.broadcast %cst_15 : f32 to vector<512x8xf32>
    %22 = arith.subf %21, %10 : vector<512x8xf32>
    %23 = math.exp %22 : vector<512x8xf32>
    %cst_16 = arith.constant 1.000000e+00 : f32
    %24 = vector.broadcast %cst_16 : f32 to vector<512x8xf32>
    %25 = arith.addf %24, %23 : vector<512x8xf32>
    %cst_17 = arith.constant 1.000000e+00 : f32
    %26 = vector.broadcast %cst_17 : f32 to vector<512x8xf32>
    %27 = arith.divf %26, %25 : vector<512x8xf32>
    %28 = arith.mulf %10, %27 : vector<512x8xf32>
    %29 = arith.truncf %28 : vector<512x8xf32> to vector<512x8xbf16>
    %c0_18 = arith.constant 0 : index
    %c0_19 = arith.constant 0 : index
    %30 = vector.load %arg7[%c0_18, %c0_19] : memref<512x8xbf16, #tpu.memory_space<vmem>>, vector<512x8xbf16>
    tpu.vector_store %arg7[%c0_18, %c0_19], %29 {strides = array<i32>} : memref<512x8xbf16, #tpu.memory_space<vmem>>, vector<512x8xbf16>,
    return
  }
  func.func @transform_0(%arg0: i32) -> (i32, i32) {
    %c0_i32 = arith.constant 0 : i32
    %c0_i32_0 = arith.constant 0 : i32
    return %arg0, %c0_i32 : i32, i32
  }
  func.func @transform_1(%arg0: i32) -> (i32, i32) {
    %c0_i32 = arith.constant 0 : i32
    %c0_i32_0 = arith.constant 0 : i32
    %c0_i32_1 = arith.constant 0 : i32
    return %c0_i32, %c0_i32_0 : i32, i32
  }
  func.func @transform_2(%arg0: i32) -> (i32, i32) {
    %c0_i32 = arith.constant 0 : i32
    %c0_i32_0 = arith.constant 0 : i32
    %c0_i32_1 = arith.constant 0 : i32
    return %c0_i32, %c0_i32_0 : i32, i32
  }
  func.func @transform_3(%arg0: i32) -> (i32, i32) {
    %c0_i32 = arith.constant 0 : i32
    %c0_i32_0 = arith.constant 0 : i32
    %c0_i32_1 = arith.constant 0 : i32
    return %c0_i32, %c0_i32_0 : i32, i32
  }
  func.func @transform_4(%arg0: i32) -> (i32, i32) {
    %c0_i32 = arith.constant 0 : i32
    %c0_i32_0 = arith.constant 0 : i32
    %c0_i32_1 = arith.constant 0 : i32
    return %c0_i32, %c0_i32_0 : i32, i32
  }
  func.func @transform_5(%arg0: i32) -> (i32, i32) {
    %c0_i32 = arith.constant 0 : i32
    %c0_i32_0 = arith.constant 0 : i32
    return %arg0, %c0_i32 : i32, i32
  }
  func.func @transform_6(%arg0: i32) -> (i32, i32) {
    %c0_i32 = arith.constant 0 : i32
    %c0_i32_0 = arith.constant 0 : i32
    return %arg0, %c0_i32 : i32, i32
  }
}

module attributes {stable_mosaic.version = 11 : i64} {
  func.func @_bneck_csp_tail_kernel(%arg0: i32, %arg1: i32, %arg2: memref<1x16x16x8xbf16, #tpu.memory_space<vmem>>, %arg3: memref<1x1x16x8xbf16, #tpu.memory_space<vmem>>, %arg4: memref<1x1x16x8xbf16, #tpu.memory_space<vmem>>, %arg5: memref<1x16x16x8xbf16, #tpu.memory_space<vmem>>, %arg6: memref<8x8xbf16, #tpu.memory_space<vmem>>, %arg7: memref<1x8xf32, #tpu.memory_space<vmem>>, %arg8: memref<9x8x8xbf16, #tpu.memory_space<vmem>>, %arg9: memref<1x8xf32, #tpu.memory_space<vmem>>, %arg10: memref<8x16xbf16, #tpu.memory_space<vmem>>, %arg11: memref<8x16xbf16, #tpu.memory_space<vmem>>, %arg12: memref<1x16xf32, #tpu.memory_space<vmem>>, %arg13: memref<1x16x16x16xbf16, #tpu.memory_space<vmem>>) attributes {dimension_semantics = [#tpu.dimension_semantics<parallel>, #tpu.dimension_semantics<parallel>], iteration_bounds = array<i64: 2, 1>, scalar_prefetch = 0 : i64, scratch_operands = 0 : i64, tpu.core_type = #tpu.core_type<tc>, window_params = [{transform_indices = @transform_0, window_bounds = array<i64: 1, 16, 16, 8>}, {transform_indices = @transform_1, window_bounds = array<i64: 1, 1, 16, 8>}, {transform_indices = @transform_2, window_bounds = array<i64: 1, 1, 16, 8>}, {transform_indices = @transform_3, window_bounds = array<i64: 1, 16, 16, 8>}, {pipeline_mode = #tpu.pipeline_mode<synchronous>, transform_indices = @transform_4, window_bounds = array<i64: 8, 8>}, {pipeline_mode = #tpu.pipeline_mode<synchronous>, transform_indices = @transform_5, window_bounds = array<i64: 1, 8>}, {pipeline_mode = #tpu.pipeline_mode<synchronous>, transform_indices = @transform_6, window_bounds = array<i64: 9, 8, 8>}, {pipeline_mode = #tpu.pipeline_mode<synchronous>, transform_indices = @transform_7, window_bounds = array<i64: 1, 8>}, {pipeline_mode = #tpu.pipeline_mode<synchronous>, transform_indices = @transform_8, window_bounds = array<i64: 8, 16>}, {pipeline_mode = #tpu.pipeline_mode<synchronous>, transform_indices = @transform_9, window_bounds = array<i64: 8, 16>}, {pipeline_mode = #tpu.pipeline_mode<synchronous>, transform_indices = @transform_10, window_bounds = array<i64: 1, 16>}, {transform_indices = @transform_11, window_bounds = array<i64: 1, 16, 16, 16>}]} {
    %c0 = arith.constant 0 : index
    %c0_0 = arith.constant 0 : index
    %c0_1 = arith.constant 0 : index
    %c0_2 = arith.constant 0 : index
    %0 = vector.load %arg2[%c0, %c0_0, %c0_1, %c0_2] : memref<1x16x16x8xbf16, #tpu.memory_space<vmem>>, vector<1x16x16x8xbf16>
    %1 = vector.shape_cast %0 : vector<1x16x16x8xbf16> to vector<16x16x8xbf16>
    %c0_3 = arith.constant 0 : index
    %c0_4 = arith.constant 0 : index
    %c0_5 = arith.constant 0 : index
    %c0_6 = arith.constant 0 : index
    %2 = vector.load %arg3[%c0_3, %c0_4, %c0_5, %c0_6] : memref<1x1x16x8xbf16, #tpu.memory_space<vmem>>, vector<1x1x16x8xbf16>
    %3 = vector.shape_cast %2 : vector<1x1x16x8xbf16> to vector<1x16x8xbf16>
    %c0_7 = arith.constant 0 : index
    %c0_8 = arith.constant 0 : index
    %c0_9 = arith.constant 0 : index
    %c0_10 = arith.constant 0 : index
    %4 = vector.load %arg4[%c0_7, %c0_8, %c0_9, %c0_10] : memref<1x1x16x8xbf16, #tpu.memory_space<vmem>>, vector<1x1x16x8xbf16>
    %5 = vector.shape_cast %4 : vector<1x1x16x8xbf16> to vector<1x16x8xbf16>
    %c0_11 = arith.constant 0 : index
    %c0_12 = arith.constant 0 : index
    %6 = vector.load %arg6[%c0_11, %c0_12] : memref<8x8xbf16, #tpu.memory_space<vmem>>, vector<8x8xbf16>
    %c0_13 = arith.constant 0 : index
    %c0_14 = arith.constant 0 : index
    %7 = vector.load %arg7[%c0_13, %c0_14] : memref<1x8xf32, #tpu.memory_space<vmem>>, vector<1x8xf32>
    %c0_15 = arith.constant 0 : index
    %c0_16 = arith.constant 0 : index
    %c0_17 = arith.constant 0 : index
    %8 = vector.load %arg8[%c0_15, %c0_16, %c0_17] : memref<9x8x8xbf16, #tpu.memory_space<vmem>>, vector<9x8x8xbf16>
    %c0_18 = arith.constant 0 : index
    %c0_19 = arith.constant 0 : index
    %9 = vector.load %arg9[%c0_18, %c0_19] : memref<1x8xf32, #tpu.memory_space<vmem>>, vector<1x8xf32>
    %10 = tpu.concatenate %3, %1, %5 in 0 : vector<1x16x8xbf16>, vector<16x16x8xbf16>, vector<1x16x8xbf16> -> vector<18x16x8xbf16>
    %11 = vector.shape_cast %10 : vector<18x16x8xbf16> to vector<288x8xbf16>
    %cst = arith.constant dense<0.000000e+00> : vector<288x8xf32>
    %12 = tpu.matmul %11, %6, %cst {dimension_numbers = #tpu.dot_dimension_numbers<[1], [0], [0], [1], [0, 0, 1, 1], [], []>} : vector<288x8xbf16>, vector<8x8xbf16>, vector<288x8xf32> -> vector<288x8xf32>
    %13 = vector.broadcast %7 : vector<1x8xf32> to vector<288x8xf32>
    %14 = arith.addf %12, %13 : vector<288x8xf32>
    %cst_20 = arith.constant 0.000000e+00 : f32
    %15 = vector.broadcast %cst_20 : f32 to vector<288x8xf32>
    %16 = arith.subf %15, %14 : vector<288x8xf32>
    %17 = math.exp %16 : vector<288x8xf32>
    %cst_21 = arith.constant 1.000000e+00 : f32
    %18 = vector.broadcast %cst_21 : f32 to vector<288x8xf32>
    %19 = arith.addf %18, %17 : vector<288x8xf32>
    %cst_22 = arith.constant 1.000000e+00 : f32
    %20 = vector.broadcast %cst_22 : f32 to vector<288x8xf32>
    %21 = arith.divf %20, %19 : vector<288x8xf32>
    %22 = arith.mulf %14, %21 : vector<288x8xf32>
    %23 = arith.truncf %22 : vector<288x8xf32> to vector<288x8xbf16>
    %24 = vector.shape_cast %23 : vector<288x8xbf16> to vector<18x16x8xbf16>
    %25 = tpu.iota {dimensions = array<i32: 0>} : vector<18x16x8xi32>
    %c0_i32 = arith.constant 0 : i32
    %26 = vector.broadcast %c0_i32 : i32 to vector<18x16x8xi32>
    %27 = arith.cmpi eq, %25, %26 : vector<18x16x8xi32>
    %c0_i32_23 = arith.constant 0 : i32
    %28 = arith.cmpi eq, %arg1, %c0_i32_23 : i32
    %29 = vector.broadcast %28 : i1 to vector<18x16x8xi1>
    %30 = arith.andi %27, %29 : vector<18x16x8xi1>
    %c17_i32 = arith.constant 17 : i32
    %31 = vector.broadcast %c17_i32 : i32 to vector<18x16x8xi32>
    %32 = arith.cmpi eq, %25, %31 : vector<18x16x8xi32>
    %c0_i32_24 = arith.constant 0 : i32
    %33 = arith.cmpi eq, %arg1, %c0_i32_24 : i32
    %34 = vector.broadcast %33 : i1 to vector<18x16x8xi1>
    %35 = arith.andi %32, %34 : vector<18x16x8xi1>
    %36 = arith.ori %30, %35 : vector<18x16x8xi1>
    %cst_25 = arith.constant 0.000000e+00 : bf16
    %37 = vector.broadcast %cst_25 : bf16 to vector<18x16x8xbf16>
    %38 = arith.select %36, %37, %24 : vector<18x16x8xi1>, vector<18x16x8xbf16>
    %cst_26 = arith.constant 0.000000e+00 : bf16
    %39 = vector.broadcast %cst_26 : bf16 to vector<18x1x8xbf16>
    %40 = vector.extract_strided_slice %38 {offsets = [0, 0, 0], sizes = [18, 15, 8], strides = [1, 1, 1]} : vector<18x16x8xbf16> to vector<18x15x8xbf16>
    %41 = tpu.concatenate %39, %40 in 1 : vector<18x1x8xbf16>, vector<18x15x8xbf16> -> vector<18x16x8xbf16>
    %42 = vector.extract_strided_slice %38 {offsets = [0, 1, 0], sizes = [18, 15, 8], strides = [1, 1, 1]} : vector<18x16x8xbf16> to vector<18x15x8xbf16>
    %43 = tpu.concatenate %42, %39 in 1 : vector<18x15x8xbf16>, vector<18x1x8xbf16> -> vector<18x16x8xbf16>
    %cst_27 = arith.constant 0.000000e+00 : f32
    %44 = vector.broadcast %cst_27 : f32 to vector<256x8xf32>
    %45 = vector.extract_strided_slice %41 {offsets = [0, 0, 0], sizes = [16, 16, 8], strides = [1, 1, 1]} : vector<18x16x8xbf16> to vector<16x16x8xbf16>
    %46 = vector.shape_cast %45 : vector<16x16x8xbf16> to vector<256x8xbf16>
    %47 = vector.extract_strided_slice %8 {offsets = [0, 0, 0], sizes = [1, 8, 8], strides = [1, 1, 1]} : vector<9x8x8xbf16> to vector<1x8x8xbf16>
    %48 = vector.shape_cast %47 : vector<1x8x8xbf16> to vector<8x8xbf16>
    %cst_28 = arith.constant dense<0.000000e+00> : vector<256x8xf32>
    %49 = tpu.matmul %46, %48, %cst_28 {dimension_numbers = #tpu.dot_dimension_numbers<[1], [0], [0], [1], [0, 0, 1, 1], [], []>} : vector<256x8xbf16>, vector<8x8xbf16>, vector<256x8xf32> -> vector<256x8xf32>
    %50 = arith.addf %44, %49 : vector<256x8xf32>
    %51 = vector.extract_strided_slice %38 {offsets = [0, 0, 0], sizes = [16, 16, 8], strides = [1, 1, 1]} : vector<18x16x8xbf16> to vector<16x16x8xbf16>
    %52 = vector.shape_cast %51 : vector<16x16x8xbf16> to vector<256x8xbf16>
    %53 = vector.extract_strided_slice %8 {offsets = [1, 0, 0], sizes = [1, 8, 8], strides = [1, 1, 1]} : vector<9x8x8xbf16> to vector<1x8x8xbf16>
    %54 = vector.shape_cast %53 : vector<1x8x8xbf16> to vector<8x8xbf16>
    %cst_29 = arith.constant dense<0.000000e+00> : vector<256x8xf32>
    %55 = tpu.matmul %52, %54, %cst_29 {dimension_numbers = #tpu.dot_dimension_numbers<[1], [0], [0], [1], [0, 0, 1, 1], [], []>} : vector<256x8xbf16>, vector<8x8xbf16>, vector<256x8xf32> -> vector<256x8xf32>
    %56 = arith.addf %50, %55 : vector<256x8xf32>
    %57 = vector.extract_strided_slice %43 {offsets = [0, 0, 0], sizes = [16, 16, 8], strides = [1, 1, 1]} : vector<18x16x8xbf16> to vector<16x16x8xbf16>
    %58 = vector.shape_cast %57 : vector<16x16x8xbf16> to vector<256x8xbf16>
    %59 = vector.extract_strided_slice %8 {offsets = [2, 0, 0], sizes = [1, 8, 8], strides = [1, 1, 1]} : vector<9x8x8xbf16> to vector<1x8x8xbf16>
    %60 = vector.shape_cast %59 : vector<1x8x8xbf16> to vector<8x8xbf16>
    %cst_30 = arith.constant dense<0.000000e+00> : vector<256x8xf32>
    %61 = tpu.matmul %58, %60, %cst_30 {dimension_numbers = #tpu.dot_dimension_numbers<[1], [0], [0], [1], [0, 0, 1, 1], [], []>} : vector<256x8xbf16>, vector<8x8xbf16>, vector<256x8xf32> -> vector<256x8xf32>
    %62 = arith.addf %56, %61 : vector<256x8xf32>
    %63 = vector.extract_strided_slice %41 {offsets = [1, 0, 0], sizes = [16, 16, 8], strides = [1, 1, 1]} : vector<18x16x8xbf16> to vector<16x16x8xbf16>
    %64 = vector.shape_cast %63 : vector<16x16x8xbf16> to vector<256x8xbf16>
    %65 = vector.extract_strided_slice %8 {offsets = [3, 0, 0], sizes = [1, 8, 8], strides = [1, 1, 1]} : vector<9x8x8xbf16> to vector<1x8x8xbf16>
    %66 = vector.shape_cast %65 : vector<1x8x8xbf16> to vector<8x8xbf16>
    %cst_31 = arith.constant dense<0.000000e+00> : vector<256x8xf32>
    %67 = tpu.matmul %64, %66, %cst_31 {dimension_numbers = #tpu.dot_dimension_numbers<[1], [0], [0], [1], [0, 0, 1, 1], [], []>} : vector<256x8xbf16>, vector<8x8xbf16>, vector<256x8xf32> -> vector<256x8xf32>
    %68 = arith.addf %62, %67 : vector<256x8xf32>
    %69 = vector.extract_strided_slice %38 {offsets = [1, 0, 0], sizes = [16, 16, 8], strides = [1, 1, 1]} : vector<18x16x8xbf16> to vector<16x16x8xbf16>
    %70 = vector.shape_cast %69 : vector<16x16x8xbf16> to vector<256x8xbf16>
    %71 = vector.extract_strided_slice %8 {offsets = [4, 0, 0], sizes = [1, 8, 8], strides = [1, 1, 1]} : vector<9x8x8xbf16> to vector<1x8x8xbf16>
    %72 = vector.shape_cast %71 : vector<1x8x8xbf16> to vector<8x8xbf16>
    %cst_32 = arith.constant dense<0.000000e+00> : vector<256x8xf32>
    %73 = tpu.matmul %70, %72, %cst_32 {dimension_numbers = #tpu.dot_dimension_numbers<[1], [0], [0], [1], [0, 0, 1, 1], [], []>} : vector<256x8xbf16>, vector<8x8xbf16>, vector<256x8xf32> -> vector<256x8xf32>
    %74 = arith.addf %68, %73 : vector<256x8xf32>
    %75 = vector.extract_strided_slice %43 {offsets = [1, 0, 0], sizes = [16, 16, 8], strides = [1, 1, 1]} : vector<18x16x8xbf16> to vector<16x16x8xbf16>
    %76 = vector.shape_cast %75 : vector<16x16x8xbf16> to vector<256x8xbf16>
    %77 = vector.extract_strided_slice %8 {offsets = [5, 0, 0], sizes = [1, 8, 8], strides = [1, 1, 1]} : vector<9x8x8xbf16> to vector<1x8x8xbf16>
    %78 = vector.shape_cast %77 : vector<1x8x8xbf16> to vector<8x8xbf16>
    %cst_33 = arith.constant dense<0.000000e+00> : vector<256x8xf32>
    %79 = tpu.matmul %76, %78, %cst_33 {dimension_numbers = #tpu.dot_dimension_numbers<[1], [0], [0], [1], [0, 0, 1, 1], [], []>} : vector<256x8xbf16>, vector<8x8xbf16>, vector<256x8xf32> -> vector<256x8xf32>
    %80 = arith.addf %74, %79 : vector<256x8xf32>
    %81 = vector.extract_strided_slice %41 {offsets = [2, 0, 0], sizes = [16, 16, 8], strides = [1, 1, 1]} : vector<18x16x8xbf16> to vector<16x16x8xbf16>
    %82 = vector.shape_cast %81 : vector<16x16x8xbf16> to vector<256x8xbf16>
    %83 = vector.extract_strided_slice %8 {offsets = [6, 0, 0], sizes = [1, 8, 8], strides = [1, 1, 1]} : vector<9x8x8xbf16> to vector<1x8x8xbf16>
    %84 = vector.shape_cast %83 : vector<1x8x8xbf16> to vector<8x8xbf16>
    %cst_34 = arith.constant dense<0.000000e+00> : vector<256x8xf32>
    %85 = tpu.matmul %82, %84, %cst_34 {dimension_numbers = #tpu.dot_dimension_numbers<[1], [0], [0], [1], [0, 0, 1, 1], [], []>} : vector<256x8xbf16>, vector<8x8xbf16>, vector<256x8xf32> -> vector<256x8xf32>
    %86 = arith.addf %80, %85 : vector<256x8xf32>
    %87 = vector.extract_strided_slice %38 {offsets = [2, 0, 0], sizes = [16, 16, 8], strides = [1, 1, 1]} : vector<18x16x8xbf16> to vector<16x16x8xbf16>
    %88 = vector.shape_cast %87 : vector<16x16x8xbf16> to vector<256x8xbf16>
    %89 = vector.extract_strided_slice %8 {offsets = [7, 0, 0], sizes = [1, 8, 8], strides = [1, 1, 1]} : vector<9x8x8xbf16> to vector<1x8x8xbf16>
    %90 = vector.shape_cast %89 : vector<1x8x8xbf16> to vector<8x8xbf16>
    %cst_35 = arith.constant dense<0.000000e+00> : vector<256x8xf32>
    %91 = tpu.matmul %88, %90, %cst_35 {dimension_numbers = #tpu.dot_dimension_numbers<[1], [0], [0], [1], [0, 0, 1, 1], [], []>} : vector<256x8xbf16>, vector<8x8xbf16>, vector<256x8xf32> -> vector<256x8xf32>
    %92 = arith.addf %86, %91 : vector<256x8xf32>
    %93 = vector.extract_strided_slice %43 {offsets = [2, 0, 0], sizes = [16, 16, 8], strides = [1, 1, 1]} : vector<18x16x8xbf16> to vector<16x16x8xbf16>
    %94 = vector.shape_cast %93 : vector<16x16x8xbf16> to vector<256x8xbf16>
    %95 = vector.extract_strided_slice %8 {offsets = [8, 0, 0], sizes = [1, 8, 8], strides = [1, 1, 1]} : vector<9x8x8xbf16> to vector<1x8x8xbf16>
    %96 = vector.shape_cast %95 : vector<1x8x8xbf16> to vector<8x8xbf16>
    %cst_36 = arith.constant dense<0.000000e+00> : vector<256x8xf32>
    %97 = tpu.matmul %94, %96, %cst_36 {dimension_numbers = #tpu.dot_dimension_numbers<[1], [0], [0], [1], [0, 0, 1, 1], [], []>} : vector<256x8xbf16>, vector<8x8xbf16>, vector<256x8xf32> -> vector<256x8xf32>
    %98 = arith.addf %92, %97 : vector<256x8xf32>
    %99 = vector.broadcast %9 : vector<1x8xf32> to vector<256x8xf32>
    %100 = arith.addf %98, %99 : vector<256x8xf32>
    %cst_37 = arith.constant 0.000000e+00 : f32
    %101 = vector.broadcast %cst_37 : f32 to vector<256x8xf32>
    %102 = arith.subf %101, %100 : vector<256x8xf32>
    %103 = math.exp %102 : vector<256x8xf32>
    %cst_38 = arith.constant 1.000000e+00 : f32
    %104 = vector.broadcast %cst_38 : f32 to vector<256x8xf32>
    %105 = arith.addf %104, %103 : vector<256x8xf32>
    %cst_39 = arith.constant 1.000000e+00 : f32
    %106 = vector.broadcast %cst_39 : f32 to vector<256x8xf32>
    %107 = arith.divf %106, %105 : vector<256x8xf32>
    %108 = arith.mulf %100, %107 : vector<256x8xf32>
    %109 = vector.shape_cast %1 : vector<16x16x8xbf16> to vector<256x8xbf16>
    %110 = arith.extf %109 : vector<256x8xbf16> to vector<256x8xf32>
    %111 = arith.addf %108, %110 : vector<256x8xf32>
    %c0_40 = arith.constant 0 : index
    %c0_41 = arith.constant 0 : index
    %c0_42 = arith.constant 0 : index
    %c0_43 = arith.constant 0 : index
    %112 = vector.load %arg5[%c0_40, %c0_41, %c0_42, %c0_43] : memref<1x16x16x8xbf16, #tpu.memory_space<vmem>>, vector<1x16x16x8xbf16>
    %113 = vector.shape_cast %112 : vector<1x16x16x8xbf16> to vector<256x8xbf16>
    %114 = arith.truncf %111 : vector<256x8xf32> to vector<256x8xbf16>
    %c0_44 = arith.constant 0 : index
    %c0_45 = arith.constant 0 : index
    %115 = vector.load %arg10[%c0_44, %c0_45] : memref<8x16xbf16, #tpu.memory_space<vmem>>, vector<8x16xbf16>
    %cst_46 = arith.constant dense<0.000000e+00> : vector<256x16xf32>
    %116 = tpu.matmul %114, %115, %cst_46 {dimension_numbers = #tpu.dot_dimension_numbers<[1], [0], [0], [1], [0, 0, 1, 1], [], []>} : vector<256x8xbf16>, vector<8x16xbf16>, vector<256x16xf32> -> vector<256x16xf32>
    %c0_47 = arith.constant 0 : index
    %c0_48 = arith.constant 0 : index
    %117 = vector.load %arg11[%c0_47, %c0_48] : memref<8x16xbf16, #tpu.memory_space<vmem>>, vector<8x16xbf16>
    %cst_49 = arith.constant dense<0.000000e+00> : vector<256x16xf32>
    %118 = tpu.matmul %113, %117, %cst_49 {dimension_numbers = #tpu.dot_dimension_numbers<[1], [0], [0], [1], [0, 0, 1, 1], [], []>} : vector<256x8xbf16>, vector<8x16xbf16>, vector<256x16xf32> -> vector<256x16xf32>
    %119 = arith.addf %116, %118 : vector<256x16xf32>
    %c0_50 = arith.constant 0 : index
    %c0_51 = arith.constant 0 : index
    %120 = vector.load %arg12[%c0_50, %c0_51] : memref<1x16xf32, #tpu.memory_space<vmem>>, vector<1x16xf32>
    %121 = vector.broadcast %120 : vector<1x16xf32> to vector<256x16xf32>
    %122 = arith.addf %119, %121 : vector<256x16xf32>
    %cst_52 = arith.constant 0.000000e+00 : f32
    %123 = vector.broadcast %cst_52 : f32 to vector<256x16xf32>
    %124 = arith.subf %123, %122 : vector<256x16xf32>
    %125 = math.exp %124 : vector<256x16xf32>
    %cst_53 = arith.constant 1.000000e+00 : f32
    %126 = vector.broadcast %cst_53 : f32 to vector<256x16xf32>
    %127 = arith.addf %126, %125 : vector<256x16xf32>
    %cst_54 = arith.constant 1.000000e+00 : f32
    %128 = vector.broadcast %cst_54 : f32 to vector<256x16xf32>
    %129 = arith.divf %128, %127 : vector<256x16xf32>
    %130 = arith.mulf %122, %129 : vector<256x16xf32>
    %131 = vector.shape_cast %130 : vector<256x16xf32> to vector<1x16x16x16xf32>
    %132 = arith.truncf %131 : vector<1x16x16x16xf32> to vector<1x16x16x16xbf16>
    %c0_55 = arith.constant 0 : index
    %c0_56 = arith.constant 0 : index
    %c0_57 = arith.constant 0 : index
    %c0_58 = arith.constant 0 : index
    %133 = vector.load %arg13[%c0_55, %c0_56, %c0_57, %c0_58] : memref<1x16x16x16xbf16, #tpu.memory_space<vmem>>, vector<1x16x16x16xbf16>
    tpu.vector_store %arg13[%c0_55, %c0_56, %c0_57, %c0_58], %132 {strides = array<i32>} : memref<1x16x16x16xbf16, #tpu.memory_space<vmem>>, vector<1x16x16x16xbf16>,
    return
  }
  func.func @transform_0(%arg0: i32, %arg1: i32) -> (i32, i32, i32, i32) {
    %c0_i32 = arith.constant 0 : i32
    %c0_i32_0 = arith.constant 0 : i32
    %c0_i32_1 = arith.constant 0 : i32
    return %arg0, %arg1, %c0_i32, %c0_i32_0 : i32, i32, i32, i32
  }
  func.func @transform_1(%arg0: i32, %arg1: i32) -> (i32, i32, i32, i32) {
    %c16_i32 = arith.constant 16 : i32
    %0 = arith.muli %arg1, %c16_i32 : i32
    %c1_i32 = arith.constant 1 : i32
    %1 = arith.subi %0, %c1_i32 : i32
    %c0_i32 = arith.constant 0 : i32
    %2 = arith.maxsi %1, %c0_i32 : i32
    %c0_i32_0 = arith.constant 0 : i32
    %c0_i32_1 = arith.constant 0 : i32
    %c0_i32_2 = arith.constant 0 : i32
    return %arg0, %2, %c0_i32_0, %c0_i32_1 : i32, i32, i32, i32
  }
  func.func @transform_2(%arg0: i32, %arg1: i32) -> (i32, i32, i32, i32) {
    %c16_i32 = arith.constant 16 : i32
    %0 = arith.muli %arg1, %c16_i32 : i32
    %c16_i32_0 = arith.constant 16 : i32
    %1 = arith.addi %0, %c16_i32_0 : i32
    %c15_i32 = arith.constant 15 : i32
    %2 = arith.minsi %1, %c15_i32 : i32
    %c0_i32 = arith.constant 0 : i32
    %c0_i32_1 = arith.constant 0 : i32
    %c0_i32_2 = arith.constant 0 : i32
    return %arg0, %2, %c0_i32, %c0_i32_1 : i32, i32, i32, i32
  }
  func.func @transform_3(%arg0: i32, %arg1: i32) -> (i32, i32, i32, i32) {
    %c0_i32 = arith.constant 0 : i32
    %c0_i32_0 = arith.constant 0 : i32
    %c0_i32_1 = arith.constant 0 : i32
    return %arg0, %arg1, %c0_i32, %c0_i32_0 : i32, i32, i32, i32
  }
  func.func @transform_4(%arg0: i32, %arg1: i32) -> (i32, i32) {
    %c0_i32 = arith.constant 0 : i32
    %c0_i32_0 = arith.constant 0 : i32
    %c0_i32_1 = arith.constant 0 : i32
    return %c0_i32, %c0_i32_0 : i32, i32
  }
  func.func @transform_5(%arg0: i32, %arg1: i32) -> (i32, i32) {
    %c0_i32 = arith.constant 0 : i32
    %c0_i32_0 = arith.constant 0 : i32
    %c0_i32_1 = arith.constant 0 : i32
    return %c0_i32, %c0_i32_0 : i32, i32
  }
  func.func @transform_6(%arg0: i32, %arg1: i32) -> (i32, i32, i32) {
    %c0_i32 = arith.constant 0 : i32
    %c0_i32_0 = arith.constant 0 : i32
    %c0_i32_1 = arith.constant 0 : i32
    %c0_i32_2 = arith.constant 0 : i32
    return %c0_i32, %c0_i32_0, %c0_i32_1 : i32, i32, i32
  }
  func.func @transform_7(%arg0: i32, %arg1: i32) -> (i32, i32) {
    %c0_i32 = arith.constant 0 : i32
    %c0_i32_0 = arith.constant 0 : i32
    %c0_i32_1 = arith.constant 0 : i32
    return %c0_i32, %c0_i32_0 : i32, i32
  }
  func.func @transform_8(%arg0: i32, %arg1: i32) -> (i32, i32) {
    %c0_i32 = arith.constant 0 : i32
    %c0_i32_0 = arith.constant 0 : i32
    %c0_i32_1 = arith.constant 0 : i32
    return %c0_i32, %c0_i32_0 : i32, i32
  }
  func.func @transform_9(%arg0: i32, %arg1: i32) -> (i32, i32) {
    %c0_i32 = arith.constant 0 : i32
    %c0_i32_0 = arith.constant 0 : i32
    %c0_i32_1 = arith.constant 0 : i32
    return %c0_i32, %c0_i32_0 : i32, i32
  }
  func.func @transform_10(%arg0: i32, %arg1: i32) -> (i32, i32) {
    %c0_i32 = arith.constant 0 : i32
    %c0_i32_0 = arith.constant 0 : i32
    %c0_i32_1 = arith.constant 0 : i32
    return %c0_i32, %c0_i32_0 : i32, i32
  }
  func.func @transform_11(%arg0: i32, %arg1: i32) -> (i32, i32, i32, i32) {
    %c0_i32 = arith.constant 0 : i32
    %c0_i32_0 = arith.constant 0 : i32
    %c0_i32_1 = arith.constant 0 : i32
    return %arg0, %arg1, %c0_i32, %c0_i32_0 : i32, i32, i32, i32
  }
}

</mosaic_0001>

<bundles_post_ra>
// kernel: csplayer_forward.2
= control target key start
LH: loop header
LB: loop body
LE: loop exit
PB: predicated region body
PF: predicated region fallthrough
CT: control target
= control target key end

     0   :  { %vm352_vm0 = vcmask 1043456   ;;  %vm255_vm1 = vcmask 64512   ;;  %vm1649_vm2 = vcmask 60416   ;;  %s5365_s1 = inlined_call_operand.vmem [shape: bf16[8,8], index: 1, kind: input, shape index: {}]   ;;  %s5366_s3 = inlined_call_operand.vmem [shape: bf16[8,8], index: 3, kind: input, shape index: {}]   ;;  %s5367_s0 = inlined_call_operand.vmem [shape: bf16[512,8], index: 0, kind: input, shape index: {}]   ;;  %s5368_s2 = inlined_call_operand.vmem [shape: f32[1,8], index: 2, kind: input, shape index: {}]   ;;  %s5369_s4 = inlined_call_operand.vmem [shape: f32[1,8], index: 4, kind: input, shape index: {}]   ;;  %s5370_s5 = inlined_call_operand.vmem [shape: bf16[512,8], index: 5, kind: output, shape index: {0}]   ;;  %s5371_s6 = inlined_call_operand.vmem [shape: bf16[512,8], index: 6, kind: output, shape index: {1}]  }
   0x1   :  { %v87_v0 = vld [vmem:[%s5365_s1] sm:$0xf]  ;;  %v3045_v5 = vld [vmem:[%s5367_s0 + $0x8] sm:$0xff]   ;;  %v3046_v6 = vld [vmem:[%s5367_s0 + $0x10] sm:$0xff]  }
   0x2   :  { %v645_v1 = vld [vmem:[%s5366_s3] sm:$0xf]  ;;  %3042 = vmatprep.subr.msk.bf16.mxu0 %vm352_vm0, %v87_v0  ;;  %v354_v2 = vsel %vm352_vm0, %v87_v0, 0  ;;  %v3047_v7 = vld [vmem:[%s5367_s0 + $0x18] sm:$0xff]   ;;  %v3049_v9 = vld [vmem:[%s5367_s0 + $0x28] sm:$0xff]  }
   0x3   :  { %3043 = vmatprep.subr.msk.bf16.mxu1 %vm352_vm0, %v645_v1  ;;  %v654_v3 = vsel %vm352_vm0, %v645_v1, 0  ;;  %v3044_v4 = vld [vmem:[%s5367_s0] sm:$0xff]   ;;  %2911 = vmatpush3.bf16.msra.mxu0 %v354_v2  ;;  %v3050_v10 = vld [vmem:[%s5367_s0 + $0x30] sm:$0xff]   ;;  %v3051_v11 = vld [vmem:[%s5367_s0 + $0x38] sm:$0xff]  }
   0x4   :  { %2977 = vmatpush3.bf16.msra.mxu1 %v654_v3  ;;  %2912 = vmatprep.mubr.msk.bf16.mxu0 %vm255_vm1, %v3044_v4  ;;  %v3048_v8 = vld [vmem:[%s5367_s0 + $0x20] sm:$0xff]   ;;  %v3053_v13 = vld [vmem:[%s5367_s0 + $0x48] sm:$0xff]   ;;  %v3054_v14 = vld [vmem:[%s5367_s0 + $0x50] sm:$0xff]  }
   0x5   :  { %2978 = vmatprep.mubr.msk.bf16.mxu1 %vm255_vm1, %v3044_v4  ;;  %v3052_v12 = vld [vmem:[%s5367_s0 + $0x40] sm:$0xff]   ;;  %v3055_v15 = vld [vmem:[%s5367_s0 + $0x58] sm:$0xff]   ;;  %v3057_v17 = vld [vmem:[%s5367_s0 + $0x68] sm:$0xff]  }
   0x6   :  { %2913 = vmatmul.mubr.msk.bf16.vlgmr.msra.gmra.mrb[0].mxu0 %vm255_vm1, %v3045_v5  ;;  %v3056_v16 = vld [vmem:[%s5367_s0 + $0x60] sm:$0xff]   ;;  %v3058_v18 = vld [vmem:[%s5367_s0 + $0x70] sm:$0xff]   ;;  %v3059_v19 = vld [vmem:[%s5367_s0 + $0x78] sm:$0xff]  }
   0x7   :  { %2979 = vmatmul.mubr.msk.bf16.vlgmr.msra.gmra.mrb[0].mxu1 %vm255_vm1, %v3045_v5  ;;  %2916 = vmatprep.mubr.msk.bf16.mxu0 %vm255_vm1, %v3046_v6  ;;  %v3060_v20 = vld [vmem:[%s5367_s0 + $0x80] sm:$0xff]   ;;  %v3061_v21 = vld [vmem:[%s5367_s0 + $0x88] sm:$0xff]   ;;  %v3062_v22 = vld [vmem:[%s5367_s0 + $0x90] sm:$0xff]  }
   0x8   :  { %2982 = vmatprep.mubr.msk.bf16.mxu1 %vm255_vm1, %v3046_v6  ;;  %v3063_v23 = vld [vmem:[%s5367_s0 + $0x98] sm:$0xff]   ;;  %v3064_v24 = vld [vmem:[%s5367_s0 + $0xa0] sm:$0xff]   ;;  %v3065_v25 = vld [vmem:[%s5367_s0 + $0xa8] sm:$0xff]  }
   0x9   :  { %v3066_v26 = vld [vmem:[%s5367_s0 + $0xb0] sm:$0xff]   ;;  %v3067_v27 = vld [vmem:[%s5367_s0 + $0xb8] sm:$0xff]   ;;  %v3068_v28 = vld [vmem:[%s5367_s0 + $0xc0] sm:$0xff]  }
   0xa   :  { %v3069_v29 = vld [vmem:[%s5367_s0 + $0xc8] sm:$0xff]   ;;  %v3070_v30 = vld [vmem:[%s5367_s0 + $0xd0] sm:$0xff]   ;;  %v3071_v31 = vld [vmem:[%s5367_s0 + $0xd8] sm:$0xff]  }
   0xb   :  { %v3072_v32 = vld [vmem:[%s5367_s0 + $0xe0] sm:$0xff]   ;;  %v3073_v33 = vld [vmem:[%s5367_s0 + $0xe8] sm:$0xff]   ;;  %v3074_v34 = vld [vmem:[%s5367_s0 + $0xf0] sm:$0xff]  }
   0xc   :  { %v3075_v35 = vld [vmem:[%s5367_s0 + $0xf8] sm:$0xff]   ;;  %v3796_v36 = vld [vmem:[%s5368_s2] ss:$0 sm:$0xff] }
   0xd   :  { %v3801_v37 = vld [vmem:[%s5369_s4] ss:$0 sm:$0xff] }
   0xe   :  { %2917 = vmatmul.mubr.msk.bf16.gmra.mrb[4].mxu0 %vm255_vm1, %v3047_v7 }
   0xf   :  { %2983 = vmatmul.mubr.msk.bf16.gmra.mrb[4].mxu1 %vm255_vm1, %v3047_v7  ;;  %2920 = vmatprep.mubr.msk.bf16.mxu0 %vm255_vm1, %v3048_v8 }
  0x10   :  { %2986 = vmatprep.mubr.msk.bf16.mxu1 %vm255_vm1, %v3048_v8 }
  0x16   :  { %2921 = vmatmul.mubr.msk.bf16.gmra.mrb[8].mxu0 %vm255_vm1, %v3049_v9 }
  0x17   :  { %2987 = vmatmul.mubr.msk.bf16.gmra.mrb[8].mxu1 %vm255_vm1, %v3049_v9  ;;  %2924 = vmatprep.mubr.msk.bf16.mxu0 %vm255_vm1, %v3050_v10 }
  0x18   :  { %2990 = vmatprep.mubr.msk.bf16.mxu1 %vm255_vm1, %v3050_v10 }
  0x1e   :  { %2925 = vmatmul.mubr.msk.bf16.gmra.mrb[12].mxu0 %vm255_vm1, %v3051_v11 }
  0x1f   :  { %2991 = vmatmul.mubr.msk.bf16.gmra.mrb[12].mxu1 %vm255_vm1, %v3051_v11  ;;  %2928 = vmatprep.mubr.msk.bf16.mxu0 %vm255_vm1, %v3052_v12 }
  0x20   :  { %2994 = vmatprep.mubr.msk.bf16.mxu1 %vm255_vm1, %v3052_v12 }
  0x26   :  { %2929 = vmatmul.mubr.msk.bf16.gmra.mrb[16].mxu0 %vm255_vm1, %v3053_v13 }
  0x27   :  { %2995 = vmatmul.mubr.msk.bf16.gmra.mrb[16].mxu1 %vm255_vm1, %v3053_v13  ;;  %2932 = vmatprep.mubr.msk.bf16.mxu0 %vm255_vm1, %v3054_v14 }
  0x28   :  { %2998 = vmatprep.mubr.msk.bf16.mxu1 %vm255_vm1, %v3054_v14 }
  0x2e   :  { %2933 = vmatmul.mubr.msk.bf16.gmra.mrb[20].mxu0 %vm255_vm1, %v3055_v15 }
  0x2f   :  { %2999 = vmatmul.mubr.msk.bf16.gmra.mrb[20].mxu1 %vm255_vm1, %v3055_v15  ;;  %2936 = vmatprep.mubr.msk.bf16.mxu0 %vm255_vm1, %v3056_v16 }
  0x30   :  { %3002 = vmatprep.mubr.msk.bf16.mxu1 %vm255_vm1, %v3056_v16 }
  0x36   :  { %2937 = vmatmul.mubr.msk.bf16.gmra.mrb[24].mxu0 %vm255_vm1, %v3057_v17 }
  0x37   :  { %3003 = vmatmul.mubr.msk.bf16.gmra.mrb[24].mxu1 %vm255_vm1, %v3057_v17  ;;  %2940 = vmatprep.mubr.msk.bf16.mxu0 %vm255_vm1, %v3058_v18 }
  0x38   :  { %3006 = vmatprep.mubr.msk.bf16.mxu1 %vm255_vm1, %v3058_v18 }
  0x3e   :  { %2941 = vmatmul.mubr.msk.bf16.gmra.mrb[28].mxu0 %vm255_vm1, %v3059_v19 }
  0x3f   :  { %3007 = vmatmul.mubr.msk.bf16.gmra.mrb[28].mxu1 %vm255_vm1, %v3059_v19  ;;  %2944 = vmatprep.mubr.msk.bf16.mxu0 %vm255_vm1, %v3060_v20 }
  0x40   :  { %3010 = vmatprep.mubr.msk.bf16.mxu1 %vm255_vm1, %v3060_v20 }
  0x46   :  { %2945 = vmatmul.mubr.msk.bf16.gmra.mrb[32].mxu0 %vm255_vm1, %v3061_v21 }
  0x47   :  { %3011 = vmatmul.mubr.msk.bf16.gmra.mrb[32].mxu1 %vm255_vm1, %v3061_v21  ;;  %2948 = vmatprep.mubr.msk.bf16.mxu0 %vm255_vm1, %v3062_v22 }
  0x48   :  { %3014 = vmatprep.mubr.msk.bf16.mxu1 %vm255_vm1, %v3062_v22 }
  0x4e   :  { %2949 = vmatmul.mubr.msk.bf16.gmra.mrb[36].mxu0 %vm255_vm1, %v3063_v23 }
  0x4f   :  { %3015 = vmatmul.mubr.msk.bf16.gmra.mrb[36].mxu1 %vm255_vm1, %v3063_v23  ;;  %2952 = vmatprep.mubr.msk.bf16.mxu0 %vm255_vm1, %v3064_v24 }
  0x50   :  { %3018 = vmatprep.mubr.msk.bf16.mxu1 %vm255_vm1, %v3064_v24 }
  0x56   :  { %2953 = vmatmul.mubr.msk.bf16.gmra.mrb[40].mxu0 %vm255_vm1, %v3065_v25 }
  0x57   :  { %3019 = vmatmul.mubr.msk.bf16.gmra.mrb[40].mxu1 %vm255_vm1, %v3065_v25  ;;  %2956 = vmatprep.mubr.msk.bf16.mxu0 %vm255_vm1, %v3066_v26 }
  0x58   :  { %3022 = vmatprep.mubr.msk.bf16.mxu1 %vm255_vm1, %v3066_v26 }
  0x5e   :  { %2957 = vmatmul.mubr.msk.bf16.gmra.mrb[44].mxu0 %vm255_vm1, %v3067_v27 }
  0x5f   :  { %3023 = vmatmul.mubr.msk.bf16.gmra.mrb[44].mxu1 %vm255_vm1, %v3067_v27  ;;  %2960 = vmatprep.mubr.msk.bf16.mxu0 %vm255_vm1, %v3068_v28 }
  0x60   :  { %3026 = vmatprep.mubr.msk.bf16.mxu1 %vm255_vm1, %v3068_v28 }
  0x66   :  { %2961 = vmatmul.mubr.msk.bf16.gmra.mrb[48].mxu0 %vm255_vm1, %v3069_v29 }
  0x67   :  { %3027 = vmatmul.mubr.msk.bf16.gmra.mrb[48].mxu1 %vm255_vm1, %v3069_v29  ;;  %2964 = vmatprep.mubr.msk.bf16.mxu0 %vm255_vm1, %v3070_v30 }
  0x68   :  { %3030 = vmatprep.mubr.msk.bf16.mxu1 %vm255_vm1, %v3070_v30 }
  0x6e   :  { %2965 = vmatmul.mubr.msk.bf16.gmra.mrb[52].mxu0 %vm255_vm1, %v3071_v31 }
  0x6f   :  { %3031 = vmatmul.mubr.msk.bf16.gmra.mrb[52].mxu1 %vm255_vm1, %v3071_v31  ;;  %2968 = vmatprep.mubr.msk.bf16.mxu0 %vm255_vm1, %v3072_v32 }
  0x70   :  { %3034 = vmatprep.mubr.msk.bf16.mxu1 %vm255_vm1, %v3072_v32 }
  0x76   :  { %2969 = vmatmul.mubr.msk.bf16.gmra.mrb[56].mxu0 %vm255_vm1, %v3073_v33 }
  0x77   :  { %3035 = vmatmul.mubr.msk.bf16.gmra.mrb[56].mxu1 %vm255_vm1, %v3073_v33  ;;  %2972 = vmatprep.mubr.msk.bf16.mxu0 %vm255_vm1, %v3074_v34 }
  0x78   :  { %3038 = vmatprep.mubr.msk.bf16.mxu1 %vm255_vm1, %v3074_v34 }
  0x7e   :  { %2973 = vmatmul.mubr.msk.bf16.gmra.mrb[60].mxu0 %vm255_vm1, %v3075_v35 }
  0x7f   :  { %3039 = vmatmul.mubr.msk.bf16.gmra.mrb[60].mxu1 %vm255_vm1, %v3075_v35 }
  0xd9   :  { %v2914_v38 = vpop.f32.mrb[0].mxu0 }
  0xda   :  { %v2980_v39 = vpop.f32.mrb[0].mxu1  ;;  %v3804_v40 = vadd.f32 %v2914_v38, %v3796_v36  ;;  %v390_v42 = vpop.f32.mrb[1].mxu0 }
  0xdb   :  { %v3807_v41 = vadd.f32 %v2980_v39, %v3801_v37  ;;  %v690_v43 = vpop.f32.mrb[1].mxu1  ;;  %v3810_v44 = vadd.f32 %v3796_v36, %v390_v42  ;;  %v2915_v46 = vpop.f32.mrb[2].mxu0 }
  0xdc   :  { %v3813_v45 = vadd.f32 %v3801_v37, %v690_v43  ;;  %v2981_v47 = vpop.f32.mrb[2].mxu1  ;;  %v947_v48 = vsub.f32 0.0, %v3804_v40  ;;  %v3818_v50 = vadd.f32 %v2915_v46, %v3796_v36  ;;  %v393_v52 = vpop.f32.mrb[3].mxu0 }
  0xdd   :  { %v1716_v49 = vsub.f32 0.0, %v3807_v41  ;;  %v3821_v51 = vadd.f32 %v2981_v47, %v3801_v37  ;;  %v693_v53 = vpop.f32.mrb[3].mxu1  ;;  %v945_v54 = vsub.f32 0.0, %v3810_v44  ;;  %v3826_v56 = vadd.f32 %v3796_v36, %v393_v52 }
  0xde   :  { %v1714_v55 = vsub.f32 0.0, %v3813_v45  ;;  %v3829_v57 = vadd.f32 %v3801_v37, %v693_v53  ;;  %v1013_v58 = vmul.f32 1.442695, %v947_v48  ;;  %v948_v60 = vsub.f32 0.0, %v3818_v50 }
  0xdf   :  { %v1782_v59 = vmul.f32 1.442695, %v1716_v49  ;;  %v1717_v61 = vsub.f32 0.0, %v3821_v51  ;;  %v1009_v62 = vmul.f32 1.442695, %v945_v54  ;;  %v946_v0 = vsub.f32 0.0, %v3826_v56 }
  0xe0   :  { %v1778_v63 = vmul.f32 1.442695, %v1714_v55  ;;  %v1715_v1 = vsub.f32 0.0, %v3829_v57  ;;  %3076 = vpow2.f32 %v1013_v58  ;;  %v1015_v2 = vmul.f32 1.442695, %v948_v60 }
  0xe1   :  { %3078 = vpow2.f32 %v1782_v59  ;;  %v1784_v3 = vmul.f32 1.442695, %v1717_v61  ;;  %v2918_v4 = vpop.f32.mrb[4].mxu0  ;;  %v1011_v6 = vmul.f32 1.442695, %v946_v0 }
  0xe2   :  { %v2984_v5 = vpop.f32.mrb[4].mxu1  ;;  %3080 = vpow2.f32 %v1009_v62  ;;  %v3836_v7 = vadd.f32 %v2918_v4, %v3796_v36  ;;  %v406_v9 = vpop.f32.mrb[5].mxu0  ;;  %v1780_v11 = vmul.f32 1.442695, %v1715_v1 }
  0xe3   :  { %v3839_v8 = vadd.f32 %v2984_v5, %v3801_v37  ;;  %v706_v10 = vpop.f32.mrb[5].mxu1  ;;  %3082 = vpow2.f32 %v1778_v63  ;;  %v3842_v12 = vadd.f32 %v3796_v36, %v406_v9  ;;  %v2919_v14 = vpop.f32.mrb[6].mxu0 }
  0xe4   :  { %v3845_v13 = vadd.f32 %v3801_v37, %v706_v10  ;;  %v2985_v15 = vpop.f32.mrb[6].mxu1  ;;  %3084 = vpow2.f32 %v1015_v2  ;;  %v951_v16 = vsub.f32 0.0, %v3836_v7  ;;  %v3850_v18 = vadd.f32 %v2919_v14, %v3796_v36  ;;  %v409_v19 = vpop.f32.mrb[7].mxu0 }
  0xe5   :  { %v1720_v17 = vsub.f32 0.0, %v3839_v8  ;;  %v709_v20 = vpop.f32.mrb[7].mxu1  ;;  %3086 = vpow2.f32 %v1784_v3  ;;  %v949_v21 = vsub.f32 0.0, %v3842_v12  ;;  %v3855_v23 = vadd.f32 %v2985_v15, %v3801_v37 }
  0xe6   :  { %v1718_v22 = vsub.f32 0.0, %v3845_v13  ;;  %3088 = vpow2.f32 %v1011_v6  ;;  %v1021_v24 = vmul.f32 1.442695, %v951_v16  ;;  %v952_v26 = vsub.f32 0.0, %v3850_v18 }
  0xe7   :  { %v1790_v25 = vmul.f32 1.442695, %v1720_v17  ;;  %3090 = vpow2.f32 %v1780_v11  ;;  %v1017_v27 = vmul.f32 1.442695, %v949_v21  ;;  %v3859_v30 = vadd.f32 %v3796_v36, %v409_v19 }
  0xe8   :  { %v1786_v28 = vmul.f32 1.442695, %v1718_v22  ;;  %3092 = vpow2.f32 %v1021_v24  ;;  %v1023_v29 = vmul.f32 1.442695, %v952_v26  ;;  %v3862_v31 = vadd.f32 %v3801_v37, %v709_v20 }
  0xe9   :  { %3094 = vpow2.f32 %v1790_v25  ;;  %v1721_v32 = vsub.f32 0.0, %v3855_v23  ;;  %v2922_v33 = vpop.f32.mrb[8].mxu0  ;;  %v950_v38 = vsub.f32 0.0, %v3859_v30 }
  0xea   :  { %v2988_v34 = vpop.f32.mrb[8].mxu1  ;;  %v3077_v35 = vpop.eup %3076  ;;  %3096 = vpow2.f32 %v1017_v27  ;;  %v1719_v47 = vsub.f32 0.0, %v3862_v31  ;;  %v3868_v48 = vadd.f32 %v2922_v33, %v3796_v36 }
  0xeb   :  { %v422_v39 = vpop.f32.mrb[9].mxu0  ;;  %v722_v42 = vpop.f32.mrb[9].mxu1  ;;  %v1139_v46 = vadd.f32 1.0, %v3077_v35  ;;  %3098 = vpow2.f32 %v1786_v28  ;;  %v3871_v55 = vadd.f32 %v2988_v34, %v3801_v37  ;;  %v3876_v62 = vmul.f32 1.442695, %v1721_v32 }
  0xec   :  { %v3079_v43 = vpop.eup %3078  ;;  %v2923_v49 = vpop.f32.mrb[10].mxu0  ;;  %3100 = vpow2.f32 %v1023_v29  ;;  %v3874_v58 = vadd.f32 %v3796_v36, %v422_v39  ;;  %v3878_v2 = vmul.f32 1.442695, %v950_v38  ;;  %v3881_v3 = vadd.f32 %v3801_v37, %v722_v42 }
  0xed   :  { %v2989_v52 = vpop.f32.mrb[10].mxu1  ;;  %v3081_v53 = vpop.eup %3080  ;;  %v1908_v54 = vadd.f32 1.0, %v3079_v43  ;;  %3102 = vrcp.f32 %v1139_v46  ;;  %v3883_v6 = vmul.f32 1.442695, %v1719_v47  ;;  %v955_v9 = vsub.f32 0.0, %v3868_v48 }
  0xee   :  { %v425_v59 = vpop.f32.mrb[11].mxu0  ;;  %v3083_v60 = vpop.eup %3082  ;;  %v1137_v61 = vadd.f32 1.0, %v3081_v53  ;;  %v1724_v14 = vsub.f32 0.0, %v3871_v55  ;;  %v953_v15 = vsub.f32 0.0, %v3874_v58  ;;  %v3889_v19 = vadd.f32 %v2923_v49, %v3796_v36 }
  0xef   :  { %v725_v63 = vpop.f32.mrb[11].mxu1  ;;  %v3085_v0 = vpop.eup %3084  ;;  %3104 = vrcp.f32 %v1908_v54  ;;  %v1906_v1 = vadd.f32 1.0, %v3083_v60  ;;  %v3892_v20 = vadd.f32 %v2989_v52, %v3801_v37  ;;  %v1722_v26 = vsub.f32 0.0, %v3881_v3 }
  0xf0   :  { %v3087_v4 = vpop.eup %3086  ;;  %3106 = vrcp.f32 %v1137_v61  ;;  %v1140_v5 = vadd.f32 1.0, %v3085_v0  ;;  %v3896_v27 = vadd.f32 %v3796_v36, %v425_v59  ;;  %v3900_v34 = vmul.f32 1.442695, %v955_v9 }
  0xf1   :  { %v3089_v10 = vpop.eup %3088  ;;  %3108 = vrcp.f32 %v1906_v1  ;;  %v1909_v11 = vadd.f32 1.0, %v3087_v4  ;;  %v2926_v21 = vpop.f32.mrb[12].mxu0  ;;  %v956_v35 = vsub.f32 0.0, %v3889_v19  ;;  %v1725_v46 = vsub.f32 0.0, %v3892_v20 }
  0xf2   :  { %v3091_v16 = vpop.eup %3090  ;;  %3110 = vrcp.f32 %v1140_v5  ;;  %v1138_v17 = vadd.f32 1.0, %v3089_v10  ;;  %v2992_v22 = vpop.f32.mrb[12].mxu1  ;;  %v3909_v47 = vadd.f32 %v3801_v37, %v725_v63  ;;  %v1798_v59 = vmul.f32 1.442695, %v1724_v14 }
  0xf3   :  { %v3093_v24 = vpop.eup %3092  ;;  %3112 = vrcp.f32 %v1909_v11  ;;  %v1907_v25 = vadd.f32 1.0, %v3091_v16  ;;  %v438_v28 = vpop.f32.mrb[13].mxu0  ;;  %v954_v60 = vsub.f32 0.0, %v3896_v27  ;;  %v1025_v1 = vmul.f32 1.442695, %v953_v15 }
  0xf4   :  { %v3898_v29 = vpop.f32.mrb[13].mxu1  ;;  %v3095_v32 = vpop.eup %3094  ;;  %3114 = vrcp.f32 %v1138_v17  ;;  %v1143_v33 = vadd.f32 1.0, %v3093_v24  ;;  %v3916_v4 = vmul.f32 1.442695, %v1722_v26  ;;  %v3918_v9 = vmul.f32 1.442695, %v956_v35 }
  0xf5   :  { %v3903_v38 = vpop.f32.mrb[14].mxu0  ;;  %v3905_v39 = vpop.f32.mrb[14].mxu1  ;;  %3116 = vrcp.f32 %v1907_v25  ;;  %v1912_v43 = vadd.f32 1.0, %v3095_v32  ;;  %v1723_v10 = vsub.f32 0.0, %v3909_v47  ;;  %v3922_v14 = vmul.f32 1.442695, %v1725_v46 }
  0xf6   :  { %v3097_v42 = vpop.eup %3096  ;;  %v3911_v49 = vpop.f32.mrb[15].mxu0  ;;  %3118 = vrcp.f32 %v1143_v33  ;;  %v3925_v17 = vadd.f32 %v2926_v21, %v3796_v36  ;;  %v3928_v25 = vmul.f32 1.442695, %v954_v60  ;;  %v3931_v26 = vadd.f32 %v2992_v22, %v3801_v37 }
  0xf7   :  { %v3913_v52 = vpop.f32.mrb[15].mxu1  ;;  %v3099_v53 = vpop.eup %3098  ;;  %v1141_v54 = vadd.f32 1.0, %v3097_v42  ;;  %3120 = vrcp.f32 %v1912_v43  ;;  %v3940_v21 = vadd.f32 %v3796_v36, %v438_v28 }
  0xf8   :  { %v3101_v61 = vpop.eup %3100  ;;  %v1910_v0 = vadd.f32 1.0, %v3099_v53 }
  0xf9   :  { %v3103_v5 = vpop.eup %3102  ;;  %3122 = vrcp.f32 %v1141_v54  ;;  %v1144_v63 = vadd.f32 1.0, %v3101_v61  ;;  %v3933_v32 = vpop.f32.mrb[16].mxu0  ;;  %v3948_v54 = vmul.f32 1.442695, %v1723_v10 }
  0xfa   :  { %v3105_v11 = vpop.eup %3104  ;;  %v1331_v16 = vmul.f32 %v3103_v5, %v3804_v40  ;;  %3124 = vrcp.f32 %v1910_v0  ;;  %v3935_v33 = vpop.f32.mrb[16].mxu1 }
  0xfb   :  { %v3107_v24 = vpop.eup %3106  ;;  %v2100_v15 = vmul.f32 %v3105_v11, %v3807_v41  ;;  %3126 = vrcp.f32 %v1144_v63  ;;  %v3942_v41 = vpop.f32.mrb[17].mxu0 }
  0xfc   :  { %v3109_v40 = vpop.eup %3108  ;;  %v2718_v35 = vpack.c.bf16 %v1331_v16, %v1331_v16  ;;  %v1329_v42 = vmul.f32 %v3107_v24, %v3810_v44  ;;  %3128 = vpow2.f32 %v3876_v62  ;;  %v3944_v43 = vpop.f32.mrb[17].mxu1  ;;  %v957_v24 = vsub.f32 0.0, %v3940_v21 }
  0xfd   :  { %v3111_v46 = vpop.eup %3110  ;;  %v2782_v22 = vpack.c.bf16 %v2100_v15, %v2100_v15  ;;  %v2098_v53 = vmul.f32 %v3109_v40, %v3813_v45  ;;  %3130 = vpow2.f32 %v3878_v2  ;;  %v3950_v60 = vpop.f32.mrb[18].mxu0  ;;  %v959_v45 = vsub.f32 0.0, %v3925_v17 }
  0xfe   :  { %v3952_v44 = vpop.f32.mrb[18].mxu1  ;;  %v3113_v62 = vpop.eup %3112  ;;  %1652 = vst.msk [vmem:[%s5370_s5 + $0x8] sm:$0xf] %vm1649_vm2, %v2718_v35  ;;  %v2716_v28 = vpack.c.bf16 %v1329_v42, %v1329_v42  ;;  %v1332_v61 = vmul.f32 %v3111_v46, %v3818_v50  ;;  %3132 = vpow2.f32 %v3883_v6  ;;  %v1728_v50 = vsub.f32 0.0, %v3931_v26 }
  0xff   :  { %v3961_v2 = vpop.f32.mrb[19].mxu0  ;;  %v3963_v0 = vpop.f32.mrb[19].mxu1  ;;  %2420 = vst.msk [vmem:[%s5371_s6 + $0x8] sm:$0xf] %vm1649_vm2, %v2782_v22  ;;  %v2780_v63 = vpack.c.bf16 %v2098_v53, %v2098_v53  ;;  %v2101_v10 = vmul.f32 %v3113_v62, %v3821_v51  ;;  %3134 = vpow2.f32 %v3900_v34  ;;  %v3985_v40 = vadd.f32 %v3801_v37, %v3898_v29 }
 0x100   :  { %v3115_v5 = vpop.eup %3114  ;;  %1650 = vst.msk [vmem:[%s5370_s5] sm:$0xf] %vm1649_vm2, %v2716_v28  ;;  %v2719_v11 = vpack.c.bf16 %v1332_v61, %v1332_v61  ;;  %3136 = vpow2.f32 %v1798_v59  ;;  %v1037_v42 = vmul.f32 1.442695, %v959_v45 }
 0x101   :  { %v3117_v6 = vpop.eup %3116  ;;  %v1330_v16 = vmul.f32 %v3115_v5, %v3826_v56  ;;  %2418 = vst.msk [vmem:[%s5371_s6] sm:$0xf] %vm1649_vm2, %v2780_v63  ;;  %v2783_v51 = vpack.c.bf16 %v2101_v10, %v2101_v10  ;;  %3138 = vpow2.f32 %v1025_v1  ;;  %v1806_v1 = vmul.f32 1.442695, %v1728_v50  ;;  %v3999_v22 = vpop.f32.mrb[20].mxu0 }
 0x102   :  { %v3119_v15 = vpop.eup %3118  ;;  %v2099_v34 = vmul.f32 %v3117_v6, %v3829_v57  ;;  %1653 = vst.msk [vmem:[%s5370_s5 + $0xc] sm:$0xf] %vm1649_vm2, %v2719_v11  ;;  %3140 = vpow2.f32 %v3916_v4  ;;  %v4001_v53 = vpop.f32.mrb[20].mxu1 }
 0x103   :  { %v3121_v35 = vpop.eup %3120  ;;  %v2717_v56 = vpack.c.bf16 %v1330_v16, %v1330_v16  ;;  %v1335_v59 = vmul.f32 %v3119_v15, %v3836_v7  ;;  %2421 = vst.msk [vmem:[%s5371_s6 + $0xc] sm:$0xf] %vm1649_vm2, %v2783_v51  ;;  %3142 = vpow2.f32 %v3918_v9  ;;  %v4013_v9 = vpop.f32.mrb[21].mxu0 }
 0x104   :  { %v3123_v46 = vpop.eup %3122  ;;  %v2781_v57 = vpack.c.bf16 %v2099_v34, %v2099_v34  ;;  %v2104_v29 = vmul.f32 %v3121_v35, %v3839_v8  ;;  %3144 = vpow2.f32 %v3922_v14  ;;  %v4011_v8 = vadd.f32 %v3903_v38, %v3796_v36  ;;  %v4015_v28 = vpop.f32.mrb[21].mxu1 }
 0x105   :  { %v3125_v7 = vpop.eup %3124  ;;  %1651 = vst.msk [vmem:[%s5370_s5 + $0x4] sm:$0xf] %vm1649_vm2, %v2717_v56  ;;  %v2722_v4 = vpack.c.bf16 %v1335_v59, %v1335_v59  ;;  %v1333_v62 = vmul.f32 %v3123_v46, %v3842_v12  ;;  %3146 = vpow2.f32 %v3928_v25  ;;  %v1726_v12 = vsub.f32 0.0, %v3985_v40  ;;  %v4024_v14 = vpop.f32.mrb[22].mxu0 }
 0x106   :  { %v3127_v61 = vpop.eup %3126  ;;  %2419 = vst.msk [vmem:[%s5371_s6 + $0x4] sm:$0xf] %vm1649_vm2, %v2781_v57  ;;  %v2786_v45 = vpack.c.bf16 %v2104_v29, %v2104_v29  ;;  %v2102_v5 = vmul.f32 %v3125_v7, %v3845_v13  ;;  %v4026_v38 = vpop.f32.mrb[22].mxu1  ;;  %3148 = vpow2.f32 %v3948_v54  ;;  %v4036_v13 = vadd.f32 %v3905_v39, %v3801_v37 }
 0x107   :  { %v3129_v63 = vpop.eup %3128  ;;  %1656 = vst.msk [vmem:[%s5370_s5 + $0x18] sm:$0xf] %vm1649_vm2, %v2722_v4  ;;  %v2720_v10 = vpack.c.bf16 %v1333_v62, %v1333_v62  ;;  %v1336_v50 = vmul.f32 %v3127_v61, %v3850_v18  ;;  %v4038_v25 = vpop.f32.mrb[23].mxu0  ;;  %3150 = vpow2.f32 %v1037_v42  ;;  %v4048_v18 = vadd.f32 %v3796_v36, %v3911_v49 }
 0x108   :  { %v4040_v6 = vpop.f32.mrb[23].mxu1  ;;  %v3131_v11 = vpop.eup %3130  ;;  %2424 = vst.msk [vmem:[%s5371_s6 + $0x18] sm:$0xf] %vm1649_vm2, %v2786_v45  ;;  %v2784_v16 = vpack.c.bf16 %v2102_v5, %v2102_v5  ;;  %v1913_v15 = vadd.f32 1.0, %v3129_v63  ;;  %3152 = vpow2.f32 %v1806_v1  ;;  %v960_v34 = vsub.f32 0.0, %v4011_v8 }
 0x109   :  { %v3133_v54 = vpop.eup %3132  ;;  %1654 = vst.msk [vmem:[%s5370_s5 + $0x10] sm:$0xf] %vm1649_vm2, %v2720_v10  ;;  %v2723_v39 = vpack.c.bf16 %v1336_v50, %v1336_v50  ;;  %v1142_v51 = vadd.f32 1.0, %v3131_v11  ;;  %v4059_v56 = vmul.f32 1.442695, %v957_v24  ;;  %v1729_v59 = vsub.f32 0.0, %v4036_v13 }
 0x10a   :  { %v3135_v35 = vpop.eup %3134  ;;  %2422 = vst.msk [vmem:[%s5371_s6 + $0x10] sm:$0xf] %vm1649_vm2, %v2784_v16  ;;  %3154 = vrcp.f32 %v1913_v15  ;;  %v1911_v49 = vadd.f32 1.0, %v3133_v54  ;;  %v958_v57 = vsub.f32 0.0, %v4048_v18  ;;  %v4069_v29 = vadd.f32 %v3801_v37, %v3913_v52  ;;  %v4077_v62 = vpop.f32.mrb[24].mxu0 }
 0x10b   :  { %v3137_v42 = vpop.eup %3136  ;;  %1657 = vst.msk [vmem:[%s5370_s5 + $0x1c] sm:$0xf] %vm1649_vm2, %v2723_v39  ;;  %3156 = vrcp.f32 %v1142_v51  ;;  %v1147_v46 = vadd.f32 1.0, %v3135_v35  ;;  %v4071_v7 = vmul.f32 1.442695, %v1726_v12  ;;  %v4075_v4 = vadd.f32 %v3933_v32, %v3796_v36  ;;  %v4079_v61 = vpop.f32.mrb[24].mxu1 }
 0x10c   :  { %v3139_v1 = vpop.eup %3138  ;;  %3158 = vrcp.f32 %v1911_v49  ;;  %v1916_v24 = vadd.f32 1.0, %v3137_v42  ;;  %v4081_v63 = vmul.f32 1.442695, %v960_v34  ;;  %v4085_v52 = vadd.f32 %v3935_v33, %v3801_v37  ;;  %v4087_v10 = vpop.f32.mrb[25].mxu0 }
 0x10d   :  { %v3141_v45 = vpop.eup %3140  ;;  %3160 = vrcp.f32 %v1147_v46  ;;  %v1145_v5 = vadd.f32 1.0, %v3139_v1  ;;  %v4089_v12 = vpop.f32.mrb[25].mxu1  ;;  %v4091_v11 = vmul.f32 1.442695, %v1729_v59  ;;  %v4095_v16 = vadd.f32 %v3796_v36, %v3942_v41 }
 0x10e   :  { %5375 = vst [vmem:[#allocation2_spill] sm:$0xff] %v4085_v52  ;;  %v3143_v50 = vpop.eup %3142  ;;  %3162 = vrcp.f32 %v1916_v24  ;;  %v1914_v32 = vadd.f32 1.0, %v3141_v45  ;;  %v4097_v15 = vpop.f32.mrb[26].mxu0  ;;  %v4101_v51 = vmul.f32 1.442695, %v958_v57  ;;  %v1727_v34 = vsub.f32 0.0, %v4069_v29 }
 0x10f   :  { %5376 = vst [vmem:[#allocation3_spill] sm:$0xff] %v4095_v16  ;;  %v4099_v54 = vpop.f32.mrb[26].mxu1  ;;  %v3145_v39 = vpop.eup %3144  ;;  %3164 = vrcp.f32 %v1145_v5  ;;  %v1148_v33 = vadd.f32 1.0, %v3143_v50  ;;  %v963_v41 = vsub.f32 0.0, %v4075_v4  ;;  %v4111_v46 = vadd.f32 %v3801_v37, %v3944_v43 }
 0x110   :  { %5377 = vst [vmem:[#allocation4_spill] sm:$0xff] %v4099_v54  ;;  %v4104_v35 = vpop.f32.mrb[27].mxu0  ;;  %v4106_v49 = vpop.f32.mrb[27].mxu1  ;;  %3166 = vrcp.f32 %v1914_v32  ;;  %v1917_v42 = vadd.f32 1.0, %v3145_v39  ;;  %v1732_v57 = vsub.f32 0.0, %v4085_v52  ;;  %v4116_v45 = vadd.f32 %v3950_v60, %v3796_v36 }
 0x111   :  { %5378 = vst [vmem:[#allocation5_spill] sm:$0xff] %v4104_v35  ;;  %5379 = vst [vmem:[#allocation6_spill] sm:$0xff] %v4106_v49  ;;  %v3147_v59 = vpop.eup %3146  ;;  %3168 = vrcp.f32 %v1148_v33  ;;  %v961_v32 = vsub.f32 0.0, %v4095_v16  ;;  %v1730_v39 = vsub.f32 0.0, %v4111_v46  ;;  %v1804_v35 = vmul.f32 1.442695, %v1727_v34 }
 0x112   :  { %5380 = vst [vmem:[#allocation7_spill] sm:$0xff] %v4111_v46  ;;  %v3149_v1 = vpop.eup %3148  ;;  %v1146_v24 = vadd.f32 1.0, %v3147_v59  ;;  %3170 = vrcp.f32 %v1917_v42  ;;  %v4122_v33 = vadd.f32 %v3952_v44, %v3801_v37  ;;  %v1045_v60 = vmul.f32 1.442695, %v963_v41  ;;  %v4130_v16 = vpop.f32.mrb[28].mxu1 }
 0x113   :  { %v3151_v5 = vpop.eup %3150  ;;  %v1915_v50 = vadd.f32 1.0, %v3149_v1  ;;  %v4126_v42 = vadd.f32 %v3796_v36, %v3961_v2  ;;  %v4128_v1 = vpop.f32.mrb[28].mxu0  ;;  %5382 = vst [vmem:[#allocation9_spill] sm:$0xff] %v4130_v16  ;;  %v1814_v34 = vmul.f32 1.442695, %v1732_v57  ;;  %v964_v44 = vsub.f32 0.0, %v4116_v45 }
 0x114   :  { %v3153_v49 = vpop.eup %3152  ;;  %3172 = vrcp.f32 %v1146_v24  ;;  %v1151_v43 = vadd.f32 1.0, %v3151_v5  ;;  %5381 = vst [vmem:[#allocation8_spill] sm:$0xff] %v4128_v1  ;;  %v4134_v5 = vpop.f32.mrb[29].mxu0  ;;  %v1041_v2 = vmul.f32 1.442695, %v961_v32 }
 0x115   :  { %v3155_v59 = vpop.eup %3154  ;;  %3174 = vrcp.f32 %v1915_v50  ;;  %v1920_v54 = vadd.f32 1.0, %v3153_v49  ;;  %5383 = vst [vmem:[#allocation10_spill] sm:$0xff] %v4134_v5  ;;  %v4136_v50 = vpop.f32.mrb[29].mxu1  ;;  %v4139_v52 = vmul.f32 1.442695, %v1730_v39  ;;  %v962_v32 = vsub.f32 0.0, %v4126_v42 }
 0x116   :  { %v3157_v46 = vpop.eup %3156  ;;  %v2105_v24 = vmul.f32 %v3155_v59, %v3855_v23  ;;  %3176 = vrcp.f32 %v1151_v43  ;;  %5384 = vst [vmem:[#allocation11_spill] sm:$0xff] %v4136_v50  ;;  %v4141_v1 = vpop.f32.mrb[30].mxu0  ;;  %v1733_v59 = vsub.f32 0.0, %v4122_v33 }
 0x117   :  { %v3159_v49 = vpop.eup %3158  ;;  %v1334_v41 = vmul.f32 %v3157_v46, %v3859_v30  ;;  %3178 = vrcp.f32 %v1920_v54  ;;  %v4143_v16 = vpop.f32.mrb[30].mxu1 }
 0x118   :  { %v3161_v23 = vpop.eup %3160  ;;  %v2787_v43 = vpack.c.bf16 %v2105_v24, %v2105_v24  ;;  %v2103_v57 = vmul.f32 %v3159_v49, %v3862_v31  ;;  %3180 = vpow2.f32 %v4059_v56  ;;  %v4148_v50 = vpop.f32.mrb[31].mxu0  ;;  %v1047_v24 = vmul.f32 1.442695, %v964_v44 }
 0x119   :  { %v4150_v5 = vpop.f32.mrb[31].mxu1  ;;  %v3163_v30 = vpop.eup %3162  ;;  %v2721_v54 = vpack.c.bf16 %v1334_v41, %v1334_v41  ;;  %v1339_v46 = vmul.f32 %v3161_v23, %v3868_v48  ;;  %3182 = vpow2.f32 %v4071_v7  ;;  %v4169_v41 = vadd.f32 %v3801_v37, %v3963_v0 }
 0x11a   :  { %v3165_v39 = vpop.eup %3164  ;;  %2425 = vst.msk [vmem:[%s5371_s6 + $0x1c] sm:$0xf] %vm1649_vm2, %v2787_v43  ;;  %v2785_v31 = vpack.c.bf16 %v2103_v57, %v2103_v57  ;;  %v2108_v56 = vmul.f32 %v3163_v30, %v3871_v55  ;;  %3184 = vpow2.f32 %v4081_v63  ;;  %v1816_v44 = vmul.f32 1.442695, %v1733_v59  ;;  %v4182_v57 = vpop.f32.mrb[32].mxu0 }
 0x11b   :  { %v3167_v49 = vpop.eup %3166  ;;  %1655 = vst.msk [vmem:[%s5370_s5 + $0x14] sm:$0xf] %vm1649_vm2, %v2721_v54  ;;  %v2726_v48 = vpack.c.bf16 %v1339_v46, %v1339_v46  ;;  %v1337_v7 = vmul.f32 %v3165_v39, %v3874_v58  ;;  %3186 = vpow2.f32 %v4091_v11  ;;  %v1043_v11 = vmul.f32 1.442695, %v962_v32  ;;  %v4184_v30 = vpop.f32.mrb[32].mxu1 }
 0x11c   :  { %v3169_v23 = vpop.eup %3168  ;;  %2423 = vst.msk [vmem:[%s5371_s6 + $0x14] sm:$0xf] %vm1649_vm2, %v2785_v31  ;;  %v2790_v55 = vpack.c.bf16 %v2108_v56, %v2108_v56  ;;  %v2106_v63 = vmul.f32 %v3167_v49, %v3881_v3  ;;  %3188 = vpow2.f32 %v4101_v51  ;;  %v4193_v59 = vadd.f32 %v3999_v22, %v3796_v36 }
 0x11d   :  { %v3171_v43 = vpop.eup %3170  ;;  %1660 = vst.msk [vmem:[%s5370_s5 + $0x28] sm:$0xf] %vm1649_vm2, %v2726_v48  ;;  %v2724_v58 = vpack.c.bf16 %v1337_v7, %v1337_v7  ;;  %v1340_v0 = vmul.f32 %v3169_v23, %v3889_v19  ;;  %3190 = vpow2.f32 %v1804_v35  ;;  %v4195_v19 = vpop.f32.mrb[33].mxu0 }
 0x11e   :  { %v3173_v54 = vpop.eup %3172  ;;  %2428 = vst.msk [vmem:[%s5371_s6 + $0x28] sm:$0xf] %vm1649_vm2, %v2790_v55  ;;  %v2788_v3 = vpack.c.bf16 %v2106_v63, %v2106_v63  ;;  %v2109_v51 = vmul.f32 %v3171_v43, %v3892_v20  ;;  %3192 = vpow2.f32 %v1045_v60  ;;  %v4197_v35 = vpop.f32.mrb[33].mxu1  ;;  %v4206_v20 = vadd.f32 %v4001_v53, %v3801_v37 }
 0x11f   :  { %v3175_v46 = vpop.eup %3174  ;;  %1658 = vst.msk [vmem:[%s5370_s5 + $0x20] sm:$0xf] %vm1649_vm2, %v2724_v58  ;;  %v2727_v32 = vpack.c.bf16 %v1340_v0, %v1340_v0  ;;  %v1338_v39 = vmul.f32 %v3173_v54, %v3896_v27  ;;  %3194 = vpow2.f32 %v1814_v34  ;;  %v4208_v22 = vpop.f32.mrb[34].mxu0  ;;  %v1731_v27 = vsub.f32 0.0, %v4169_v41 }
 0x120   :  { %v4210_v60 = vpop.f32.mrb[34].mxu1  ;;  %v3177_v31 = vpop.eup %3176  ;;  %2426 = vst.msk [vmem:[%s5371_s6 + $0x20] sm:$0xf] %vm1649_vm2, %v2788_v3  ;;  %v2791_v56 = vpack.c.bf16 %v2109_v51, %v2109_v51  ;;  %v2107_v49 = vmul.f32 %v3175_v46, %v3909_v47  ;;  %3196 = vpow2.f32 %v1041_v2  ;;  %v4230_v47 = vadd.f32 %v3796_v36, %v4013_v9 }
 0x121   :  { %v4218_v34 = vpop.f32.mrb[35].mxu0  ;;  %v4220_v53 = vpop.f32.mrb[35].mxu1  ;;  %1661 = vst.msk [vmem:[%s5370_s5 + $0x2c] sm:$0xf] %vm1649_vm2, %v2727_v32  ;;  %v2725_v7 = vpack.c.bf16 %v1338_v39, %v1338_v39  ;;  %v1343_v23 = vmul.f32 %v3177_v31, %v3925_v17  ;;  %3198 = vpow2.f32 %v4139_v52  ;;  %v967_v43 = vsub.f32 0.0, %v4193_v59 }
 0x122   :  { %v3179_v48 = vpop.eup %3178  ;;  %2429 = vst.msk [vmem:[%s5371_s6 + $0x2c] sm:$0xf] %vm1649_vm2, %v2791_v56  ;;  %v2789_v55 = vpack.c.bf16 %v2107_v49, %v2107_v49  ;;  %3200 = vpow2.f32 %v1047_v24  ;;  %v1736_v52 = vsub.f32 0.0, %v4206_v20  ;;  %v4249_v54 = vadd.f32 %v3801_v37, %v4015_v28  ;;  %v4260_v32 = vpop.f32.mrb[36].mxu0 }
 0x123   :  { %v3181_v2 = vpop.eup %3180  ;;  %v2112_v63 = vmul.f32 %v3179_v48, %v3931_v26  ;;  %1659 = vst.msk [vmem:[%s5370_s5 + $0x24] sm:$0xf] %vm1649_vm2, %v2725_v7  ;;  %v2730_v17 = vpack.c.bf16 %v1343_v23, %v1343_v23  ;;  %3202 = vpow2.f32 %v1816_v44  ;;  %v965_v51 = vsub.f32 0.0, %v4230_v47  ;;  %v4271_v49 = vpop.f32.mrb[37].mxu0 }
 0x124   :  { %v3183_v58 = vpop.eup %3182  ;;  %v1149_v9 = vadd.f32 1.0, %v3181_v2  ;;  %2427 = vst.msk [vmem:[%s5371_s6 + $0x24] sm:$0xf] %vm1649_vm2, %v2789_v55  ;;  %3204 = vpow2.f32 %v1043_v11  ;;  %v4258_v46 = vadd.f32 %v4024_v14, %v3796_v36  ;;  %v4262_v11 = vpop.f32.mrb[36].mxu1  ;;  %v4268_v31 = vmul.f32 1.442695, %v1731_v27 }
 0x125   :  { %v3185_v0 = vpop.eup %3184  ;;  %v2794_v26 = vpack.c.bf16 %v2112_v63, %v2112_v63  ;;  %v1918_v24 = vadd.f32 1.0, %v3183_v58  ;;  %1664 = vst.msk [vmem:[%s5370_s5 + $0x38] sm:$0xf] %vm1649_vm2, %v2730_v17  ;;  %5385 = vst [vmem:[#allocation12_spill] sm:$0xff] %v4262_v11  ;;  %v1734_v56 = vsub.f32 0.0, %v4249_v54  ;;  %v4273_v14 = vpop.f32.mrb[37].mxu1  ;;  %v4279_v2 = vadd.f32 %v4026_v38, %v3801_v37 }
 0x126   :  { %v3187_v3 = vpop.eup %3186  ;;  %3206 = vrcp.f32 %v1149_v9  ;;  %v1152_v44 = vadd.f32 1.0, %v3185_v0  ;;  %5386 = vst [vmem:[#allocation13_spill] sm:$0xff] %v4271_v49  ;;  %5387 = vst [vmem:[#allocation14_spill] sm:$0xff] %v4273_v14  ;;  %v4275_v23 = vmul.f32 1.442695, %v967_v43  ;;  %v4281_v55 = vpop.f32.mrb[38].mxu0  ;;  %v4289_v9 = vadd.f32 %v3796_v36, %v4038_v25 }
 0x127   :  { %v3189_v28 = vpop.eup %3188  ;;  %2432 = vst.msk [vmem:[%s5371_s6 + $0x38] sm:$0xf] %vm1649_vm2, %v2794_v26  ;;  %3208 = vrcp.f32 %v1918_v24  ;;  %v1921_v39 = vadd.f32 1.0, %v3187_v3  ;;  %5388 = vst [vmem:[#allocation15_spill] sm:$0xff] %v4281_v55  ;;  %v4283_v63 = vpop.f32.mrb[38].mxu1  ;;  %v968_v3 = vsub.f32 0.0, %v4258_v46  ;;  %v4302_v25 = vadd.f32 %v3801_v37, %v4040_v6 }
 0x128   :  { %v3191_v48 = vpop.eup %3190  ;;  %3210 = vrcp.f32 %v1152_v44  ;;  %v1150_v7 = vadd.f32 1.0, %v3189_v28  ;;  %5389 = vst [vmem:[#allocation16_spill] sm:$0xff] %v4283_v63  ;;  %v4285_v17 = vmul.f32 1.442695, %v1736_v52  ;;  %v4291_v0 = vpop.f32.mrb[39].mxu0 }
 0x129   :  { %v3193_v27 = vpop.eup %3192  ;;  %3212 = vrcp.f32 %v1921_v39  ;;  %v1919_v58 = vadd.f32 1.0, %v3191_v48  ;;  %5390 = vst [vmem:[#allocation17_spill] sm:$0xff] %v4291_v0  ;;  %v4293_v43 = vpop.f32.mrb[39].mxu1  ;;  %v4295_v24 = vmul.f32 1.442695, %v965_v51  ;;  %v4307_v51 = vadd.f32 %v4077_v62, %v3796_v36 }
 0x12a   :  { %5391 = vst [vmem:[#allocation18_spill] sm:$0xff] %v4293_v43  ;;  %v3195_v26 = vpop.eup %3194  ;;  %3214 = vrcp.f32 %v1150_v7  ;;  %v1155_v38 = vadd.f32 1.0, %v3193_v27  ;;  %v4298_v52 = vmul.f32 1.442695, %v1734_v56  ;;  %v1737_v43 = vsub.f32 0.0, %v4279_v2  ;;  %v4318_v62 = vpop.f32.mrb[40].mxu1 }
 0x12b   :  { %v3197_v44 = vpop.eup %3196  ;;  %3216 = vrcp.f32 %v1919_v58  ;;  %v1924_v28 = vadd.f32 1.0, %v3195_v26  ;;  %v966_v58 = vsub.f32 0.0, %v4289_v9  ;;  %v1735_v56 = vsub.f32 0.0, %v4302_v25  ;;  %5393 = vst [vmem:[#allocation20_spill] sm:$0xff] %v4318_v62  ;;  %v4322_v14 = vpop.f32.mrb[41].mxu1 }
 0x12c   :  { %v3199_v39 = vpop.eup %3198  ;;  %3218 = vrcp.f32 %v1155_v38  ;;  %v1153_v48 = vadd.f32 1.0, %v3197_v44  ;;  %v971_v0 = vsub.f32 0.0, %v4307_v51  ;;  %v4314_v38 = vadd.f32 %v4079_v61, %v3801_v37  ;;  %v4316_v44 = vpop.f32.mrb[40].mxu0  ;;  %5394 = vst [vmem:[#allocation21_spill] sm:$0xff] %v4322_v14 }
 0x12d   :  { %v3201_v7 = vpop.eup %3200  ;;  %3220 = vrcp.f32 %v1924_v28  ;;  %v1922_v27 = vadd.f32 1.0, %v3199_v39  ;;  %5392 = vst [vmem:[#allocation19_spill] sm:$0xff] %v4316_v44  ;;  %v1055_v39 = vmul.f32 1.442695, %v968_v3  ;;  %v4320_v55 = vpop.f32.mrb[41].mxu0  ;;  %v4326_v61 = vadd.f32 %v3796_v36, %v4087_v10 }
 0x12e   :  { %v3203_v26 = vpop.eup %3202  ;;  %3222 = vrcp.f32 %v1153_v48  ;;  %v1156_v6 = vadd.f32 1.0, %v3201_v7  ;;  %v1824_v49 = vmul.f32 1.442695, %v1737_v43  ;;  %v4328_v11 = vpop.f32.mrb[42].mxu0  ;;  %v1051_v3 = vmul.f32 1.442695, %v966_v58 }
 0x12f   :  { %v3205_v63 = vpop.eup %3204  ;;  %3224 = vrcp.f32 %v1922_v27  ;;  %v1925_v28 = vadd.f32 1.0, %v3203_v26  ;;  %5395 = vst [vmem:[#allocation22_spill] sm:$0xff] %v4328_v11  ;;  %v4330_v44 = vpop.f32.mrb[42].mxu1  ;;  %v4333_v26 = vmul.f32 1.442695, %v1735_v56  ;;  %v1740_v10 = vsub.f32 0.0, %v4314_v38 }
 0x130   :  { %v3207_v48 = vpop.eup %3206  ;;  %3226 = vrcp.f32 %v1156_v6  ;;  %v1154_v7 = vadd.f32 1.0, %v3205_v63  ;;  %5396 = vst [vmem:[#allocation23_spill] sm:$0xff] %v4330_v44  ;;  %v4335_v14 = vpop.f32.mrb[43].mxu0  ;;  %v4340_v36 = vmul.f32 1.442695, %v971_v0  ;;  %v4347_v58 = vadd.f32 %v3801_v37, %v4089_v12 }
 0x131   :  { %v3209_v62 = vpop.eup %3208  ;;  %v1341_v27 = vmul.f32 %v3207_v48, %v3940_v21  ;;  %3228 = vrcp.f32 %v1925_v28  ;;  %v4337_v6 = vpop.f32.mrb[43].mxu1  ;;  %v4361_v37 = vld [vmem:[%s5368_s2] ss:$0 sm:$0xff] }
 0x132   :  { %v3211_v63 = vpop.eup %3210  ;;  %v2110_v43 = vmul.f32 %v3209_v62, %v3985_v40  ;;  %3230 = vrcp.f32 %v1154_v7  ;;  %v969_v40 = vsub.f32 0.0, %v4326_v61 }
 0x133   :  { %v3213_v44 = vpop.eup %3212  ;;  %v2728_v11 = vpack.c.bf16 %v1341_v27, %v1341_v27  ;;  %v1344_v21 = vmul.f32 %v3211_v63, %v4011_v8  ;;  %3232 = vpow2.f32 %v4268_v31 }
 0x134   :  { %v3215_v56 = vpop.eup %3214  ;;  %v2792_v28 = vpack.c.bf16 %v2110_v43, %v2110_v43  ;;  %v2113_v48 = vmul.f32 %v3213_v44, %v4036_v13  ;;  %3234 = vpow2.f32 %v4275_v23  ;;  %v4365_v13 = vadd.f32 %v4361_v37, %v4097_v15  ;;  %v4375_v44 = vpop.f32.mrb[44].mxu1 }
 0x135   :  { %v3217_v0 = vpop.eup %3216  ;;  %1662 = vst.msk [vmem:[%s5370_s5 + $0x30] sm:$0xf] %vm1649_vm2, %v2728_v11  ;;  %v2731_v8 = vpack.c.bf16 %v1344_v21, %v1344_v21  ;;  %v1342_v31 = vmul.f32 %v3215_v56, %v4048_v18  ;;  %3236 = vpow2.f32 %v4285_v17  ;;  %v1830_v23 = vmul.f32 1.442695, %v1740_v10  ;;  %v4373_v17 = vpop.f32.mrb[44].mxu0  ;;  %5398 = vst [vmem:[#allocation25_spill] sm:$0xff] %v4375_v44 }
 0x136   :  { %v3219_v12 = vpop.eup %3218  ;;  %2430 = vst.msk [vmem:[%s5371_s6 + $0x30] sm:$0xf] %vm1649_vm2, %v2792_v28  ;;  %v2795_v11 = vpack.c.bf16 %v2113_v48, %v2113_v48  ;;  %v2111_v18 = vmul.f32 %v3217_v0, %v4069_v29  ;;  %3238 = vpow2.f32 %v4295_v24  ;;  %5397 = vst [vmem:[#allocation24_spill] sm:$0xff] %v4373_v17  ;;  %v1738_v29 = vsub.f32 0.0, %v4347_v58  ;;  %v4384_v27 = vpop.f32.mrb[45].mxu0  ;;  %v5401_v10 = vld [vmem:[#allocation2_spill] sm:$0xff] }
 0x137   :  { %v3221_v62 = vpop.eup %3220  ;;  %1665 = vst.msk [vmem:[%s5370_s5 + $0x3c] sm:$0xf] %vm1649_vm2, %v2731_v8  ;;  %v2729_v15 = vpack.c.bf16 %v1342_v31, %v1342_v31  ;;  %v1347_v7 = vmul.f32 %v3219_v12, %v4075_v4  ;;  %3240 = vpow2.f32 %v4298_v52  ;;  %5399 = vst [vmem:[#allocation26_spill] sm:$0xff] %v4384_v27  ;;  %v4386_v24 = vpop.f32.mrb[45].mxu1  ;;  %v1057_v56 = vmul.f32 1.442695, %v969_v40 }
 0x138   :  { %5400 = vst [vmem:[#allocation27_spill] sm:$0xff] %v4386_v24  ;;  %v3223_v63 = vpop.eup %3222  ;;  %2433 = vst.msk [vmem:[%s5371_s6 + $0x3c] sm:$0xf] %vm1649_vm2, %v2795_v11  ;;  %v2793_v43 = vpack.c.bf16 %v2111_v18, %v2111_v18  ;;  %v2116_v21 = vmul.f32 %v3221_v62, %v5401_v10  ;;  %3242 = vpow2.f32 %v1055_v39  ;;  %v4393_v4 = vpop.f32.mrb[46].mxu0  ;;  %v5404_v0 = vld [vmem:[#allocation3_spill] sm:$0xff]  ;;  %v972_v31 = vsub.f32 0.0, %v4365_v13 }
 0x139   :  { %5402 = vst [vmem:[#allocation2_spill] sm:$0xff] %v4393_v4  ;;  %v4395_v52 = vpop.f32.mrb[46].mxu1  ;;  %v3225_v28 = vpop.eup %3224  ;;  %1663 = vst.msk [vmem:[%s5370_s5 + $0x34] sm:$0xf] %vm1649_vm2, %v2729_v15  ;;  %v2734_v48 = vpack.c.bf16 %v1347_v7, %v1347_v7  ;;  %v1345_v8 = vmul.f32 %v3223_v63, %v5404_v0  ;;  %3244 = vpow2.f32 %v1824_v49  ;;  %v5407_v18 = vld [vmem:[#allocation7_spill] sm:$0xff]  ;;  %v5408_v15 = vld [vmem:[#allocation4_spill] sm:$0xff] }
 0x13a   :  { %5403 = vst [vmem:[#allocation28_spill] sm:$0xff] %v4395_v52  ;;  %v4403_v12 = vpop.f32.mrb[47].mxu0  ;;  %v4405_v39 = vpop.f32.mrb[47].mxu1  ;;  %2431 = vst.msk [vmem:[%s5371_s6 + $0x34] sm:$0xf] %vm1649_vm2, %v2793_v43  ;;  %v2798_v11 = vpack.c.bf16 %v2116_v21, %v2116_v21  ;;  %v2114_v62 = vmul.f32 %v3225_v28, %v5407_v18  ;;  %3246 = vpow2.f32 %v1051_v3  ;;  %v5409_v18 = vld [vmem:[#allocation5_spill] sm:$0xff] }
 0x13b   :  { %5405 = vst [vmem:[#allocation3_spill] sm:$0xff] %v4403_v12  ;;  %5406 = vst [vmem:[#allocation29_spill] sm:$0xff] %v4405_v39  ;;  %v3227_v40 = vpop.eup %3226  ;;  %v4415_v49 = vld [vmem:[%s5369_s4] ss:$0 sm:$0xff]  ;;  %v2732_v43 = vpack.c.bf16 %v1345_v8, %v1345_v8  ;;  %3248 = vpow2.f32 %v4333_v26  ;;  %v1826_v3 = vmul.f32 1.442695, %v1738_v29 }
 0x13c   :  { %v4419_v7 = vadd.f32 %v4415_v49, %v5408_v15  ;;  %v3229_v63 = vpop.eup %3228  ;;  %1668 = vst.msk [vmem:[%s5370_s5 + $0x48] sm:$0xf] %vm1649_vm2, %v2734_v48  ;;  %v1348_v10 = vmul.f32 %v3227_v40, %v4116_v45  ;;  %2436 = vst.msk [vmem:[%s5371_s6 + $0x48] sm:$0xf] %vm1649_vm2, %v2798_v11  ;;  %v2796_v28 = vpack.c.bf16 %v2114_v62, %v2114_v62  ;;  %3250 = vpow2.f32 %v4340_v36  ;;  %v5410_v29 = vld [vmem:[#allocation6_spill] sm:$0xff]  ;;  %v4451_v15 = vpop.f32.mrb[48].mxu0 }
 0x13d   :  { %v3231_v21 = vpop.eup %3230  ;;  %v2117_v0 = vmul.f32 %v3229_v63, %v4122_v33  ;;  %v4435_v48 = vadd.f32 %v4361_v37, %v5409_v18  ;;  %1666 = vst.msk [vmem:[%s5370_s5 + $0x40] sm:$0xf] %vm1649_vm2, %v2732_v43  ;;  %3252 = vpow2.f32 %v1830_v23  ;;  %v4444_v40 = vadd.f32 %v4415_v49, %v5410_v29  ;;  %5411 = vst [vmem:[#allocation7_spill] sm:$0xff] %v4451_v15  ;;  %v4453_v63 = vpop.f32.mrb[48].mxu1 }
 0x13e   :  { %v3233_v8 = vpop.eup %3232  ;;  %v2735_v45 = vpack.c.bf16 %v1348_v10, %v1348_v10  ;;  %v1346_v26 = vmul.f32 %v3231_v21, %v4126_v42  ;;  %2434 = vst.msk [vmem:[%s5371_s6 + $0x40] sm:$0xf] %vm1649_vm2, %v2796_v28  ;;  %3254 = vpow2.f32 %v1057_v56  ;;  %v1741_v62 = vsub.f32 0.0, %v4419_v7  ;;  %5412 = vst [vmem:[#allocation4_spill] sm:$0xff] %v4453_v63  ;;  %v5413_v10 = vld [vmem:[#allocation8_spill] sm:$0xff]  ;;  %v4463_v56 = vpop.f32.mrb[49].mxu0 }
 0x13f   :  { %v3235_v33 = vpop.eup %3234  ;;  %v2799_v36 = vpack.c.bf16 %v2117_v0, %v2117_v0  ;;  %v1923_v11 = vadd.f32 1.0, %v3233_v8  ;;  %3256 = vpow2.f32 %v1826_v3  ;;  %v4461_v21 = vadd.f32 %v4361_v37, %v5413_v10  ;;  %5414 = vst [vmem:[#allocation5_spill] sm:$0xff] %v4463_v56  ;;  %v4465_v28 = vpop.f32.mrb[49].mxu1  ;;  %v5421_v56 = vld [vmem:[#allocation10_spill] sm:$0xff] }
 0x140   :  { %v3237_v42 = vpop.eup %3236  ;;  %1669 = vst.msk [vmem:[%s5370_s5 + $0x4c] sm:$0xf] %vm1649_vm2, %v2735_v45  ;;  %v2733_v23 = vpack.c.bf16 %v1346_v26, %v1346_v26  ;;  %v1159_v43 = vadd.f32 1.0, %v3235_v33  ;;  %5415 = vst [vmem:[#allocation6_spill] sm:$0xff] %v4465_v28  ;;  %v4471_v8 = vmul.f32 1.442695, %v972_v31 }
 0x141   :  { %v3239_v0 = vpop.eup %3238  ;;  %2437 = vst.msk [vmem:[%s5371_s6 + $0x4c] sm:$0xf] %vm1649_vm2, %v2799_v36  ;;  %3258 = vrcp.f32 %v1923_v11  ;;  %v1928_v18 = vadd.f32 1.0, %v3237_v42  ;;  %v970_v3 = vsub.f32 0.0, %v4435_v48  ;;  %v4474_v45 = vpop.f32.mrb[50].mxu0  ;;  %v1739_v36 = vsub.f32 0.0, %v4444_v40 }
 0x142   :  { %5416 = vst [vmem:[#allocation8_spill] sm:$0xff] %v4474_v45  ;;  %v4476_v26 = vpop.f32.mrb[50].mxu1  ;;  %v3241_v29 = vpop.eup %3240  ;;  %1667 = vst.msk [vmem:[%s5370_s5 + $0x44] sm:$0xf] %vm1649_vm2, %v2733_v23  ;;  %3260 = vrcp.f32 %v1159_v43  ;;  %v1157_v33 = vadd.f32 1.0, %v3239_v0  ;;  %v5418_v11 = vld [vmem:[#allocation9_spill] sm:$0xff]  ;;  %v4495_v23 = vadd.f32 %v4361_v37, %v5421_v56 }
 0x143   :  { %5417 = vst [vmem:[#allocation30_spill] sm:$0xff] %v4476_v26  ;;  %v4485_v31 = vadd.f32 %v4415_v49, %v5418_v11  ;;  %v4487_v42 = vpop.f32.mrb[51].mxu0  ;;  %v4489_v10 = vpop.f32.mrb[51].mxu1  ;;  %3262 = vrcp.f32 %v1928_v18  ;;  %v1926_v26 = vadd.f32 1.0, %v3241_v29  ;;  %v4491_v28 = vmul.f32 1.442695, %v1741_v62 }
 0x144   :  { %5419 = vst [vmem:[#allocation9_spill] sm:$0xff] %v4487_v42  ;;  %5420 = vst [vmem:[#allocation31_spill] sm:$0xff] %v4489_v10  ;;  %v3243_v45 = vpop.eup %3242  ;;  %3264 = vrcp.f32 %v1157_v33  ;;  %v975_v63 = vsub.f32 0.0, %v4461_v21  ;;  %v5422_v11 = vld [vmem:[#allocation11_spill] sm:$0xff]  ;;  %v4502_v18 = vmul.f32 1.442695, %v970_v3  ;;  %v4506_v62 = vadd.f32 %v4361_v37, %v4141_v1 }
 0x145   :  { %v3245_v43 = vpop.eup %3244  ;;  %v1160_v0 = vadd.f32 1.0, %v3243_v45  ;;  %v4500_v15 = vadd.f32 %v4415_v49, %v5422_v11  ;;  %3266 = vrcp.f32 %v1926_v26  ;;  %v4508_v33 = vmul.f32 1.442695, %v1739_v36  ;;  %v4516_v26 = vpop.f32.mrb[52].mxu0 }
 0x146   :  { %v3247_v42 = vpop.eup %3246  ;;  %v1929_v10 = vadd.f32 1.0, %v3245_v43  ;;  %v1744_v45 = vsub.f32 0.0, %v4485_v31  ;;  %v973_v12 = vsub.f32 0.0, %v4495_v23  ;;  %v4514_v3 = vadd.f32 %v4415_v49, %v4143_v16  ;;  %5423 = vst [vmem:[#allocation10_spill] sm:$0xff] %v4516_v26  ;;  %v4518_v1 = vpop.f32.mrb[52].mxu1 }
 0x147   :  { %v3249_v56 = vpop.eup %3248  ;;  %3268 = vrcp.f32 %v1160_v0  ;;  %v1158_v29 = vadd.f32 1.0, %v3247_v42  ;;  %5424 = vst [vmem:[#allocation11_spill] sm:$0xff] %v4518_v1  ;;  %v4520_v36 = vmul.f32 1.442695, %v975_v63  ;;  %v1742_v0 = vsub.f32 0.0, %v4500_v15  ;;  %v4523_v52 = vpop.f32.mrb[53].mxu0 }
 0x148   :  { %v3251_v39 = vpop.eup %3250  ;;  %3270 = vrcp.f32 %v1929_v10  ;;  %v1927_v11 = vadd.f32 1.0, %v3249_v56  ;;  %5425 = vst [vmem:[#allocation32_spill] sm:$0xff] %v4523_v52  ;;  %v4525_v10 = vpop.f32.mrb[53].mxu1  ;;  %v976_v16 = vsub.f32 0.0, %v4506_v62  ;;  %v4530_v26 = vadd.f32 %v4361_v37, %v4148_v50 }
 0x149   :  { %v3253_v43 = vpop.eup %3252  ;;  %3272 = vrcp.f32 %v1158_v29  ;;  %v1163_v42 = vadd.f32 1.0, %v3251_v39  ;;  %5426 = vst [vmem:[#allocation33_spill] sm:$0xff] %v4525_v10  ;;  %v4532_v1 = vpop.f32.mrb[54].mxu0  ;;  %v1838_v24 = vmul.f32 1.442695, %v1744_v45  ;;  %v1745_v44 = vsub.f32 0.0, %v4514_v3 }
 0x14a   :  { %v3255_v56 = vpop.eup %3254  ;;  %3274 = vrcp.f32 %v1927_v11  ;;  %v1932_v4 = vadd.f32 1.0, %v3253_v43  ;;  %5427 = vst [vmem:[#allocation34_spill] sm:$0xff] %v4532_v1  ;;  %v4534_v39 = vpop.f32.mrb[54].mxu1  ;;  %v1065_v27 = vmul.f32 1.442695, %v973_v12 }
 0x14b   :  { %v3257_v63 = vpop.eup %3256  ;;  %3276 = vrcp.f32 %v1163_v42  ;;  %v1161_v29 = vadd.f32 1.0, %v3255_v56  ;;  %v4536_v52 = vpop.f32.mrb[55].mxu0  ;;  %v1834_v1 = vmul.f32 1.442695, %v1742_v0  ;;  %v4544_v42 = vadd.f32 %v4415_v49, %v4150_v5 }
 0x14c   :  { %5428 = vst [vmem:[#allocation35_spill] sm:$0xff] %v4536_v52  ;;  %v4538_v10 = vpop.f32.mrb[55].mxu1  ;;  %v3259_v11 = vpop.eup %3258  ;;  %3278 = vrcp.f32 %v1932_v4  ;;  %v1930_v43 = vadd.f32 1.0, %v3257_v63  ;;  %v974_v4 = vsub.f32 0.0, %v4530_v26 }
 0x14d   :  { %5429 = vst [vmem:[#allocation36_spill] sm:$0xff] %v4538_v10  ;;  %v3261_v50 = vpop.eup %3260  ;;  %v2115_v17 = vmul.f32 %v3259_v11, %v4169_v41  ;;  %3280 = vrcp.f32 %v1161_v29  ;;  %v1071_v10 = vmul.f32 1.442695, %v976_v16  ;;  %v4552_v41 = vadd.f32 %v4361_v37, %v4182_v57  ;;  %v4556_v16 = vpop.f32.mrb[56].mxu0 }
 0x14e   :  { %v3263_v45 = vpop.eup %3262  ;;  %v1351_v56 = vmul.f32 %v3261_v50, %v4193_v59  ;;  %3282 = vrcp.f32 %v1930_v43  ;;  %v1840_v59 = vmul.f32 1.442695, %v1745_v44  ;;  %v4558_v11 = vpop.f32.mrb[56].mxu1 }
 0x14f   :  { %v3265_v63 = vpop.eup %3264  ;;  %v2797_v12 = vpack.c.bf16 %v2115_v17, %v2115_v17  ;;  %v2120_v52 = vmul.f32 %v3263_v45, %v4206_v20  ;;  %3284 = vpow2.f32 %v4471_v8  ;;  %v4567_v8 = vpop.f32.mrb[57].mxu0 }
 0x150   :  { %v3267_v0 = vpop.eup %3266  ;;  %v2738_v5 = vpack.c.bf16 %v1351_v56, %v1351_v56  ;;  %v1349_v29 = vmul.f32 %v3265_v63, %v4230_v47  ;;  %3286 = vpow2.f32 %v4491_v28  ;;  %v1743_v47 = vsub.f32 0.0, %v4544_v42  ;;  %v4569_v44 = vpop.f32.mrb[57].mxu1 }
 0x151   :  { %v3269_v17 = vpop.eup %3268  ;;  %2435 = vst.msk [vmem:[%s5371_s6 + $0x44] sm:$0xf] %vm1649_vm2, %v2797_v12  ;;  %v2802_v20 = vpack.c.bf16 %v2120_v52, %v2120_v52  ;;  %v2118_v57 = vmul.f32 %v3267_v0, %v4249_v54  ;;  %3288 = vpow2.f32 %v4502_v18  ;;  %v1067_v54 = vmul.f32 1.442695, %v974_v4  ;;  %v4577_v52 = vpop.f32.mrb[58].mxu0 }
 0x152   :  { %v3271_v28 = vpop.eup %3270  ;;  %1672 = vst.msk [vmem:[%s5370_s5 + $0x58] sm:$0xf] %vm1649_vm2, %v2738_v5  ;;  %v2736_v43 = vpack.c.bf16 %v1349_v29, %v1349_v29  ;;  %v1352_v50 = vmul.f32 %v3269_v17, %v4258_v46  ;;  %3290 = vpow2.f32 %v4508_v33  ;;  %v4579_v18 = vpop.f32.mrb[58].mxu1  ;;  %v979_v46 = vsub.f32 0.0, %v4552_v41 }
 0x153   :  { %v3273_v45 = vpop.eup %3272  ;;  %2440 = vst.msk [vmem:[%s5371_s6 + $0x58] sm:$0xf] %vm1649_vm2, %v2802_v20  ;;  %v2800_v56 = vpack.c.bf16 %v2118_v57, %v2118_v57  ;;  %v2121_v63 = vmul.f32 %v3271_v28, %v4279_v2  ;;  %3292 = vpow2.f32 %v4520_v36  ;;  %v4588_v12 = vpop.f32.mrb[59].mxu0  ;;  %v4599_v2 = vadd.f32 %v4415_v49, %v4184_v30 }
 0x154   :  { %v4590_v33 = vpop.f32.mrb[59].mxu1  ;;  %v3275_v4 = vpop.eup %3274  ;;  %1670 = vst.msk [vmem:[%s5370_s5 + $0x50] sm:$0xf] %vm1649_vm2, %v2736_v43  ;;  %v2739_v0 = vpack.c.bf16 %v1352_v50, %v1352_v50  ;;  %v1350_v5 = vmul.f32 %v3273_v45, %v4289_v9  ;;  %3294 = vpow2.f32 %v1838_v24  ;;  %v1836_v20 = vmul.f32 1.442695, %v1743_v47 }
 0x155   :  { %v3277_v36 = vpop.eup %3276  ;;  %2438 = vst.msk [vmem:[%s5371_s6 + $0x50] sm:$0xf] %vm1649_vm2, %v2800_v56  ;;  %v2803_v29 = vpack.c.bf16 %v2121_v63, %v2121_v63  ;;  %v2119_v17 = vmul.f32 %v3275_v4, %v4302_v25  ;;  %3296 = vpow2.f32 %v1065_v27  ;;  %v4613_v24 = vadd.f32 %v4361_v37, %v4195_v19  ;;  %v4629_v50 = vpop.f32.mrb[60].mxu0 }
 0x156   :  { %v3279_v57 = vpop.eup %3278  ;;  %1673 = vst.msk [vmem:[%s5370_s5 + $0x5c] sm:$0xf] %vm1649_vm2, %v2739_v0  ;;  %v2737_v9 = vpack.c.bf16 %v1350_v5, %v1350_v5  ;;  %v1355_v30 = vmul.f32 %v3277_v36, %v4307_v51  ;;  %3298 = vpow2.f32 %v1834_v1  ;;  %v1077_v47 = vmul.f32 1.442695, %v979_v46  ;;  %5430 = vst [vmem:[#allocation37_spill] sm:$0xff] %v4629_v50  ;;  %v4631_v45 = vpop.f32.mrb[60].mxu1 }
 0x157   :  { %v3281_v28 = vpop.eup %3280  ;;  %2441 = vst.msk [vmem:[%s5371_s6 + $0x5c] sm:$0xf] %vm1649_vm2, %v2803_v29  ;;  %v2801_v25 = vpack.c.bf16 %v2119_v17, %v2119_v17  ;;  %v2124_v27 = vmul.f32 %v3279_v57, %v4314_v38  ;;  %3300 = vpow2.f32 %v1071_v10  ;;  %v4627_v1 = vadd.f32 %v4415_v49, %v4197_v35  ;;  %5431 = vst [vmem:[#allocation38_spill] sm:$0xff] %v4631_v45  ;;  %v4641_v35 = vpop.f32.mrb[61].mxu1  ;;  %v5441_v45 = vld [vmem:[#allocation15_spill] sm:$0xff] }
 0x158   :  { %v3283_v43 = vpop.eup %3282  ;;  %1671 = vst.msk [vmem:[%s5370_s5 + $0x54] sm:$0xf] %vm1649_vm2, %v2737_v9  ;;  %v2742_v51 = vpack.c.bf16 %v1355_v30, %v1355_v30  ;;  %v1353_v19 = vmul.f32 %v3281_v28, %v4326_v61  ;;  %3302 = vpow2.f32 %v1840_v59  ;;  %v1748_v61 = vsub.f32 0.0, %v4599_v2  ;;  %v4639_v59 = vpop.f32.mrb[61].mxu0  ;;  %5433 = vst [vmem:[#allocation40_spill] sm:$0xff] %v4641_v35 }
 0x159   :  { %v3285_v38 = vpop.eup %3284  ;;  %2439 = vst.msk [vmem:[%s5371_s6 + $0x54] sm:$0xf] %vm1649_vm2, %v2801_v25  ;;  %v2806_v10 = vpack.c.bf16 %v2124_v27, %v2124_v27  ;;  %v2122_v56 = vmul.f32 %v3283_v43, %v4347_v58  ;;  %3304 = vpow2.f32 %v1067_v54  ;;  %5432 = vst [vmem:[#allocation39_spill] sm:$0xff] %v4639_v59  ;;  %v977_v0 = vsub.f32 0.0, %v4613_v24  ;;  %v4648_v5 = vpop.f32.mrb[62].mxu0 }
 0x15a   :  { %v3287_v63 = vpop.eup %3286  ;;  %1676 = vst.msk [vmem:[%s5370_s5 + $0x68] sm:$0xf] %vm1649_vm2, %v2742_v51  ;;  %v2740_v46 = vpack.c.bf16 %v1353_v19, %v1353_v19  ;;  %v1164_v4 = vadd.f32 1.0, %v3285_v38  ;;  %3306 = vpow2.f32 %v1836_v20  ;;  %5434 = vst [vmem:[#allocation41_spill] sm:$0xff] %v4648_v5  ;;  %v4650_v58 = vpop.f32.mrb[62].mxu1  ;;  %v4658_v17 = vadd.f32 %v4361_v37, %v4208_v22 }
 0x15b   :  { %5435 = vst [vmem:[#allocation42_spill] sm:$0xff] %v4650_v58  ;;  %v3289_v54 = vpop.eup %3288  ;;  %2444 = vst.msk [vmem:[%s5371_s6 + $0x68] sm:$0xf] %vm1649_vm2, %v2806_v10  ;;  %v2804_v36 = vpack.c.bf16 %v2122_v56, %v2122_v56  ;;  %v1933_v29 = vadd.f32 1.0, %v3287_v63  ;;  %3308 = vpow2.f32 %v1077_v47  ;;  %v4660_v20 = vpop.f32.mrb[63].mxu0  ;;  %v1746_v28 = vsub.f32 0.0, %v4627_v1 }
 0x15c   :  { %5436 = vst [vmem:[#allocation43_spill] sm:$0xff] %v4660_v20  ;;  %v4662_v57 = vpop.f32.mrb[63].mxu1  ;;  %v3291_v9 = vpop.eup %3290  ;;  %1674 = vst.msk [vmem:[%s5370_s5 + $0x60] sm:$0xf] %vm1649_vm2, %v2740_v46  ;;  %3310 = vrcp.f32 %v1164_v4  ;;  %v1162_v30 = vadd.f32 1.0, %v3289_v54  ;;  %v4671_v25 = vadd.f32 %v4415_v49, %v4210_v60  ;;  %v4679_v43 = vadd.f32 %v4361_v37, %v4218_v34  ;;  %v5440_v20 = vld [vmem:[#allocation14_spill] sm:$0xff] }
 0x15d   :  { %5437 = vst [vmem:[#allocation44_spill] sm:$0xff] %v4662_v57  ;;  %v3293_v22 = vpop.eup %3292  ;;  %2442 = vst.msk [vmem:[%s5371_s6 + $0x60] sm:$0xf] %vm1649_vm2, %v2804_v36  ;;  %3312 = vrcp.f32 %v1933_v29  ;;  %v1931_v27 = vadd.f32 1.0, %v3291_v9  ;;  %v1846_v47 = vmul.f32 1.442695, %v1748_v61  ;;  %v4683_v60 = vadd.f32 %v4415_v49, %v4220_v53 }
 0x15e   :  { %v3295_v51 = vpop.eup %3294  ;;  %3314 = vrcp.f32 %v1162_v30  ;;  %v1167_v19 = vadd.f32 1.0, %v3293_v22  ;;  %v1073_v38 = vmul.f32 1.442695, %v977_v0  ;;  %v980_v63 = vsub.f32 0.0, %v4658_v17  ;;  %v5438_v29 = vld [vmem:[#allocation12_spill] sm:$0xff] }
 0x15f   :  { %v3297_v10 = vpop.eup %3296  ;;  %3316 = vrcp.f32 %v1931_v27  ;;  %v1936_v56 = vadd.f32 1.0, %v3295_v51  ;;  %v4688_v61 = vadd.f32 %v4361_v37, %v4260_v32  ;;  %v1842_v4 = vmul.f32 1.442695, %v1746_v28  ;;  %v5439_v27 = vld [vmem:[#allocation13_spill] sm:$0xff] }
 0x160   :  { %v3299_v46 = vpop.eup %3298  ;;  %3318 = vrcp.f32 %v1167_v19  ;;  %v1165_v34 = vadd.f32 1.0, %v3297_v10  ;;  %v1749_v54 = vsub.f32 0.0, %v4671_v25  ;;  %v978_v53 = vsub.f32 0.0, %v4679_v43 }
 0x161   :  { %v3301_v0 = vpop.eup %3300  ;;  %3320 = vrcp.f32 %v1936_v56  ;;  %v1934_v36 = vadd.f32 1.0, %v3299_v46  ;;  %v4694_v9 = vadd.f32 %v4415_v49, %v5438_v29  ;;  %v1747_v32 = vsub.f32 0.0, %v4683_v60 }
 0x162   :  { %v3303_v30 = vpop.eup %3302  ;;  %3322 = vrcp.f32 %v1165_v34  ;;  %v1168_v22 = vadd.f32 1.0, %v3301_v0  ;;  %v4699_v51 = vadd.f32 %v4361_v37, %v5439_v27  ;;  %v1079_v10 = vmul.f32 1.442695, %v980_v63 }
 0x163   :  { %v3305_v28 = vpop.eup %3304  ;;  %3324 = vrcp.f32 %v1934_v36  ;;  %v1937_v19 = vadd.f32 1.0, %v3303_v30  ;;  %v983_v56 = vsub.f32 0.0, %v4688_v61  ;;  %v1752_v29 = vsub.f32 0.0, %v4694_v9 }
 0x164   :  { %v3307_v46 = vpop.eup %3306  ;;  %3326 = vrcp.f32 %v1168_v22  ;;  %v1166_v57 = vadd.f32 1.0, %v3305_v28  ;;  %v4705_v34 = vadd.f32 %v4415_v49, %v5440_v20  ;;  %v1848_v27 = vmul.f32 1.442695, %v1749_v54 }
 0x165   :  { %v3309_v0 = vpop.eup %3308  ;;  %3328 = vrcp.f32 %v1937_v19  ;;  %v1935_v58 = vadd.f32 1.0, %v3307_v46  ;;  %v1075_v5 = vmul.f32 1.442695, %v978_v53  ;;  %v1844_v63 = vmul.f32 1.442695, %v1747_v32 }
 0x166   :  { %v3311_v35 = vpop.eup %3310  ;;  %3330 = vrcp.f32 %v1166_v57  ;;  %v1171_v36 = vadd.f32 1.0, %v3309_v0  ;;  %v981_v30 = vsub.f32 0.0, %v4699_v51  ;;  %v1085_v28 = vmul.f32 1.442695, %v983_v56  ;;  %v5442_v0 = vld [vmem:[#allocation16_spill] sm:$0xff] }
 0x167   :  { %v3313_v59 = vpop.eup %3312  ;;  %v1356_v22 = vmul.f32 %v3311_v35, %v4365_v13  ;;  %3332 = vrcp.f32 %v1935_v58  ;;  %v4711_v20 = vadd.f32 %v4361_v37, %v5441_v45  ;;  %v1854_v54 = vmul.f32 1.442695, %v1752_v29 }
 0x168   :  { %v3315_v50 = vpop.eup %3314  ;;  %v2125_v19 = vmul.f32 %v3313_v59, %v4419_v7  ;;  %3334 = vrcp.f32 %v1171_v36  ;;  %v1750_v57 = vsub.f32 0.0, %v4705_v34  ;;  %v4718_v13 = vadd.f32 %v4415_v49, %v5442_v0  ;;  %v5444_v0 = vld [vmem:[#allocation18_spill] sm:$0xff] }
 0x169   :  { %v3317_v53 = vpop.eup %3316  ;;  %v2743_v32 = vpack.c.bf16 %v1356_v22, %v1356_v22  ;;  %v1354_v46 = vmul.f32 %v3315_v50, %v4435_v48  ;;  %3336 = vpow2.f32 %v1846_v47  ;;  %v1081_v56 = vmul.f32 1.442695, %v981_v30 }
 0x16a   :  { %v3319_v35 = vpop.eup %3318  ;;  %v2807_v58 = vpack.c.bf16 %v2125_v19, %v2125_v19  ;;  %v2123_v45 = vmul.f32 %v3317_v53, %v4444_v40  ;;  %3338 = vpow2.f32 %v1073_v38  ;;  %v984_v50 = vsub.f32 0.0, %v4711_v20  ;;  %v5443_v19 = vld [vmem:[#allocation17_spill] sm:$0xff] }
 0x16b   :  { %v3321_v7 = vpop.eup %3320  ;;  %1677 = vst.msk [vmem:[%s5370_s5 + $0x6c] sm:$0xf] %vm1649_vm2, %v2743_v32  ;;  %v2741_v59 = vpack.c.bf16 %v1354_v46, %v1354_v46  ;;  %v1359_v48 = vmul.f32 %v3319_v35, %v4461_v21  ;;  %3340 = vpow2.f32 %v1842_v4  ;;  %v1850_v29 = vmul.f32 1.442695, %v1750_v57 }
 0x16c   :  { %v3323_v47 = vpop.eup %3322  ;;  %2445 = vst.msk [vmem:[%s5371_s6 + $0x6c] sm:$0xf] %vm1649_vm2, %v2807_v58  ;;  %v2805_v40 = vpack.c.bf16 %v2123_v45, %v2123_v45  ;;  %v2128_v38 = vmul.f32 %v3321_v7, %v4485_v31  ;;  %3342 = vpow2.f32 %v1079_v10  ;;  %v1753_v30 = vsub.f32 0.0, %v4718_v13 }
 0x16d   :  { %v3325_v36 = vpop.eup %3324  ;;  %1675 = vst.msk [vmem:[%s5370_s5 + $0x64] sm:$0xf] %vm1649_vm2, %v2741_v59  ;;  %v2746_v21 = vpack.c.bf16 %v1359_v48, %v1359_v48  ;;  %v1357_v4 = vmul.f32 %v3323_v47, %v4495_v23  ;;  %3344 = vpow2.f32 %v1848_v27  ;;  %v4745_v57 = vadd.f32 %v4361_v37, %v5443_v19 }
 0x16e   :  { %v3327_v22 = vpop.eup %3326  ;;  %2443 = vst.msk [vmem:[%s5371_s6 + $0x64] sm:$0xf] %vm1649_vm2, %v2805_v40  ;;  %v2810_v31 = vpack.c.bf16 %v2128_v38, %v2128_v38  ;;  %v2126_v10 = vmul.f32 %v3325_v36, %v4500_v15  ;;  %3346 = vpow2.f32 %v1075_v5  ;;  %v1087_v32 = vmul.f32 1.442695, %v984_v50  ;;  %v5445_v50 = vld [vmem:[#allocation19_spill] sm:$0xff] }
 0x16f   :  { %v3329_v53 = vpop.eup %3328  ;;  %1680 = vst.msk [vmem:[%s5370_s5 + $0x78] sm:$0xf] %vm1649_vm2, %v2746_v21  ;;  %v2744_v23 = vpack.c.bf16 %v1357_v4, %v1357_v4  ;;  %v1360_v27 = vmul.f32 %v3327_v22, %v4506_v62  ;;  %3348 = vpow2.f32 %v1844_v63  ;;  %v4759_v35 = vadd.f32 %v4415_v49, %v5444_v0  ;;  %v5446_v21 = vld [vmem:[#allocation20_spill] sm:$0xff] }
 0x170   :  { %v3331_v46 = vpop.eup %3330  ;;  %2448 = vst.msk [vmem:[%s5371_s6 + $0x78] sm:$0xf] %vm1649_vm2, %v2810_v31  ;;  %v2808_v15 = vpack.c.bf16 %v2126_v10, %v2126_v10  ;;  %v2129_v5 = vmul.f32 %v3329_v53, %v4514_v3  ;;  %3350 = vpow2.f32 %v1085_v28  ;;  %v1856_v45 = vmul.f32 1.442695, %v1753_v30 }
 0x171   :  { %v3333_v58 = vpop.eup %3332  ;;  %1678 = vst.msk [vmem:[%s5370_s5 + $0x70] sm:$0xf] %vm1649_vm2, %v2744_v23  ;;  %v2747_v62 = vpack.c.bf16 %v1360_v27, %v1360_v27  ;;  %v1358_v63 = vmul.f32 %v3331_v46, %v4530_v26  ;;  %3352 = vpow2.f32 %v1854_v54  ;;  %v982_v59 = vsub.f32 0.0, %v4745_v57  ;;  %v5447_v27 = vld [vmem:[#allocation21_spill] sm:$0xff] }
 0x172   :  { %v3335_v7 = vpop.eup %3334  ;;  %2446 = vst.msk [vmem:[%s5371_s6 + $0x70] sm:$0xf] %vm1649_vm2, %v2808_v15  ;;  %v2811_v3 = vpack.c.bf16 %v2129_v5, %v2129_v5  ;;  %v2127_v28 = vmul.f32 %v3333_v58, %v4544_v42  ;;  %3354 = vpow2.f32 %v1081_v56  ;;  %v4779_v47 = vadd.f32 %v4361_v37, %v5445_v50 }
 0x173   :  { %v3337_v48 = vpop.eup %3336  ;;  %1681 = vst.msk [vmem:[%s5370_s5 + $0x7c] sm:$0xf] %vm1649_vm2, %v2747_v62  ;;  %v2745_v26 = vpack.c.bf16 %v1358_v63, %v1358_v63  ;;  %v1363_v54 = vmul.f32 %v3335_v7, %v4552_v41  ;;  %3356 = vpow2.f32 %v1850_v29  ;;  %v1751_v38 = vsub.f32 0.0, %v4759_v35 }
 0x174   :  { %v3339_v40 = vpop.eup %3338  ;;  %2449 = vst.msk [vmem:[%s5371_s6 + $0x7c] sm:$0xf] %vm1649_vm2, %v2811_v3  ;;  %v2809_v42 = vpack.c.bf16 %v2127_v28, %v2127_v28  ;;  %v1940_v56 = vadd.f32 1.0, %v3337_v48  ;;  %3358 = vpow2.f32 %v1087_v32  ;;  %v4792_v4 = vadd.f32 %v4415_v49, %v5446_v21 }
 0x175   :  { %v3341_v36 = vpop.eup %3340  ;;  %1679 = vst.msk [vmem:[%s5370_s5 + $0x74] sm:$0xf] %vm1649_vm2, %v2745_v26  ;;  %v2750_v41 = vpack.c.bf16 %v1363_v54, %v1363_v54  ;;  %v1169_v29 = vadd.f32 1.0, %v3339_v40  ;;  %3360 = vpow2.f32 %v1856_v45  ;;  %v4798_v31 = vmul.f32 1.442695, %v982_v59  ;;  %v5449_v45 = vld [vmem:[#allocation23_spill] sm:$0xff] }
 0x176   :  { %v3343_v30 = vpop.eup %3342  ;;  %2447 = vst.msk [vmem:[%s5371_s6 + $0x74] sm:$0xf] %vm1649_vm2, %v2809_v42  ;;  %3362 = vrcp.f32 %v1940_v56  ;;  %v1938_v22 = vadd.f32 1.0, %v3341_v36  ;;  %v4802_v10 = vadd.f32 %v4361_v37, %v4320_v55  ;;  %v987_v23 = vsub.f32 0.0, %v4779_v47  ;;  %v5448_v55 = vld [vmem:[#allocation22_spill] sm:$0xff] }
 0x177   :  { %v3345_v19 = vpop.eup %3344  ;;  %1684 = vst.msk [vmem:[%s5370_s5 + $0x88] sm:$0xf] %vm1649_vm2, %v2750_v41  ;;  %3364 = vrcp.f32 %v1169_v29  ;;  %v1172_v53 = vadd.f32 1.0, %v3343_v30  ;;  %v4811_v32 = vadd.f32 %v4415_v49, %v5447_v27  ;;  %v1852_v5 = vmul.f32 1.442695, %v1751_v38 }
 0x178   :  { %v3347_v46 = vpop.eup %3346  ;;  %3366 = vrcp.f32 %v1938_v22  ;;  %v1941_v15 = vadd.f32 1.0, %v3345_v19  ;;  %v4815_v0 = vadd.f32 %v4361_v37, %v5448_v55  ;;  %v1756_v63 = vsub.f32 0.0, %v4792_v4 }
 0x179   :  { %v3349_v58 = vpop.eup %3348  ;;  %3368 = vrcp.f32 %v1172_v53  ;;  %v1170_v62 = vadd.f32 1.0, %v3347_v46  ;;  %v4820_v7 = vadd.f32 %v4415_v49, %v5449_v45  ;;  %v985_v59 = vsub.f32 0.0, %v4802_v10 }
 0x17a   :  { %v3351_v3 = vpop.eup %3350  ;;  %3370 = vrcp.f32 %v1941_v15  ;;  %v1939_v28 = vadd.f32 1.0, %v3349_v58  ;;  %v4825_v48 = vadd.f32 %v4361_v37, %v4335_v14  ;;  %v1093_v50 = vmul.f32 1.442695, %v987_v23  ;;  %v5450_v15 = vld [vmem:[#allocation24_spill] sm:$0xff] }
 0x17b   :  { %v3353_v26 = vpop.eup %3352  ;;  %3372 = vrcp.f32 %v1170_v62  ;;  %v1175_v54 = vadd.f32 1.0, %v3351_v3  ;;  %v1754_v40 = vsub.f32 0.0, %v4811_v32  ;;  %v988_v38 = vsub.f32 0.0, %v4815_v0 }
 0x17c   :  { %v3355_v42 = vpop.eup %3354  ;;  %3374 = vrcp.f32 %v1939_v28  ;;  %v1944_v56 = vadd.f32 1.0, %v3353_v26  ;;  %v4831_v36 = vadd.f32 %v4415_v49, %v4337_v6  ;;  %v1862_v14 = vmul.f32 1.442695, %v1756_v63 }
 0x17d   :  { %v3357_v41 = vpop.eup %3356  ;;  %3376 = vrcp.f32 %v1175_v54  ;;  %v1173_v29 = vadd.f32 1.0, %v3355_v42  ;;  %v1757_v21 = vsub.f32 0.0, %v4820_v7  ;;  %v1089_v19 = vmul.f32 1.442695, %v985_v59  ;;  %v5451_v59 = vld [vmem:[#allocation25_spill] sm:$0xff] }
 0x17e   :  { %v3359_v30 = vpop.eup %3358  ;;  %3378 = vrcp.f32 %v1944_v56  ;;  %v1942_v22 = vadd.f32 1.0, %v3357_v41  ;;  %v986_v53 = vsub.f32 0.0, %v4825_v48  ;;  %v1858_v46 = vmul.f32 1.442695, %v1754_v40  ;;  %v5452_v56 = vld [vmem:[#allocation26_spill] sm:$0xff] }
 0x17f   :  { %v3361_v23 = vpop.eup %3360  ;;  %3380 = vrcp.f32 %v1173_v29  ;;  %v1176_v27 = vadd.f32 1.0, %v3359_v30  ;;  %v4837_v6 = vadd.f32 %v4361_v37, %v5450_v15  ;;  %v1095_v62 = vmul.f32 1.442695, %v988_v38 }
 0x180   :  { %v3363_v55 = vpop.eup %3362  ;;  %3382 = vrcp.f32 %v1942_v22  ;;  %v1945_v58 = vadd.f32 1.0, %v3361_v23  ;;  %v1755_v63 = vsub.f32 0.0, %v4831_v36  ;;  %v1864_v28 = vmul.f32 1.442695, %v1757_v21 }
 0x181   :  { %v3365_v45 = vpop.eup %3364  ;;  %v2132_v3 = vmul.f32 %v3363_v55, %v4599_v2  ;;  %3384 = vrcp.f32 %v1176_v27  ;;  %v4843_v26 = vadd.f32 %v4415_v49, %v5451_v59  ;;  %v1091_v42 = vmul.f32 1.442695, %v986_v53 }
 0x182   :  { %v3367_v54 = vpop.eup %3366  ;;  %v1361_v40 = vmul.f32 %v3365_v45, %v4613_v24  ;;  %3386 = vrcp.f32 %v1945_v58  ;;  %v4848_v41 = vadd.f32 %v4361_v37, %v5452_v56  ;;  %v991_v2 = vsub.f32 0.0, %v4837_v6 }
 0x183   :  { %v3369_v38 = vpop.eup %3368  ;;  %v2814_v29 = vpack.c.bf16 %v2132_v3, %v2132_v3  ;;  %v2130_v30 = vmul.f32 %v3367_v54, %v4627_v1  ;;  %3388 = vpow2.f32 %v4798_v31  ;;  %v1860_v24 = vmul.f32 1.442695, %v1755_v63  ;;  %v5453_v3 = vld [vmem:[#allocation27_spill] sm:$0xff] }
 0x184   :  { %v3371_v21 = vpop.eup %3370  ;;  %v2748_v22 = vpack.c.bf16 %v1361_v40, %v1361_v40  ;;  %v1364_v23 = vmul.f32 %v3369_v38, %v4658_v17  ;;  %3390 = vpow2.f32 %v1852_v5  ;;  %v1760_v1 = vsub.f32 0.0, %v4843_v26 }
 0x185   :  { %v3373_v27 = vpop.eup %3372  ;;  %2452 = vst.msk [vmem:[%s5371_s6 + $0x88] sm:$0xf] %vm1649_vm2, %v2814_v29  ;;  %v2812_v53 = vpack.c.bf16 %v2130_v30, %v2130_v30  ;;  %v2133_v15 = vmul.f32 %v3371_v21, %v4671_v25  ;;  %3392 = vpow2.f32 %v1093_v50  ;;  %v989_v55 = vsub.f32 0.0, %v4848_v41  ;;  %v5454_v30 = vld [vmem:[#allocation2_spill] sm:$0xff] }
 0x186   :  { %v3375_v31 = vpop.eup %3374  ;;  %1682 = vst.msk [vmem:[%s5370_s5 + $0x80] sm:$0xf] %vm1649_vm2, %v2748_v22  ;;  %v2751_v17 = vpack.c.bf16 %v1364_v23, %v1364_v23  ;;  %v1362_v5 = vmul.f32 %v3373_v27, %v4679_v43  ;;  %3394 = vpow2.f32 %v1862_v14  ;;  %v1101_v63 = vmul.f32 1.442695, %v991_v2  ;;  %v5455_v27 = vld [vmem:[#allocation28_spill] sm:$0xff] }
 0x187   :  { %v3377_v58 = vpop.eup %3376  ;;  %2450 = vst.msk [vmem:[%s5371_s6 + $0x80] sm:$0xf] %vm1649_vm2, %v2812_v53  ;;  %v2815_v25 = vpack.c.bf16 %v2133_v15, %v2133_v15  ;;  %v2131_v50 = vmul.f32 %v3375_v31, %v4683_v60  ;;  %3396 = vpow2.f32 %v1089_v19  ;;  %v4878_v59 = vadd.f32 %v4415_v49, %v5453_v3  ;;  %v5458_v3 = vld [vmem:[#allocation7_spill] sm:$0xff] }
 0x188   :  { %v3379_v45 = vpop.eup %3378  ;;  %1685 = vst.msk [vmem:[%s5370_s5 + $0x8c] sm:$0xf] %vm1649_vm2, %v2751_v17  ;;  %v2749_v43 = vpack.c.bf16 %v1362_v5, %v1362_v5  ;;  %v1367_v14 = vmul.f32 %v3377_v58, %v4688_v61  ;;  %3398 = vpow2.f32 %v1858_v46  ;;  %v1870_v40 = vmul.f32 1.442695, %v1760_v1  ;;  %v5456_v58 = vld [vmem:[#allocation3_spill] sm:$0xff] }
 0x189   :  { %v3381_v54 = vpop.eup %3380  ;;  %2453 = vst.msk [vmem:[%s5371_s6 + $0x8c] sm:$0xf] %vm1649_vm2, %v2815_v25  ;;  %v2813_v60 = vpack.c.bf16 %v2131_v50, %v2131_v50  ;;  %v2136_v19 = vmul.f32 %v3379_v45, %v4694_v9  ;;  %3400 = vpow2.f32 %v1095_v62  ;;  %v1097_v38 = vmul.f32 1.442695, %v989_v55  ;;  %v4930_v55 = vld [vmem:[%s5368_s2] ss:$0 sm:$0xff] }
 0x18a   :  { %v3383_v56 = vpop.eup %3382  ;;  %1683 = vst.msk [vmem:[%s5370_s5 + $0x84] sm:$0xf] %vm1649_vm2, %v2749_v43  ;;  %v2754_v61 = vpack.c.bf16 %v1367_v14, %v1367_v14  ;;  %v1365_v46 = vmul.f32 %v3381_v54, %v4699_v51  ;;  %3402 = vpow2.f32 %v1864_v28  ;;  %v4897_v2 = vadd.f32 %v4361_v37, %v5454_v30  ;;  %v5457_v50 = vld [vmem:[#allocation29_spill] sm:$0xff] }
 0x18b   :  { %v3385_v29 = vpop.eup %3384  ;;  %2451 = vst.msk [vmem:[%s5371_s6 + $0x84] sm:$0xf] %vm1649_vm2, %v2813_v60  ;;  %v2818_v9 = vpack.c.bf16 %v2136_v19, %v2136_v19  ;;  %v2134_v62 = vmul.f32 %v3383_v56, %v4705_v34  ;;  %3404 = vpow2.f32 %v1091_v42  ;;  %v1758_v42 = vsub.f32 0.0, %v4878_v59  ;;  %v5459_v56 = vld [vmem:[#allocation4_spill] sm:$0xff] }
 0x18c   :  { %v3387_v21 = vpop.eup %3386  ;;  %1688 = vst.msk [vmem:[%s5370_s5 + $0x98] sm:$0xf] %vm1649_vm2, %v2754_v61  ;;  %v2752_v51 = vpack.c.bf16 %v1365_v46, %v1365_v46  ;;  %v1368_v28 = vmul.f32 %v3385_v29, %v4711_v20  ;;  %3406 = vpow2.f32 %v1860_v24  ;;  %v4916_v53 = vadd.f32 %v4415_v49, %v5455_v27 }
 0x18d   :  { %v3389_v22 = vpop.eup %3388  ;;  %2456 = vst.msk [vmem:[%s5371_s6 + $0x98] sm:$0xf] %vm1649_vm2, %v2818_v9  ;;  %v2816_v34 = vpack.c.bf16 %v2134_v62, %v2134_v62  ;;  %v2137_v37 = vmul.f32 %v3387_v21, %v4718_v13  ;;  %3408 = vpow2.f32 %v1101_v63  ;;  %v992_v31 = vsub.f32 0.0, %v4897_v2  ;;  %v5460_v9 = vld [vmem:[#allocation5_spill] sm:$0xff] }
 0x18e   :  { %v3391_v23 = vpop.eup %3390  ;;  %1686 = vst.msk [vmem:[%s5370_s5 + $0x90] sm:$0xf] %vm1649_vm2, %v2752_v51  ;;  %v2755_v20 = vpack.c.bf16 %v1368_v28, %v1368_v28  ;;  %v1174_v24 = vadd.f32 1.0, %v3389_v22  ;;  %3410 = vpow2.f32 %v1870_v40  ;;  %v4934_v25 = vadd.f32 %v4930_v55, %v5456_v58 }
 0x18f   :  { %v3393_v15 = vpop.eup %3392  ;;  %2454 = vst.msk [vmem:[%s5371_s6 + $0x90] sm:$0xf] %vm1649_vm2, %v2816_v34  ;;  %v2819_v13 = vpack.c.bf16 %v2137_v37, %v2137_v37  ;;  %v1943_v1 = vadd.f32 1.0, %v3391_v23  ;;  %3412 = vpow2.f32 %v1097_v38  ;;  %v4938_v63 = vadd.f32 %v4415_v49, %v5457_v50  ;;  %v4963_v37 = vld [vmem:[%s5369_s4] ss:$0 sm:$0xff] }
 0x190   :  { %v3395_v17 = vpop.eup %3394  ;;  %1689 = vst.msk [vmem:[%s5370_s5 + $0x9c] sm:$0xf] %vm1649_vm2, %v2755_v20  ;;  %3414 = vrcp.f32 %v1174_v24  ;;  %v1179_v5 = vadd.f32 1.0, %v3393_v15  ;;  %v1866_v14 = vmul.f32 1.442695, %v1758_v42  ;;  %v4946_v54 = vadd.f32 %v4930_v55, %v5458_v3  ;;  %v5461_v42 = vld [vmem:[#allocation6_spill] sm:$0xff] }
 0x191   :  { %v3397_v45 = vpop.eup %3396  ;;  %2457 = vst.msk [vmem:[%s5371_s6 + $0x9c] sm:$0xf] %vm1649_vm2, %v2819_v13  ;;  %3416 = vrcp.f32 %v1943_v1  ;;  %v1948_v43 = vadd.f32 1.0, %v3395_v17  ;;  %v1761_v40 = vsub.f32 0.0, %v4916_v53  ;;  %v4951_v61 = vadd.f32 %v4415_v49, %v5459_v56  ;;  %v5462_v17 = vld [vmem:[#allocation8_spill] sm:$0xff] }
 0x192   :  { %v3399_v60 = vpop.eup %3398  ;;  %3418 = vrcp.f32 %v1179_v5  ;;  %v1177_v19 = vadd.f32 1.0, %v3397_v45  ;;  %v1103_v29 = vmul.f32 1.442695, %v992_v31  ;;  %v4955_v62 = vadd.f32 %v4930_v55, %v5460_v9  ;;  %v5463_v9 = vld [vmem:[#allocation30_spill] sm:$0xff] }
 0x193   :  { %v3401_v46 = vpop.eup %3400  ;;  %3420 = vrcp.f32 %v1948_v43  ;;  %v1946_v38 = vadd.f32 1.0, %v3399_v60  ;;  %v990_v51 = vsub.f32 0.0, %v4934_v25  ;;  %v1759_v28 = vsub.f32 0.0, %v4938_v63 }
 0x194   :  { %v3403_v30 = vpop.eup %3402  ;;  %3422 = vrcp.f32 %v1177_v19  ;;  %v1180_v21 = vadd.f32 1.0, %v3401_v46  ;;  %v995_v49 = vsub.f32 0.0, %v4946_v54  ;;  %v4967_v23 = vadd.f32 %v4963_v37, %v5461_v42 }
 0x195   :  { %v3405_v22 = vpop.eup %3404  ;;  %3424 = vrcp.f32 %v1946_v38  ;;  %v1949_v34 = vadd.f32 1.0, %v3403_v30  ;;  %v1872_v27 = vmul.f32 1.442695, %v1761_v40  ;;  %v1764_v15 = vsub.f32 0.0, %v4951_v61 }
 0x196   :  { %v3407_v20 = vpop.eup %3406  ;;  %3426 = vrcp.f32 %v1180_v21  ;;  %v1178_v24 = vadd.f32 1.0, %v3405_v22  ;;  %v993_v31 = vsub.f32 0.0, %v4955_v62  ;;  %v4973_v5 = vadd.f32 %v4930_v55, %v5462_v17  ;;  %v5465_v17 = vld [vmem:[#allocation31_spill] sm:$0xff] }
 0x197   :  { %v3409_v13 = vpop.eup %3408  ;;  %3428 = vrcp.f32 %v1949_v34  ;;  %v1947_v1 = vadd.f32 1.0, %v3407_v20  ;;  %v1099_v45 = vmul.f32 1.442695, %v990_v51  ;;  %v1762_v43 = vsub.f32 0.0, %v4967_v23 }
 0x198   :  { %v3411_v58 = vpop.eup %3410  ;;  %3430 = vrcp.f32 %v1178_v24  ;;  %v1183_v50 = vadd.f32 1.0, %v3409_v13  ;;  %v1868_v19 = vmul.f32 1.442695, %v1759_v28  ;;  %v1109_v40 = vmul.f32 1.442695, %v995_v49  ;;  %v5464_v49 = vld [vmem:[#allocation9_spill] sm:$0xff] }
 0x199   :  { %v3413_v3 = vpop.eup %3412  ;;  %3432 = vrcp.f32 %v1947_v1  ;;  %v1952_v60 = vadd.f32 1.0, %v3411_v58  ;;  %v1878_v38 = vmul.f32 1.442695, %v1764_v15  ;;  %v4978_v30 = vadd.f32 %v4963_v37, %v5463_v9 }
 0x19a   :  { %v3415_v56 = vpop.eup %3414  ;;  %3434 = vrcp.f32 %v1183_v50  ;;  %v1181_v46 = vadd.f32 1.0, %v3413_v3  ;;  %v1105_v51 = vmul.f32 1.442695, %v993_v31  ;;  %v996_v34 = vsub.f32 0.0, %v4973_v5 }
 0x19b   :  { %v3417_v21 = vpop.eup %3416  ;;  %v1366_v22 = vmul.f32 %v3415_v56, %v4745_v57  ;;  %3436 = vrcp.f32 %v1952_v60  ;;  %v1874_v28 = vmul.f32 1.442695, %v1762_v43  ;;  %v4985_v24 = vadd.f32 %v4930_v55, %v5464_v49 }
 0x19c   :  { %v3419_v42 = vpop.eup %3418  ;;  %v2135_v20 = vmul.f32 %v3417_v21, %v4759_v35  ;;  %3438 = vrcp.f32 %v1181_v46  ;;  %v4990_v57 = vadd.f32 %v4963_v37, %v5465_v17  ;;  %v1765_v35 = vsub.f32 0.0, %v4978_v30 }
 0x19d   :  { %v3421_v15 = vpop.eup %3420  ;;  %v2753_v13 = vpack.c.bf16 %v1366_v22, %v1366_v22  ;;  %v1371_v1 = vmul.f32 %v3419_v42, %v4779_v47  ;;  %3440 = vpow2.f32 %v1866_v14  ;;  %v1111_v14 = vmul.f32 1.442695, %v996_v34  ;;  %v5466_v22 = vld [vmem:[#allocation10_spill] sm:$0xff] }
 0x19e   :  { %v3423_v31 = vpop.eup %3422  ;;  %v2817_v58 = vpack.c.bf16 %v2135_v20, %v2135_v20  ;;  %v2140_v50 = vmul.f32 %v3421_v15, %v4792_v4  ;;  %3442 = vpow2.f32 %v1103_v29  ;;  %v994_v56 = vsub.f32 0.0, %v4985_v24 }
 0x19f   :  { %v3425_v43 = vpop.eup %3424  ;;  %1687 = vst.msk [vmem:[%s5370_s5 + $0x94] sm:$0xf] %vm1649_vm2, %v2753_v13  ;;  %v2758_v3 = vpack.c.bf16 %v1371_v1, %v1371_v1  ;;  %v1369_v47 = vmul.f32 %v3423_v31, %v4802_v10  ;;  %3444 = vpow2.f32 %v1872_v27  ;;  %v1763_v9 = vsub.f32 0.0, %v4990_v57 }
 0x1a0   :  { %v3427_v60 = vpop.eup %3426  ;;  %2455 = vst.msk [vmem:[%s5371_s6 + $0x94] sm:$0xf] %vm1649_vm2, %v2817_v58  ;;  %v2822_v4 = vpack.c.bf16 %v2140_v50, %v2140_v50  ;;  %v2138_v29 = vmul.f32 %v3425_v43, %v4811_v32  ;;  %3446 = vpow2.f32 %v1099_v45  ;;  %v5018_v34 = vadd.f32 %v4930_v55, %v5466_v22  ;;  %v5467_v43 = vld [vmem:[#allocation11_spill] sm:$0xff] }
 0x1a1   :  { %v3429_v46 = vpop.eup %3428  ;;  %1692 = vst.msk [vmem:[%s5370_s5 + $0xa8] sm:$0xf] %vm1649_vm2, %v2758_v3  ;;  %v2756_v10 = vpack.c.bf16 %v1369_v47, %v1369_v47  ;;  %v1372_v27 = vmul.f32 %v3427_v60, %v4815_v0  ;;  %3448 = vpow2.f32 %v1868_v19  ;;  %v1880_v20 = vmul.f32 1.442695, %v1765_v35  ;;  %v5468_v60 = vld [vmem:[#allocation32_spill] sm:$0xff] }
 0x1a2   :  { %v3431_v21 = vpop.eup %3430  ;;  %2460 = vst.msk [vmem:[%s5371_s6 + $0xa8] sm:$0xf] %vm1649_vm2, %v2822_v4  ;;  %v2820_v32 = vpack.c.bf16 %v2138_v29, %v2138_v29  ;;  %v2141_v45 = vmul.f32 %v3429_v46, %v4820_v7  ;;  %3450 = vpow2.f32 %v1109_v40  ;;  %v1107_v15 = vmul.f32 1.442695, %v994_v56 }
 0x1a3   :  { %v3433_v42 = vpop.eup %3432  ;;  %1690 = vst.msk [vmem:[%s5370_s5 + $0xa0] sm:$0xf] %vm1649_vm2, %v2756_v10  ;;  %v2759_v0 = vpack.c.bf16 %v1372_v27, %v1372_v27  ;;  %v1370_v19 = vmul.f32 %v3431_v21, %v4825_v48  ;;  %3452 = vpow2.f32 %v1878_v38  ;;  %v1876_v1 = vmul.f32 1.442695, %v1763_v9  ;;  %v5469_v10 = vld [vmem:[#allocation33_spill] sm:$0xff] }
 0x1a4   :  { %v3435_v49 = vpop.eup %3434  ;;  %2458 = vst.msk [vmem:[%s5371_s6 + $0xa0] sm:$0xf] %vm1649_vm2, %v2820_v32  ;;  %v2823_v7 = vpack.c.bf16 %v2141_v45, %v2141_v45  ;;  %v2139_v40 = vmul.f32 %v3433_v42, %v4831_v36  ;;  %3454 = vpow2.f32 %v1105_v51  ;;  %v999_v31 = vsub.f32 0.0, %v5018_v34  ;;  %v5470_v32 = vld [vmem:[#allocation34_spill] sm:$0xff] }
 0x1a5   :  { %v3437_v13 = vpop.eup %3436  ;;  %1693 = vst.msk [vmem:[%s5370_s5 + $0xac] sm:$0xf] %vm1649_vm2, %v2759_v0  ;;  %v2757_v48 = vpack.c.bf16 %v1370_v19, %v1370_v19  ;;  %v1375_v38 = vmul.f32 %v3435_v49, %v4837_v6  ;;  %3456 = vpow2.f32 %v1874_v28  ;;  %v5052_v3 = vadd.f32 %v4963_v37, %v5467_v43 }
 0x1a6   :  { %v3439_v17 = vpop.eup %3438  ;;  %2461 = vst.msk [vmem:[%s5371_s6 + $0xac] sm:$0xf] %vm1649_vm2, %v2823_v7  ;;  %v2821_v36 = vpack.c.bf16 %v2139_v40, %v2139_v40  ;;  %v2144_v51 = vmul.f32 %v3437_v13, %v4843_v26  ;;  %3458 = vpow2.f32 %v1111_v14  ;;  %v5060_v4 = vadd.f32 %v4930_v55, %v5468_v60  ;;  %v5472_v13 = vld [vmem:[#allocation36_spill] sm:$0xff] }
 0x1a7   :  { %v3441_v58 = vpop.eup %3440  ;;  %1691 = vst.msk [vmem:[%s5370_s5 + $0xa4] sm:$0xf] %vm1649_vm2, %v2757_v48  ;;  %v2762_v6 = vpack.c.bf16 %v1375_v38, %v1375_v38  ;;  %v1373_v28 = vmul.f32 %v3439_v17, %v4848_v41  ;;  %3460 = vpow2.f32 %v1880_v20  ;;  %v5066_v46 = vmul.f32 1.442695, %v999_v31  ;;  %v5471_v20 = vld [vmem:[#allocation35_spill] sm:$0xff] }
 0x1a8   :  { %v3443_v50 = vpop.eup %3442  ;;  %2459 = vst.msk [vmem:[%s5371_s6 + $0xa4] sm:$0xf] %vm1649_vm2, %v2821_v36  ;;  %v2826_v26 = vpack.c.bf16 %v2144_v51, %v2144_v51  ;;  %v1950_v35 = vadd.f32 1.0, %v3441_v58  ;;  %3462 = vpow2.f32 %v1107_v15  ;;  %v5070_v27 = vadd.f32 %v4963_v37, %v5469_v10 }
 0x1a9   :  { %v3445_v47 = vpop.eup %3444  ;;  %1696 = vst.msk [vmem:[%s5370_s5 + $0xb8] sm:$0xf] %vm1649_vm2, %v2762_v6  ;;  %v2760_v41 = vpack.c.bf16 %v1373_v28, %v1373_v28  ;;  %v1184_v14 = vadd.f32 1.0, %v3443_v50  ;;  %3464 = vpow2.f32 %v1876_v1  ;;  %v5078_v45 = vadd.f32 %v4930_v55, %v5470_v32 }
 0x1aa   :  { %v3447_v29 = vpop.eup %3446  ;;  %2464 = vst.msk [vmem:[%s5371_s6 + $0xb8] sm:$0xf] %vm1649_vm2, %v2826_v26  ;;  %3466 = vrcp.f32 %v1950_v35  ;;  %v1953_v56 = vadd.f32 1.0, %v3445_v47  ;;  %v5082_v22 = vadd.f32 %v4963_v37, %v4534_v39  ;;  %v1768_v19 = vsub.f32 0.0, %v5052_v3 }
 0x1ab   :  { %v3449_v9 = vpop.eup %3448  ;;  %1694 = vst.msk [vmem:[%s5370_s5 + $0xb0] sm:$0xf] %vm1649_vm2, %v2760_v41  ;;  %3468 = vrcp.f32 %v1184_v14  ;;  %v1182_v21 = vadd.f32 1.0, %v3447_v29  ;;  %v5087_v49 = vadd.f32 %v4930_v55, %v5471_v20  ;;  %v997_v15 = vsub.f32 0.0, %v5060_v4 }
 0x1ac   :  { %v3451_v42 = vpop.eup %3450  ;;  %3470 = vrcp.f32 %v1953_v56  ;;  %v1951_v0 = vadd.f32 1.0, %v3449_v9  ;;  %v5092_v48 = vadd.f32 %v4963_v37, %v5472_v13  ;;  %v1766_v1 = vsub.f32 0.0, %v5070_v27 }
 0x1ad   :  { %v3453_v7 = vpop.eup %3452  ;;  %3472 = vrcp.f32 %v1182_v21  ;;  %v1187_v40 = vadd.f32 1.0, %v3451_v42  ;;  %v5097_v17 = vadd.f32 %v4930_v55, %v4556_v16  ;;  %v1000_v31 = vsub.f32 0.0, %v5078_v45 }
 0x1ae   :  { %v3455_v39 = vpop.eup %3454  ;;  %3474 = vrcp.f32 %v1951_v0  ;;  %v1956_v38 = vadd.f32 1.0, %v3453_v7  ;;  %v1769_v58 = vsub.f32 0.0, %v5082_v22  ;;  %v1886_v50 = vmul.f32 1.442695, %v1768_v19 }
 0x1af   :  { %v3457_v36 = vpop.eup %3456  ;;  %3476 = vrcp.f32 %v1187_v40  ;;  %v1185_v51 = vadd.f32 1.0, %v3455_v39  ;;  %v998_v26 = vsub.f32 0.0, %v5087_v49  ;;  %v1113_v47 = vmul.f32 1.442695, %v997_v15 }
 0x1b0   :  { %v3459_v6 = vpop.eup %3458  ;;  %3478 = vrcp.f32 %v1956_v38  ;;  %v1954_v28 = vadd.f32 1.0, %v3457_v36  ;;  %v1767_v16 = vsub.f32 0.0, %v5092_v48  ;;  %v1882_v60 = vmul.f32 1.442695, %v1766_v1 }
 0x1b1   :  { %v3461_v35 = vpop.eup %3460  ;;  %3480 = vrcp.f32 %v1185_v51  ;;  %v1188_v43 = vadd.f32 1.0, %v3459_v6  ;;  %v1003_v29 = vsub.f32 0.0, %v5097_v17  ;;  %v1119_v9 = vmul.f32 1.442695, %v1000_v31 }
 0x1b2   :  { %v3463_v41 = vpop.eup %3462  ;;  %3482 = vrcp.f32 %v1954_v28  ;;  %v1957_v14 = vadd.f32 1.0, %v3461_v35  ;;  %v1888_v21 = vmul.f32 1.442695, %v1769_v58  ;;  %v1115_v0 = vmul.f32 1.442695, %v998_v26 }
 0x1b3   :  { %v3465_v56 = vpop.eup %3464  ;;  %3484 = vrcp.f32 %v1188_v43  ;;  %v1186_v10 = vadd.f32 1.0, %v3463_v41  ;;  %v5106_v19 = vadd.f32 %v4963_v37, %v4558_v11  ;;  %v1884_v40 = vmul.f32 1.442695, %v1767_v16 }
 0x1b4   :  { %v3467_v32 = vpop.eup %3466  ;;  %3486 = vrcp.f32 %v1957_v14  ;;  %v1955_v42 = vadd.f32 1.0, %v3465_v56  ;;  %v5111_v15 = vadd.f32 %v4930_v55, %v4567_v8  ;;  %v1125_v38 = vmul.f32 1.442695, %v1003_v29 }
 0x1b5   :  { %v3469_v20 = vpop.eup %3468  ;;  %v2142_v7 = vmul.f32 %v3467_v32, %v4878_v59  ;;  %3488 = vrcp.f32 %v1186_v10  ;;  %v5116_v1 = vadd.f32 %v4963_v37, %v4569_v44  ;;  %v5122_v59 = vadd.f32 %v4930_v55, %v4577_v52 }
 0x1b6   :  { %v3471_v13 = vpop.eup %3470  ;;  %v1376_v39 = vmul.f32 %v3469_v20, %v4897_v2  ;;  %3490 = vrcp.f32 %v1955_v42  ;;  %v1772_v58 = vsub.f32 0.0, %v5106_v19  ;;  %v1001_v52 = vsub.f32 0.0, %v5111_v15 }
 0x1b7   :  { %v3473_v11 = vpop.eup %3472  ;;  %v2824_v36 = vpack.c.bf16 %v2142_v7, %v2142_v7  ;;  %v2145_v51 = vmul.f32 %v3471_v13, %v4916_v53  ;;  %3492 = vpow2.f32 %v5066_v46  ;;  %v1004_v43 = vsub.f32 0.0, %v5122_v59 }
 0x1b8   :  { %v3475_v8 = vpop.eup %3474  ;;  %v2763_v31 = vpack.c.bf16 %v1376_v39, %v1376_v39  ;;  %v1374_v2 = vmul.f32 %v3473_v11, %v4934_v25  ;;  %3494 = vpow2.f32 %v1886_v50  ;;  %v1770_v50 = vsub.f32 0.0, %v5116_v1 }
 0x1b9   :  { %v3477_v6 = vpop.eup %3476  ;;  %2462 = vst.msk [vmem:[%s5371_s6 + $0xb0] sm:$0xf] %vm1649_vm2, %v2824_v36  ;;  %v2827_v44 = vpack.c.bf16 %v2145_v51, %v2145_v51  ;;  %v2143_v53 = vmul.f32 %v3475_v8, %v4938_v63  ;;  %3496 = vpow2.f32 %v1113_v47  ;;  %v1894_v41 = vmul.f32 1.442695, %v1772_v58 }
 0x1ba   :  { %v3479_v46 = vpop.eup %3478  ;;  %1697 = vst.msk [vmem:[%s5370_s5 + $0xbc] sm:$0xf] %vm1649_vm2, %v2763_v31  ;;  %v2761_v25 = vpack.c.bf16 %v1374_v2, %v1374_v2  ;;  %v1379_v28 = vmul.f32 %v3477_v6, %v4946_v54  ;;  %3498 = vpow2.f32 %v1882_v60  ;;  %v1121_v29 = vmul.f32 1.442695, %v1001_v52 }
 0x1bb   :  { %v3481_v26 = vpop.eup %3480  ;;  %2465 = vst.msk [vmem:[%s5371_s6 + $0xbc] sm:$0xf] %vm1649_vm2, %v2827_v44  ;;  %v2825_v63 = vpack.c.bf16 %v2143_v53, %v2143_v53  ;;  %v2148_v35 = vmul.f32 %v3479_v46, %v4951_v61  ;;  %3500 = vpow2.f32 %v1119_v9  ;;  %v1890_v9 = vmul.f32 1.442695, %v1770_v50  ;;  %v5474_v46 = vld [vmem:[#allocation38_spill] sm:$0xff] }
 0x1bc   :  { %v3483_v47 = vpop.eup %3482  ;;  %1695 = vst.msk [vmem:[%s5370_s5 + $0xb4] sm:$0xf] %vm1649_vm2, %v2761_v25  ;;  %v2766_v54 = vpack.c.bf16 %v1379_v28, %v1379_v28  ;;  %v1377_v16 = vmul.f32 %v3481_v26, %v4955_v62  ;;  %3502 = vpow2.f32 %v1888_v21  ;;  %v1127_v42 = vmul.f32 1.442695, %v1004_v43 }
 0x1bd   :  { %v3485_v14 = vpop.eup %3484  ;;  %2463 = vst.msk [vmem:[%s5371_s6 + $0xb4] sm:$0xf] %vm1649_vm2, %v2825_v63  ;;  %v2830_v61 = vpack.c.bf16 %v2148_v35, %v2148_v35  ;;  %v2146_v60 = vmul.f32 %v3483_v47, %v4967_v23  ;;  %3504 = vpow2.f32 %v1115_v0  ;;  %v5176_v13 = vadd.f32 %v4963_v37, %v4579_v18  ;;  %v5475_v63 = vld [vmem:[#allocation39_spill] sm:$0xff] }
 0x1be   :  { %v3487_v56 = vpop.eup %3486  ;;  %1700 = vst.msk [vmem:[%s5370_s5 + $0xc8] sm:$0xf] %vm1649_vm2, %v2766_v54  ;;  %v2764_v62 = vpack.c.bf16 %v1377_v16, %v1377_v16  ;;  %v1380_v10 = vmul.f32 %v3485_v14, %v4973_v5  ;;  %3506 = vpow2.f32 %v1884_v40  ;;  %v5184_v11 = vadd.f32 %v4930_v55, %v4588_v12  ;;  %v5476_v54 = vld [vmem:[#allocation40_spill] sm:$0xff] }
 0x1bf   :  { %v3489_v21 = vpop.eup %3488  ;;  %2468 = vst.msk [vmem:[%s5371_s6 + $0xc8] sm:$0xf] %vm1649_vm2, %v2830_v61  ;;  %v2828_v23 = vpack.c.bf16 %v2146_v60, %v2146_v60  ;;  %v2149_v32 = vmul.f32 %v3487_v56, %v4978_v30  ;;  %3508 = vpow2.f32 %v1125_v38  ;;  %v5192_v51 = vadd.f32 %v4963_v37, %v4590_v33  ;;  %v5473_v33 = vld [vmem:[#allocation37_spill] sm:$0xff] }
 0x1c0   :  { %v3491_v0 = vpop.eup %3490  ;;  %1698 = vst.msk [vmem:[%s5370_s5 + $0xc0] sm:$0xf] %vm1649_vm2, %v2764_v62  ;;  %v2767_v5 = vpack.c.bf16 %v1380_v10, %v1380_v10  ;;  %v1378_v20 = vmul.f32 %v3489_v21, %v4985_v24  ;;  %3510 = vpow2.f32 %v1894_v41  ;;  %v1773_v58 = vsub.f32 0.0, %v5176_v13 }
 0x1c1   :  { %v3493_v7 = vpop.eup %3492  ;;  %2466 = vst.msk [vmem:[%s5371_s6 + $0xc0] sm:$0xf] %vm1649_vm2, %v2828_v23  ;;  %v2831_v40 = vpack.c.bf16 %v2149_v32, %v2149_v32  ;;  %v2147_v30 = vmul.f32 %v3491_v0, %v4990_v57  ;;  %3512 = vpow2.f32 %v1121_v29  ;;  %v5205_v6 = vadd.f32 %v4930_v55, %v5473_v33  ;;  %v5480_v33 = vld [vmem:[#allocation44_spill] sm:$0xff] }
 0x1c2   :  { %v3495_v39 = vpop.eup %3494  ;;  %1701 = vst.msk [vmem:[%s5370_s5 + $0xcc] sm:$0xf] %vm1649_vm2, %v2767_v5  ;;  %v2765_v24 = vpack.c.bf16 %v1378_v20, %v1378_v20  ;;  %v1191_v38 = vadd.f32 1.0, %v3493_v7  ;;  %3514 = vpow2.f32 %v1890_v9  ;;  %v1002_v52 = vsub.f32 0.0, %v5184_v11  ;;  %v5477_v20 = vld [vmem:[#allocation41_spill] sm:$0xff] }
 0x1c3   :  { %v3497_v36 = vpop.eup %3496  ;;  %2469 = vst.msk [vmem:[%s5371_s6 + $0xcc] sm:$0xf] %vm1649_vm2, %v2831_v40  ;;  %v2829_v18 = vpack.c.bf16 %v2147_v30, %v2147_v30  ;;  %v1960_v57 = vadd.f32 1.0, %v3495_v39  ;;  %3516 = vpow2.f32 %v1127_v42  ;;  %v5210_v25 = vadd.f32 %v4963_v37, %v5474_v46 }
 0x1c4   :  { %v3499_v8 = vpop.eup %3498  ;;  %1699 = vst.msk [vmem:[%s5370_s5 + $0xc4] sm:$0xf] %vm1649_vm2, %v2765_v24  ;;  %3518 = vrcp.f32 %v1191_v38  ;;  %v1189_v12 = vadd.f32 1.0, %v3497_v36  ;;  %v1771_v26 = vsub.f32 0.0, %v5192_v51  ;;  %v5215_v35 = vadd.f32 %v4930_v55, %v5475_v63  ;;  %v5478_v24 = vld [vmem:[#allocation42_spill] sm:$0xff] }
 0x1c5   :  { %v3501_v31 = vpop.eup %3500  ;;  %2467 = vst.msk [vmem:[%s5371_s6 + $0xc4] sm:$0xf] %vm1649_vm2, %v2829_v18  ;;  %3520 = vrcp.f32 %v1960_v57  ;;  %v1958_v2 = vadd.f32 1.0, %v3499_v8  ;;  %v5219_v16 = vadd.f32 %v4963_v37, %v5476_v54  ;;  %v1896_v61 = vmul.f32 1.442695, %v1773_v58  ;;  %v5479_v8 = vld [vmem:[#allocation43_spill] sm:$0xff] }
 0x1c6   :  { %v3503_v44 = vpop.eup %3502  ;;  %3522 = vrcp.f32 %v1189_v12  ;;  %v1192_v53 = vadd.f32 1.0, %v3501_v31  ;;  %v1007_v60 = vsub.f32 0.0, %v5205_v6  ;;  %v1123_v62 = vmul.f32 1.442695, %v1002_v52 }
 0x1c7   :  { %v3505_v28 = vpop.eup %3504  ;;  %3524 = vrcp.f32 %v1958_v2  ;;  %v1961_v50 = vadd.f32 1.0, %v3503_v44  ;;  %v1776_v10 = vsub.f32 0.0, %v5210_v25  ;;  %v1892_v23 = vmul.f32 1.442695, %v1771_v26 }
 0x1c8   :  { %v3507_v43 = vpop.eup %3506  ;;  %3526 = vrcp.f32 %v1192_v53  ;;  %v1190_v47 = vadd.f32 1.0, %v3505_v28  ;;  %v1005_v32 = vsub.f32 0.0, %v5215_v35  ;;  %v1774_v5 = vsub.f32 0.0, %v5219_v16 }
 0x1c9   :  { %v3509_v41 = vpop.eup %3508  ;;  %3528 = vrcp.f32 %v1961_v50  ;;  %v1959_v14 = vadd.f32 1.0, %v3507_v43  ;;  %v5227_v7 = vadd.f32 %v4930_v55, %v5477_v20  ;;  %v1133_v39 = vmul.f32 1.442695, %v1007_v60 }
 0x1ca   :  { %v3511_v29 = vpop.eup %3510  ;;  %3530 = vrcp.f32 %v1190_v47  ;;  %v1195_v56 = vadd.f32 1.0, %v3509_v41  ;;  %v5231_v38 = vadd.f32 %v4963_v37, %v5478_v24  ;;  %v1902_v57 = vmul.f32 1.442695, %v1776_v10 }
 0x1cb   :  { %v3513_v9 = vpop.eup %3512  ;;  %3532 = vrcp.f32 %v1959_v14  ;;  %v1964_v21 = vadd.f32 1.0, %v3511_v29  ;;  %v5235_v12 = vadd.f32 %v4930_v55, %v5479_v8  ;;  %v1129_v58 = vmul.f32 1.442695, %v1005_v32 }
 0x1cc   :  { %v3515_v42 = vpop.eup %3514  ;;  %3534 = vrcp.f32 %v1195_v56  ;;  %v1193_v0 = vadd.f32 1.0, %v3513_v9  ;;  %v5240_v44 = vadd.f32 %v4963_v37, %v5480_v33  ;;  %v1898_v46 = vmul.f32 1.442695, %v1774_v5 }
 0x1cd   :  { %v3517_v40 = vpop.eup %3516  ;;  %3536 = vrcp.f32 %v1964_v21  ;;  %v1962_v30 = vadd.f32 1.0, %v3515_v42  ;;  %v1008_v28 = vsub.f32 0.0, %v5227_v7  ;;  %v1006_v37 = vsub.f32 0.0, %v5235_v12 }
 0x1ce   :  { %v3519_v36 = vpop.eup %3518  ;;  %3538 = vrcp.f32 %v1193_v0  ;;  %v1196_v18 = vadd.f32 1.0, %v3517_v40 }
 0x1cf   :  { %v3521_v31 = vpop.eup %3520  ;;  %v1383_v2 = vmul.f32 %v3519_v36, %v5018_v34  ;;  %3540 = vrcp.f32 %v1962_v30  ;;  %v1777_v34 = vsub.f32 0.0, %v5231_v38  ;;  %v1135_v60 = vmul.f32 1.442695, %v1008_v28 }
 0x1d0   :  { %v3523_v53 = vpop.eup %3522  ;;  %v2152_v52 = vmul.f32 %v3521_v31, %v5052_v3  ;;  %3542 = vrcp.f32 %v1196_v18  ;;  %v1131_v21 = vmul.f32 1.442695, %v1006_v37 }
 0x1d1   :  { %v3525_v50 = vpop.eup %3524  ;;  %v2770_v26 = vpack.c.bf16 %v1383_v2, %v1383_v2  ;;  %v1381_v55 = vmul.f32 %v3523_v53, %v5060_v4  ;;  %3544 = vpow2.f32 %v1896_v61  ;;  %v1775_v4 = vsub.f32 0.0, %v5240_v44 }
 0x1d2   :  { %v3527_v63 = vpop.eup %3526  ;;  %v2834_v43 = vpack.c.bf16 %v2152_v52, %v2152_v52  ;;  %v2150_v47 = vmul.f32 %v3525_v50, %v5070_v27  ;;  %3546 = vpow2.f32 %v1123_v62  ;;  %v1904_v62 = vmul.f32 1.442695, %v1777_v34 }
 0x1d3   :  { %v3529_v54 = vpop.eup %3528  ;;  %1704 = vst.msk [vmem:[%s5370_s5 + $0xd8] sm:$0xf] %vm1649_vm2, %v2770_v26  ;;  %v2768_v3 = vpack.c.bf16 %v1381_v55, %v1381_v55  ;;  %v1384_v41 = vmul.f32 %v3527_v63, %v5078_v45  ;;  %3548 = vpow2.f32 %v1892_v23  ;;  %v1900_v42 = vmul.f32 1.442695, %v1775_v4 }
 0x1d4   :  { %v3531_v14 = vpop.eup %3530  ;;  %2472 = vst.msk [vmem:[%s5371_s6 + $0xd8] sm:$0xf] %vm1649_vm2, %v2834_v43  ;;  %v2832_v27 = vpack.c.bf16 %v2150_v47, %v2150_v47  ;;  %v2153_v61 = vmul.f32 %v3529_v54, %v5082_v22  ;;  %3550 = vpow2.f32 %v1133_v39 }
 0x1d5   :  { %v3533_v29 = vpop.eup %3532  ;;  %1702 = vst.msk [vmem:[%s5370_s5 + $0xd0] sm:$0xf] %vm1649_vm2, %v2768_v3  ;;  %v2771_v45 = vpack.c.bf16 %v1384_v41, %v1384_v41  ;;  %v1382_v56 = vmul.f32 %v3531_v14, %v5087_v49  ;;  %3552 = vpow2.f32 %v1902_v57 }
 0x1d6   :  { %v3535_v10 = vpop.eup %3534  ;;  %2470 = vst.msk [vmem:[%s5371_s6 + $0xd0] sm:$0xf] %vm1649_vm2, %v2832_v27  ;;  %v2835_v22 = vpack.c.bf16 %v2153_v61, %v2153_v61  ;;  %v2151_v9 = vmul.f32 %v3533_v29, %v5092_v48  ;;  %3554 = vpow2.f32 %v1129_v58 }
 0x1d7   :  { %v3537_v23 = vpop.eup %3536  ;;  %1705 = vst.msk [vmem:[%s5370_s5 + $0xdc] sm:$0xf] %vm1649_vm2, %v2771_v45  ;;  %v2769_v49 = vpack.c.bf16 %v1382_v56, %v1382_v56  ;;  %v1387_v32 = vmul.f32 %v3535_v10, %v5097_v17  ;;  %3556 = vpow2.f32 %v1898_v46 }
 0x1d8   :  { %v3539_v0 = vpop.eup %3538  ;;  %2473 = vst.msk [vmem:[%s5371_s6 + $0xdc] sm:$0xf] %vm1649_vm2, %v2835_v22  ;;  %v2833_v48 = vpack.c.bf16 %v2151_v9, %v2151_v9  ;;  %v2156_v5 = vmul.f32 %v3537_v23, %v5106_v19  ;;  %3558 = vpow2.f32 %v1135_v60 }
 0x1d9   :  { %v3541_v20 = vpop.eup %3540  ;;  %1703 = vst.msk [vmem:[%s5370_s5 + $0xd4] sm:$0xf] %vm1649_vm2, %v2769_v49  ;;  %v2774_v40 = vpack.c.bf16 %v1387_v32, %v1387_v32  ;;  %v1385_v17 = vmul.f32 %v3539_v0, %v5111_v15  ;;  %3560 = vpow2.f32 %v1904_v62 }
 0x1da   :  { %v3543_v30 = vpop.eup %3542  ;;  %2471 = vst.msk [vmem:[%s5371_s6 + $0xd4] sm:$0xf] %vm1649_vm2, %v2833_v48  ;;  %v2838_v39 = vpack.c.bf16 %v2156_v5, %v2156_v5  ;;  %v2154_v19 = vmul.f32 %v3541_v20, %v5116_v1  ;;  %3562 = vpow2.f32 %v1131_v21 }
 0x1db   :  { %v3545_v24 = vpop.eup %3544  ;;  %1708 = vst.msk [vmem:[%s5370_s5 + $0xe8] sm:$0xf] %vm1649_vm2, %v2774_v40  ;;  %v2772_v36 = vpack.c.bf16 %v1385_v17, %v1385_v17  ;;  %v1388_v15 = vmul.f32 %v3543_v30, %v5122_v59  ;;  %3564 = vpow2.f32 %v1900_v42 }
 0x1dc   :  { %v3547_v18 = vpop.eup %3546  ;;  %2476 = vst.msk [vmem:[%s5371_s6 + $0xe8] sm:$0xf] %vm1649_vm2, %v2838_v39  ;;  %v2836_v57 = vpack.c.bf16 %v2154_v19, %v2154_v19  ;;  %v1965_v8 = vadd.f32 1.0, %v3545_v24 }
 0x1dd   :  { %v3549_v1 = vpop.eup %3548  ;;  %1706 = vst.msk [vmem:[%s5370_s5 + $0xe0] sm:$0xf] %vm1649_vm2, %v2772_v36  ;;  %v2775_v31 = vpack.c.bf16 %v1388_v15, %v1388_v15  ;;  %v1194_v2 = vadd.f32 1.0, %v3547_v18 }
 0x1de   :  { %v3551_v58 = vpop.eup %3550  ;;  %2474 = vst.msk [vmem:[%s5371_s6 + $0xe0] sm:$0xf] %vm1649_vm2, %v2836_v57  ;;  %3566 = vrcp.f32 %v1965_v8  ;;  %v1963_v59 = vadd.f32 1.0, %v3549_v1 }
 0x1df   :  { %v3553_v33 = vpop.eup %3552  ;;  %1709 = vst.msk [vmem:[%s5370_s5 + $0xec] sm:$0xf] %vm1649_vm2, %v2775_v31  ;;  %3568 = vrcp.f32 %v1194_v2  ;;  %v1199_v53 = vadd.f32 1.0, %v3551_v58 }
 0x1e0   :  { %v3555_v52 = vpop.eup %3554  ;;  %3570 = vrcp.f32 %v1963_v59  ;;  %v1968_v46 = vadd.f32 1.0, %v3553_v33 }
 0x1e1   :  { %v3557_v28 = vpop.eup %3556  ;;  %3572 = vrcp.f32 %v1199_v53  ;;  %v1197_v50 = vadd.f32 1.0, %v3555_v52 }
 0x1e2   :  { %v3559_v26 = vpop.eup %3558  ;;  %3574 = vrcp.f32 %v1968_v46  ;;  %v1966_v55 = vadd.f32 1.0, %v3557_v28 }
 0x1e3   :  { %v3561_v34 = vpop.eup %3560  ;;  %3576 = vrcp.f32 %v1197_v50  ;;  %v1200_v63 = vadd.f32 1.0, %v3559_v26 }
 0x1e4   :  { %v3563_v43 = vpop.eup %3562  ;;  %3578 = vrcp.f32 %v1966_v55  ;;  %v1969_v47 = vadd.f32 1.0, %v3561_v34 }
 0x1e5   :  { %v3565_v37 = vpop.eup %3564  ;;  %3580 = vrcp.f32 %v1200_v63  ;;  %v1198_v54 = vadd.f32 1.0, %v3563_v43 }
 0x1e6   :  { %3582 = vrcp.f32 %v1969_v47  ;;  %v1967_v3 = vadd.f32 1.0, %v3565_v37 }
 0x1e7   :  { %3584 = vrcp.f32 %v1198_v54 }
 0x1e8   :  { %v3567_v41 = vpop.eup %3566  ;;  %3586 = vrcp.f32 %v1967_v3 }
 0x1e9   :  { %v3569_v4 = vpop.eup %3568  ;;  %v2157_v14 = vmul.f32 %v3567_v41, %v5176_v13 }
 0x1ea   :  { %v3571_v27 = vpop.eup %3570  ;;  %v1386_v61 = vmul.f32 %v3569_v4, %v5184_v11 }
 0x1eb   :  { %v3573_v60 = vpop.eup %3572  ;;  %v2839_v29 = vpack.c.bf16 %v2157_v14, %v2157_v14  ;;  %v2155_v45 = vmul.f32 %v3571_v27, %v5192_v51 }
 0x1ec   :  { %v3575_v56 = vpop.eup %3574  ;;  %v2773_v62 = vpack.c.bf16 %v1386_v61, %v1386_v61  ;;  %v1391_v10 = vmul.f32 %v3573_v60, %v5205_v6 }
 0x1ed   :  { %v3577_v22 = vpop.eup %3576  ;;  %2477 = vst.msk [vmem:[%s5371_s6 + $0xec] sm:$0xf] %vm1649_vm2, %v2839_v29  ;;  %v2837_v9 = vpack.c.bf16 %v2155_v45, %v2155_v45  ;;  %v2160_v13 = vmul.f32 %v3575_v56, %v5210_v25 }
 0x1ee   :  { %v3579_v21 = vpop.eup %3578  ;;  %1707 = vst.msk [vmem:[%s5370_s5 + $0xe4] sm:$0xf] %vm1649_vm2, %v2773_v62  ;;  %v2778_v11 = vpack.c.bf16 %v1391_v10, %v1391_v10  ;;  %v1389_v51 = vmul.f32 %v3577_v22, %v5215_v35 }
 0x1ef   :  { %v3581_v23 = vpop.eup %3580  ;;  %2475 = vst.msk [vmem:[%s5371_s6 + $0xe4] sm:$0xf] %vm1649_vm2, %v2837_v9  ;;  %v2842_v6 = vpack.c.bf16 %v2160_v13, %v2160_v13  ;;  %v2158_v49 = vmul.f32 %v3579_v21, %v5219_v16 }
 0x1f0   :  { %v3583_v32 = vpop.eup %3582  ;;  %1712 = vst.msk [vmem:[%s5370_s5 + $0xf8] sm:$0xf] %vm1649_vm2, %v2778_v11  ;;  %v2776_v25 = vpack.c.bf16 %v1389_v51, %v1389_v51  ;;  %v1392_v42 = vmul.f32 %v3581_v23, %v5227_v7 }
 0x1f1   :  { %v3585_v0 = vpop.eup %3584  ;;  %2480 = vst.msk [vmem:[%s5371_s6 + $0xf8] sm:$0xf] %vm1649_vm2, %v2842_v6  ;;  %v2840_v35 = vpack.c.bf16 %v2158_v49, %v2158_v49  ;;  %v2161_v48 = vmul.f32 %v3583_v32, %v5231_v38 }
 0x1f2   :  { %v3587_v5 = vpop.eup %3586  ;;  %1710 = vst.msk [vmem:[%s5370_s5 + $0xf0] sm:$0xf] %vm1649_vm2, %v2776_v25  ;;  %v2779_v16 = vpack.c.bf16 %v1392_v42, %v1392_v42  ;;  %v1390_v20 = vmul.f32 %v3585_v0, %v5235_v12 }
 0x1f3   :  { %2478 = vst.msk [vmem:[%s5371_s6 + $0xf0] sm:$0xf] %vm1649_vm2, %v2840_v35  ;;  %v2843_v7 = vpack.c.bf16 %v2161_v48, %v2161_v48  ;;  %v2159_v40 = vmul.f32 %v3587_v5, %v5240_v44 }
 0x1f4   :  { %1713 = vst.msk [vmem:[%s5370_s5 + $0xfc] sm:$0xf] %vm1649_vm2, %v2779_v16  ;;  %v2777_v38 = vpack.c.bf16 %v1390_v20, %v1390_v20 }
 0x1f5   :  { %2481 = vst.msk [vmem:[%s5371_s6 + $0xfc] sm:$0xf] %vm1649_vm2, %v2843_v7  ;;  %v2841_v12 = vpack.c.bf16 %v2159_v40, %v2159_v40 }
 0x1f6   :  { %1711 = vst.msk [vmem:[%s5370_s5 + $0xf4] sm:$0xf] %vm1649_vm2, %v2777_v38 }
 0x1f7   :  { %2479 = vst.msk [vmem:[%s5371_s6 + $0xf4] sm:$0xf] %vm1649_vm2, %v2841_v12 }

// kernel: csplayer_forward.3
= control target key start
LH: loop header
LB: loop body
LE: loop exit
PB: predicated region body
PF: predicated region fallthrough
CT: control target
= control target key end

     0   :  { %s6609_s17 = smov 0   ;;  %s6611_s18 = smov 0   ;;  %s8232_s0 = inlined_call_operand.vmem [shape: bf16[2,16,16,8], index: 0, kind: input, shape index: {}, may-alias: {0,1,2}]   ;;  %s8233_s1 = inlined_call_operand.vmem [shape: bf16[2,16,16,8], index: 1, kind: input, shape index: {}, may-alias: {0,1,2}]   ;;  %s8234_s2 = inlined_call_operand.vmem [shape: bf16[2,16,16,8], index: 2, kind: input, shape index: {}, may-alias: {0,1,2}]   ;;  %s8235_s3 = inlined_call_operand.vmem [shape: bf16[2,16,16,8], index: 3, kind: input, shape index: {}]   ;;  %s8236_s4 = inlined_call_operand.vmem [shape: bf16[8,8], index: 4, kind: input, shape index: {}]   ;;  %s8237_s5 = inlined_call_operand.vmem [shape: f32[1,8], index: 5, kind: input, shape index: {}]   ;;  %s8238_s6 = inlined_call_operand.vmem [shape: bf16[9,8,8], index: 6, kind: input, shape index: {}]   ;;  %s8239_s7 = inlined_call_operand.vmem [shape: f32[1,8], index: 7, kind: input, shape index: {}]   ;;  %s8240_s8 = inlined_call_operand.vmem [shape: bf16[8,16], index: 8, kind: input, shape index: {}]   ;;  %s8241_s9 = inlined_call_operand.vmem [shape: bf16[8,16], index: 9, kind: input, shape index: {}]   ;;  %s8242_s10 = inlined_call_operand.vmem [shape: f32[1,16], index: 10, kind: input, shape index: {}]   ;;  %s8243_s11 = inlined_call_operand.vmem [shape: bf16[2,16,16,16], index: 11, kind: output, shape index: {}]  }
   0x1   :  { %s6613_s19 = smov 0  }
   0x2 LB: > { %s33_s20 = sadd.s32 1, %s6542_s18  ;;  %p4818_p0 = scmp.ge.s32.totalorder %s6546_s19, 1  ;;  %s6546_s19 = sphi %s6613_s19, %s21_s19   ;;  %s6542_s18 = sphi %s6611_s18, %s8281_s18   ;;  %s6538_s17 = sphi %s6609_s17, %s8280_s17  }
   0x3   : > { %p35_p1 = scmp.ge.s32.totalorder %s33_s20, 2  ;;  %p441_p2 = scmp.lt.s32.totalorder %s6546_s19, 3 }
   0x5   : > { %s8283_s20 = smov (%p35_p1, %s33_s20), 0  ;;  %p442_p3 = pnand %p4818_p0, %p441_p2 }
   0x7   : > { %445 = sbr.rel (%p442_p3) target bundleno = 1200 (0x4b0), region = 64 }
   0xe   : > { %v631_v0 = vld [vmem:[%s8236_s4] sm:$0xf]  ;;  %vm794_vm0 = vcmask 1043456   ;;  %p528_p4 = scmp.lt.s32.totalorder %s6538_s17, 1  ;;  %vm739_vm1 = vcmask 64512   ;;  %v8248_v22 = vmov 0  }
   0xf   : > { %6037 = vmatprep.subr.msk.bf16.mxu0 %vm794_vm0, %v631_v0  ;;  %v796_v1 = vsel %vm794_vm0, %v631_v0, 0  ;;  %v634_v20 = vld [vmem:[%s8238_s6 + $0x4] sm:$0xf]  ;;  %v636_v23 = vld [vmem:[%s8238_s6 + $0xc] sm:$0xf]  ;;  %vm1411_vm2 = vcmask 1040384  }
  0x10   : > { %5338 = vmatpush3.bf16.msra.mxu0 %v796_v1  ;;  %s8285_s17 = smov (!%p528_p4, %s6538_s17), 1  ;;  %v1540_v21 = vsel %vm794_vm0, %v634_v20, 0  ;;  %6041 = vmatprep.subr.msk.bf16.mxu1 %vm794_vm0, %v636_v23  ;;  %v2163_v24 = vsel %vm794_vm0, %v636_v23, 0  ;;  %v6702_v25 = vld [vmem:[%s8238_s6 + $0x10] sm:$0xf]  ;;  %vm1486_vm5 = vcmask 1047552  }
  0x11   : > { %s6632_s23 = sshll.u32 %s8285_s17, 7  ;;  %6038 = vmatprep.subr.msk.bf16.mxu0 %vm794_vm0, %v634_v20  ;;  %5478 = vmatpush3.bf16.msra.mxu1 %v2163_v24  ;;  %v6709_v26 = vld [vmem:[%s8238_s6] sm:$0xf]  ;;  %vm1412_vm3 = vsmask.f32 256  ;;  %vm4622_vm8 = vcmask 125952  }
  0x12   : > { %s6638_s26 = scalar_lea.vmem %s8232_s0, %s6632_s23  ;;  %s550_s29 = scalar_lea.vmem %s8233_s1, %s6632_s23  ;;  %6042 = vmatprep.subr.msk.bf16.mxu1 %vm794_vm0, %v6702_v25  ;;  %v6716_v27 = vld [vmem:[%s8237_s5] ss:$0 sm:$0xff]  ;;  %vm6834_vm4 = vmand %vm1411_vm2, %vm1412_vm3  ;;  %vm1487_vm6 = vsmask.f32 7424 }
  0x13   : > { %v6074_v2 = vld [vmem:[%s550_s29] sm:$0xff]   ;;  %v597_v4 = vld [vmem:[%s6638_s26 + $0x8] sm:$0xff]   ;;  %s5095_s30 = sadd.s32 120, %s6632_s23  ;;  %v599_v5 = vld [vmem:[%s6638_s26 + $0x10] sm:$0xff]   ;;  %s6658_s17 = scalar_lea.vmem %s8235_s3, %s6632_s23 }
  0x14   : > { %v595_v3 = vld [vmem:[%s6638_s26] sm:$0xff]   ;;  %5339 = vmatprep.mubr.msk.bf16.mxu0 %vm739_vm1, %v6074_v2  ;;  %s567_s14 = scalar_lea.vmem %s8234_s2, %s5095_s30  ;;  %v601_v6 = vld [vmem:[%s6638_s26 + $0x18] sm:$0xff]   ;;  %v605_v8 = vld [vmem:[%s6638_s26 + $0x28] sm:$0xff]   ;;  %s8052_s24 = scalar_lea.vmem %s8243_s11, %s6632_s23 }
  0x15   : > { %5340 = vmatmul.mubr.msk.bf16.vlgmr.msra.gmra.mrb[0].mxu0 %vm739_vm1, %v595_v3  ;;  %v603_v7 = vld [vmem:[%s6638_s26 + $0x20] sm:$0xff]   ;;  %v607_v9 = vld [vmem:[%s6638_s26 + $0x30] sm:$0xff]   ;;  %v609_v10 = vld [vmem:[%s6638_s26 + $0x38] sm:$0xff]  }
  0x16   : > { %5343 = vmatprep.mubr.msk.bf16.mxu0 %vm739_vm1, %v597_v4  ;;  %v611_v11 = vld [vmem:[%s6638_s26 + $0x40] sm:$0xff]   ;;  %v613_v12 = vld [vmem:[%s6638_s26 + $0x48] sm:$0xff]   ;;  %v615_v13 = vld [vmem:[%s6638_s26 + $0x50] sm:$0xff]   ;;  %5376 = vmatpush3.bf16.msra.mxu0 %v1540_v21 }
  0x17   : > { %v617_v14 = vld [vmem:[%s6638_s26 + $0x58] sm:$0xff]   ;;  %v619_v15 = vld [vmem:[%s6638_s26 + $0x60] sm:$0xff]   ;;  %v621_v16 = vld [vmem:[%s6638_s26 + $0x68] sm:$0xff]   ;;  %6039 = vmatprep.subr.msk.bf16.mxu0 %vm794_vm0, %v6709_v26 }
  0x18   : > { %v623_v17 = vld [vmem:[%s6638_s26 + $0x70] sm:$0xff]   ;;  %v625_v18 = vld [vmem:[%s6638_s26 + $0x78] sm:$0xff]   ;;  %v6091_v19 = vld [vmem:[%s567_s14] sm:$0xff]  }
  0x19   : > { %vm7206_vm7 = vmand %vm1486_vm5, %vm1487_vm6 }
  0x1d   : > { %5344 = vmatmul.mubr.msk.bf16.gmra.mrb[4].mxu0 %vm739_vm1, %v599_v5 }
  0x1e   : > { %5347 = vmatprep.mubr.msk.bf16.mxu0 %vm739_vm1, %v601_v6 }
  0x25   : > { %5348 = vmatmul.mubr.msk.bf16.gmra.mrb[8].mxu0 %vm739_vm1, %v603_v7 }
  0x26   : > { %5351 = vmatprep.mubr.msk.bf16.mxu0 %vm739_vm1, %v605_v8 }
  0x2d   : > { %5352 = vmatmul.mubr.msk.bf16.gmra.mrb[12].mxu0 %vm739_vm1, %v607_v9 }
  0x2e   : > { %5355 = vmatprep.mubr.msk.bf16.mxu0 %vm739_vm1, %v609_v10 }
  0x35   : > { %5356 = vmatmul.mubr.msk.bf16.gmra.mrb[16].mxu0 %vm739_vm1, %v611_v11 }
  0x36   : > { %5359 = vmatprep.mubr.msk.bf16.mxu0 %vm739_vm1, %v613_v12 }
  0x3d   : > { %5360 = vmatmul.mubr.msk.bf16.gmra.mrb[20].mxu0 %vm739_vm1, %v615_v13 }
  0x3e   : > { %5363 = vmatprep.mubr.msk.bf16.mxu0 %vm739_vm1, %v617_v14 }
  0x45   : > { %5364 = vmatmul.mubr.msk.bf16.gmra.mrb[24].mxu0 %vm739_vm1, %v619_v15 }
  0x46   : > { %5367 = vmatprep.mubr.msk.bf16.mxu0 %vm739_vm1, %v621_v16 }
  0x4d   : > { %5368 = vmatmul.mubr.msk.bf16.gmra.mrb[28].mxu0 %vm739_vm1, %v623_v17 }
  0x4e   : > { %5371 = vmatprep.mubr.msk.bf16.mxu0 %vm739_vm1, %v625_v18 }
  0x55   : > { %5372 = vmatmul.mubr.msk.bf16.gmra.mrb[32].mxu0 %vm739_vm1, %v6091_v19 }
  0x56   : > { %5377 = vmatprep.mubr.bf16.mxu0 %v8248_v22 }
  0xe8   : > { %v5341_v28 = vpop.f32.mrb[0].mxu0 }
  0xe9   : > { %v6719_v29 = vadd.f32 %v5341_v28, %v6716_v27  ;;  %v832_v30 = vpop.f32.mrb[1].mxu0 }
  0xea   : > { %v5342_v31 = vpop.f32.mrb[2].mxu0 }
  0xeb   : > { %v977_v32 = vsub.f32 0.0, %v6719_v29  ;;  %v6723_v33 = vadd.f32 %v5342_v31, %v6716_v27  ;;  %v835_v34 = vpop.f32.mrb[3].mxu0 }
  0xed   : > { %v1015_v35 = vmul.f32 1.442695, %v977_v32  ;;  %v978_v36 = vsub.f32 0.0, %v6723_v33 }
  0xef   : > { %6124 = vpow2.f32 %v1015_v35  ;;  %v1017_v37 = vmul.f32 1.442695, %v978_v36 }
  0xf0   : > { %v5345_v38 = vpop.f32.mrb[4].mxu0 }
  0xf1   : > { %6126 = vpow2.f32 %v1017_v37  ;;  %v6727_v39 = vadd.f32 %v5345_v38, %v6716_v27  ;;  %v848_v40 = vpop.f32.mrb[5].mxu0 }
  0xf2   : > { %v6730_v41 = vadd.f32 %v6716_v27, %v848_v40  ;;  %v5346_v42 = vpop.f32.mrb[6].mxu0 }
  0xf3   : > { %v981_v43 = vsub.f32 0.0, %v6727_v39  ;;  %v6734_v44 = vadd.f32 %v5346_v42, %v6716_v27  ;;  %v851_v45 = vpop.f32.mrb[7].mxu0 }
  0xf4   : > { %v979_v46 = vsub.f32 0.0, %v6730_v41  ;;  %v6738_v47 = vadd.f32 %v6716_v27, %v851_v45 }
  0xf5   : > { %v1023_v48 = vmul.f32 1.442695, %v981_v43  ;;  %v982_v49 = vsub.f32 0.0, %v6734_v44 }
  0xf6   : > { %v1019_v50 = vmul.f32 1.442695, %v979_v46  ;;  %v980_v51 = vsub.f32 0.0, %v6738_v47  ;;  %v6776_v46 = vsel %vm794_vm0, %v6702_v25, 0 }
  0xf7   : > { %6128 = vpow2.f32 %v1023_v48  ;;  %v1025_v52 = vmul.f32 1.442695, %v982_v49 }
  0xf8   : > { %6130 = vpow2.f32 %v1019_v50  ;;  %v1021_v53 = vmul.f32 1.442695, %v980_v51  ;;  %v5349_v54 = vpop.f32.mrb[8].mxu0 }
  0xf9   : > { %v6125_v55 = vpop.eup %6124  ;;  %6132 = vpow2.f32 %v1025_v52  ;;  %v6743_v56 = vadd.f32 %v5349_v54, %v6716_v27  ;;  %v864_v57 = vpop.f32.mrb[9].mxu0 }
  0xfa   : > { %v1085_v58 = vadd.f32 1.0, %v6125_v55  ;;  %6134 = vpow2.f32 %v1021_v53  ;;  %v6746_v59 = vadd.f32 %v6716_v27, %v864_v57  ;;  %v5350_v60 = vpop.f32.mrb[10].mxu0  ;;  %v1752_v57 = vsel %vm794_vm0, %v6709_v26, 0 }
  0xfb   : > { %v6127_v61 = vpop.eup %6126  ;;  %v985_v62 = vsub.f32 0.0, %v6743_v56  ;;  %v6750_v63 = vadd.f32 %v5350_v60, %v6716_v27  ;;  %v867_v0 = vpop.f32.mrb[11].mxu0 }
  0xfc   : > { %6136 = vrcp.f32 %v1085_v58  ;;  %v1086_v1 = vadd.f32 1.0, %v6127_v61  ;;  %v983_v2 = vsub.f32 0.0, %v6746_v59  ;;  %v6754_v3 = vadd.f32 %v6716_v27, %v867_v0 }
  0xfd   : > { %v1031_v4 = vmul.f32 1.442695, %v985_v62  ;;  %v986_v5 = vsub.f32 0.0, %v6750_v63 }
  0xfe   : > { %6138 = vrcp.f32 %v1086_v1  ;;  %v1027_v6 = vmul.f32 1.442695, %v983_v2  ;;  %v984_v7 = vsub.f32 0.0, %v6754_v3 }
  0xff   : > { %6140 = vpow2.f32 %v1031_v4  ;;  %v1033_v8 = vmul.f32 1.442695, %v986_v5 }
 0x100   : > { %6142 = vpow2.f32 %v1027_v6  ;;  %v1029_v9 = vmul.f32 1.442695, %v984_v7  ;;  %v5353_v10 = vpop.f32.mrb[12].mxu0 }
 0x101   : > { %v6129_v11 = vpop.eup %6128  ;;  %6144 = vpow2.f32 %v1033_v8  ;;  %v6759_v12 = vadd.f32 %v5353_v10, %v6716_v27  ;;  %v880_v13 = vpop.f32.mrb[13].mxu0 }
 0x102   : > { %v6131_v14 = vpop.eup %6130  ;;  %v1089_v15 = vadd.f32 1.0, %v6129_v11  ;;  %6146 = vpow2.f32 %v1029_v9  ;;  %v6762_v16 = vadd.f32 %v6716_v27, %v880_v13  ;;  %v5354_v17 = vpop.f32.mrb[14].mxu0 }
 0x103   : > { %v6133_v18 = vpop.eup %6132  ;;  %v1087_v19 = vadd.f32 1.0, %v6131_v14  ;;  %v989_v20 = vsub.f32 0.0, %v6759_v12  ;;  %v6766_v21 = vadd.f32 %v5354_v17, %v6716_v27  ;;  %v883_v23 = vpop.f32.mrb[15].mxu0 }
 0x104   : > { %v6135_v24 = vpop.eup %6134  ;;  %6148 = vrcp.f32 %v1089_v15  ;;  %v1090_v28 = vadd.f32 1.0, %v6133_v18  ;;  %v987_v30 = vsub.f32 0.0, %v6762_v16  ;;  %v6770_v31 = vadd.f32 %v6716_v27, %v883_v23 }
 0x105   : > { %6150 = vrcp.f32 %v1087_v19  ;;  %v1088_v32 = vadd.f32 1.0, %v6135_v24  ;;  %v1039_v34 = vmul.f32 1.442695, %v989_v20  ;;  %v990_v35 = vsub.f32 0.0, %v6766_v21 }
 0x106   : > { %v6137_v36 = vpop.eup %6136  ;;  %6152 = vrcp.f32 %v1090_v28  ;;  %v1035_v37 = vmul.f32 1.442695, %v987_v30  ;;  %v988_v38 = vsub.f32 0.0, %v6770_v31 }
 0x107   : > { %6154 = vrcp.f32 %v1088_v32  ;;  %v1041_v40 = vmul.f32 1.442695, %v990_v35  ;;  %v1193_v49 = vmul.f32 %v6137_v36, %v6719_v29 }
 0x108   : > { %v6139_v42 = vpop.eup %6138  ;;  %6156 = vpow2.f32 %v1039_v34  ;;  %v1037_v43 = vmul.f32 1.442695, %v988_v38  ;;  %v5357_v45 = vpop.f32.mrb[16].mxu0 }
 0x109   : > { %v6141_v48 = vpop.eup %6140  ;;  %v1194_v50 = vmul.f32 %v6139_v42, %v6723_v33  ;;  %6158 = vpow2.f32 %v1035_v37  ;;  %v6781_v51 = vadd.f32 %v5357_v45, %v6716_v27  ;;  %v896_v52 = vpop.f32.mrb[17].mxu0  ;;  %v6819_v37 = vld [vmem:[%s8238_s6 + $0x8] sm:$0xf] }
 0x10a   : > { %v6143_v53 = vpop.eup %6142  ;;  %v1093_v54 = vadd.f32 1.0, %v6141_v48  ;;  %6160 = vpow2.f32 %v1041_v40  ;;  %v6784_v55 = vadd.f32 %v6716_v27, %v896_v52  ;;  %v5358_v25 = vpop.f32.mrb[18].mxu0  ;;  %v639_v52 = vld [vmem:[%s8238_s6 + $0x18] sm:$0xf] }
 0x10b   : > { %v6145_v29 = vpop.eup %6144  ;;  %v6788_v58 = vpack.c.bf16 %v1194_v50, %v1193_v49  ;;  %v1091_v33 = vadd.f32 1.0, %v6143_v53  ;;  %6162 = vpow2.f32 %v1037_v43  ;;  %v993_v60 = vsub.f32 0.0, %v6781_v51  ;;  %v899_v61 = vpop.f32.mrb[19].mxu0 }
 0x10c   : > { %v6147_v62 = vpop.eup %6146  ;;  %6164 = vrcp.f32 %v1093_v54  ;;  %v1094_v0 = vadd.f32 1.0, %v6145_v29  ;;  %v991_v1 = vsub.f32 0.0, %v6784_v55  ;;  %v6793_v2 = vadd.f32 %v5358_v25, %v6716_v27 }
 0x10d   : > { %6166 = vrcp.f32 %v1091_v33  ;;  %v1092_v4 = vadd.f32 1.0, %v6147_v62  ;;  %v1047_v5 = vmul.f32 1.442695, %v993_v60  ;;  %v6796_v26 = vadd.f32 %v6716_v27, %v899_v61  ;;  %5378 = vmatmul.mubr.msk.bf16.vlgmr.msra.gmra.mrb[36].mxu0 %vm739_vm1, %v6788_v58 }
 0x10e   : > { %v6149_v6 = vpop.eup %6148  ;;  %6168 = vrcp.f32 %v1094_v0  ;;  %v1043_v7 = vmul.f32 1.442695, %v991_v1  ;;  %v994_v8 = vsub.f32 0.0, %v6793_v2  ;;  %v1275_v9 = vshrl.u32 %v6788_v58, 16  ;;  %5410 = vmatpush3.bf16.msra.mxu0 %v1752_v57 }
 0x10f   : > { %v6151_v10 = vpop.eup %6150  ;;  %v1197_v11 = vmul.f32 %v6149_v6, %v6727_v39  ;;  %6170 = vrcp.f32 %v1092_v4  ;;  %v992_v13 = vsub.f32 0.0, %v6796_v26  ;;  %v1278_v14 = vshll.u32 %v6788_v58, 16  ;;  %6040 = vmatprep.subr.msk.bf16.mxu0 %vm794_vm0, %v6819_v37 }
 0x110   : > { %v6153_v15 = vpop.eup %6152  ;;  %v1195_v17 = vmul.f32 %v6151_v10, %v6730_v41  ;;  %6172 = vpow2.f32 %v1047_v5  ;;  %v1049_v18 = vmul.f32 1.442695, %v994_v8  ;;  %v5361_v19 = vpop.f32.mrb[20].mxu0  ;;  %v1277_v20 = vrot.slane %v1275_v9, 7 }
 0x111   : > { %v6155_v23 = vpop.eup %6154  ;;  %v1198_v24 = vmul.f32 %v6153_v15, %v6734_v44  ;;  %6174 = vpow2.f32 %v1043_v7  ;;  %v1045_v28 = vmul.f32 1.442695, %v992_v13  ;;  %v6810_v39 = vadd.f32 %v5361_v19, %v6716_v27  ;;  %v912_v30 = vpop.f32.mrb[21].mxu0 }
 0x112   : > { %v6157_v32 = vpop.eup %6156  ;;  %v1196_v34 = vmul.f32 %v6155_v23, %v6738_v47  ;;  %6176 = vpow2.f32 %v1049_v18  ;;  %v6814_v41 = vadd.f32 %v6716_v27, %v912_v30  ;;  %v5362_v35 = vpop.f32.mrb[22].mxu0  ;;  %v1280_v36 = vor.u32 %v1278_v14, %v1277_v20 }
 0x113   : > { %v6159_v44 = vpop.eup %6158  ;;  %v6821_v38 = vpack.c.bf16 %v1198_v24, %v1197_v11  ;;  %v1097_v40 = vadd.f32 1.0, %v6157_v32  ;;  %6178 = vpow2.f32 %v1045_v28  ;;  %v997_v42 = vsub.f32 0.0, %v6810_v39  ;;  %v915_v43 = vpop.f32.mrb[23].mxu0 }
 0x114   : > { %v6161_v47 = vpop.eup %6160  ;;  %v6826_v45 = vpack.c.bf16 %v1196_v34, %v1195_v17  ;;  %v1095_v48 = vadd.f32 1.0, %v6159_v44  ;;  %v995_v49 = vsub.f32 0.0, %v6814_v41  ;;  %v6830_v50 = vadd.f32 %v5362_v35, %v6716_v27 }
 0x115   : > { %v6163_v53 = vpop.eup %6162  ;;  %6180 = vrcp.f32 %v1097_v40  ;;  %v1098_v54 = vadd.f32 1.0, %v6161_v47  ;;  %v1055_v25 = vmul.f32 1.442695, %v997_v42  ;;  %v6839_v57 = vadd.f32 %v6716_v27, %v915_v43 }
 0x116   : > { %v6165_v29 = vpop.eup %6164  ;;  %6182 = vrcp.f32 %v1095_v48  ;;  %v1096_v33 = vadd.f32 1.0, %v6163_v53  ;;  %v1051_v60 = vmul.f32 1.442695, %v995_v49  ;;  %v998_v61 = vsub.f32 0.0, %v6830_v50  ;;  %5381 = vmatprep.mubr.msk.bf16.mxu0 %vm739_vm1, %v6826_v45 }
 0x117   : > { %v6167_v62 = vpop.eup %6166  ;;  %v1201_v0 = vmul.f32 %v6165_v29, %v6743_v56  ;;  %6184 = vrcp.f32 %v1098_v54  ;;  %v996_v1 = vsub.f32 0.0, %v6839_v57  ;;  %v6848_v4 = vsel %vm6834_vm4, 0, %v1280_v36  ;;  %5382 = vmatmul.mubr.msk.bf16.gmra.mrb[40].mxu0 %vm739_vm1, %v6821_v38 }
 0x118   : > { %v6169_v5 = vpop.eup %6168  ;;  %v1199_v6 = vmul.f32 %v6167_v62, %v6746_v59  ;;  %6186 = vrcp.f32 %v1096_v33  ;;  %v1057_v7 = vmul.f32 1.442695, %v998_v61  ;;  %v1434_v8 = vrot.slane %v1278_v14, 1  ;;  %5479 = vmatprep.mubr.msk.bf16.mxu1 %vm739_vm1, %v6848_v4  ;;  %v5365_v56 = vpop.f32.mrb[24].mxu0 }
 0x119   : > { %v6171_v10 = vpop.eup %6170  ;;  %v1202_v11 = vmul.f32 %v6169_v5, %v6750_v63  ;;  %6188 = vpow2.f32 %v1055_v25  ;;  %v1053_v13 = vmul.f32 1.442695, %v996_v1  ;;  %v6857_v15 = vadd.f32 %v5365_v56, %v6716_v27  ;;  %v928_v17 = vpop.f32.mrb[25].mxu0 }
 0x11a   : > { %v6173_v18 = vpop.eup %6172  ;;  %v1200_v19 = vmul.f32 %v6171_v10, %v6754_v3  ;;  %6190 = vpow2.f32 %v1051_v60  ;;  %v6862_v59 = vor.u32 %v1434_v8, %v1275_v9  ;;  %v6865_v14 = vadd.f32 %v6716_v27, %v928_v17  ;;  %v5366_v20 = vpop.f32.mrb[26].mxu0 }
 0x11b   : > { %v6175_v23 = vpop.eup %6174  ;;  %v6867_v63 = vpack.c.bf16 %v1202_v11, %v1201_v0  ;;  %v1101_v24 = vadd.f32 1.0, %v6173_v18  ;;  %6192 = vpow2.f32 %v1057_v7  ;;  %v1001_v28 = vsub.f32 0.0, %v6857_v15  ;;  %v931_v30 = vpop.f32.mrb[27].mxu0 }
 0x11c   : > { %v6177_v32 = vpop.eup %6176  ;;  %v6870_v34 = vpack.c.bf16 %v1200_v19, %v1199_v6  ;;  %v1099_v3 = vadd.f32 1.0, %v6175_v23  ;;  %6194 = vpow2.f32 %v1053_v13  ;;  %v999_v9 = vsub.f32 0.0, %v6865_v14 }
 0x11d   : > { %v6179_v35 = vpop.eup %6178  ;;  %6196 = vrcp.f32 %v1101_v24  ;;  %v1102_v36 = vadd.f32 1.0, %v6177_v32  ;;  %v1063_v44 = vmul.f32 1.442695, %v1001_v28  ;;  %v6874_v40 = vadd.f32 %v5366_v20, %v6716_v27 }
 0x11e   : > { %6198 = vrcp.f32 %v1099_v3  ;;  %v1100_v42 = vadd.f32 1.0, %v6179_v35  ;;  %v1059_v43 = vmul.f32 1.442695, %v999_v9  ;;  %v6877_v47 = vadd.f32 %v6716_v27, %v931_v30  ;;  %5385 = vmatprep.mubr.msk.bf16.mxu0 %vm739_vm1, %v6870_v34 }
 0x11f   : > { %v6181_v48 = vpop.eup %6180  ;;  %6200 = vrcp.f32 %v1102_v36  ;;  %v1002_v49 = vsub.f32 0.0, %v6874_v40  ;;  %v1282_v53 = vshrl.u32 %v6826_v45, 16  ;;  %v1285_v54 = vshll.u32 %v6826_v45, 16  ;;  %5386 = vmatmul.mubr.msk.bf16.gmra.mrb[44].mxu0 %vm739_vm1, %v6867_v63 }
 0x120   : > { %v6183_v25 = vpop.eup %6182  ;;  %v1205_v29 = vmul.f32 %v6181_v48, %v6759_v12  ;;  %6202 = vrcp.f32 %v1100_v42  ;;  %v1000_v33 = vsub.f32 0.0, %v6877_v47  ;;  %v1289_v60 = vshrl.u32 %v6821_v38, 16  ;;  %v5369_v61 = vpop.f32.mrb[28].mxu0 }
 0x121   : > { %v6185_v62 = vpop.eup %6184  ;;  %v1203_v0 = vmul.f32 %v6183_v25, %v6762_v16  ;;  %6204 = vpow2.f32 %v1063_v44  ;;  %v1065_v1 = vmul.f32 1.442695, %v1002_v49  ;;  %v1284_v5 = vrot.slane %v1282_v53, 7  ;;  %v944_v6 = vpop.f32.mrb[29].mxu0  ;;  %v6921_v44 = vld [vmem:[%s8238_s6 + $0x14] sm:$0xf] }
 0x122   : > { %v6187_v7 = vpop.eup %6186  ;;  %v1206_v8 = vmul.f32 %v6185_v62, %v6766_v21  ;;  %6206 = vpow2.f32 %v1059_v43  ;;  %v1061_v12 = vmul.f32 1.442695, %v1000_v33  ;;  %v1291_v56 = vrot.slane %v1289_v60, 7  ;;  %v5370_v10 = vpop.f32.mrb[30].mxu0 }
 0x123   : > { %v6189_v11 = vpop.eup %6188  ;;  %v1204_v13 = vmul.f32 %v6187_v7, %v6770_v31  ;;  %6208 = vpow2.f32 %v1065_v1  ;;  %v1287_v16 = vor.u32 %v1285_v54, %v1284_v5  ;;  %v1292_v17 = vshll.u32 %v6821_v38, 16  ;;  %v947_v18 = vpop.f32.mrb[31].mxu0 }
 0x124   : > { %v6191_v19 = vpop.eup %6190  ;;  %v6899_v20 = vpack.c.bf16 %v1206_v8, %v1205_v29  ;;  %v1105_v21 = vadd.f32 1.0, %v6189_v11  ;;  %6210 = vpow2.f32 %v1061_v12  ;;  %v6902_v23 = vadd.f32 %v5369_v61, %v6716_v27 }
 0x125   : > { %v6193_v24 = vpop.eup %6192  ;;  %v6904_v28 = vpack.c.bf16 %v1204_v13, %v1203_v0  ;;  %v1103_v30 = vadd.f32 1.0, %v6191_v19  ;;  %v6908_v31 = vsel %vm6834_vm4, 0, %v1287_v16  ;;  %v1294_v32 = vor.u32 %v1292_v17, %v1291_v56 }
 0x126   : > { %v6195_v3 = vpop.eup %6194  ;;  %6212 = vrcp.f32 %v1105_v21  ;;  %v1106_v9 = vadd.f32 1.0, %v6193_v24  ;;  %5480 = vmatmul.mubr.msk.bf16.vlgmr.msra.gmra.mrb[0].mxu1 %vm739_vm1, %v6908_v31  ;;  %v1005_v35 = vsub.f32 0.0, %v6902_v23  ;;  %v6916_v36 = vadd.f32 %v6716_v27, %v944_v6 }
 0x127   : > { %v6197_v42 = vpop.eup %6196  ;;  %6214 = vrcp.f32 %v1103_v30  ;;  %v1104_v43 = vadd.f32 1.0, %v6195_v3  ;;  %5512 = vmatpush3.bf16.msra.mxu1 %v6776_v46  ;;  %v6926_v48 = vsel %vm6834_vm4, 0, %v1294_v32  ;;  %v6929_v49 = vadd.f32 %v5370_v10, %v6716_v27  ;;  %5389 = vmatprep.mubr.msk.bf16.mxu0 %vm739_vm1, %v6904_v28 }
 0x128   : > { %v6199_v25 = vpop.eup %6198  ;;  %v1209_v29 = vmul.f32 %v6197_v42, %v6781_v51  ;;  %6216 = vrcp.f32 %v1106_v9  ;;  %5483 = vmatprep.mubr.msk.bf16.mxu1 %vm739_vm1, %v6926_v48  ;;  %v1071_v33 = vmul.f32 1.442695, %v1005_v35  ;;  %v1003_v46 = vsub.f32 0.0, %v6916_v36  ;;  %5390 = vmatmul.mubr.msk.bf16.gmra.mrb[48].mxu0 %vm739_vm1, %v6899_v20  ;;  %v5373_v61 = vpop.f32.mrb[32].mxu0 }
 0x129   : > { %v6201_v62 = vpop.eup %6200  ;;  %v1207_v0 = vmul.f32 %v6199_v25, %v6784_v55  ;;  %6218 = vrcp.f32 %v1104_v43  ;;  %v1006_v1 = vsub.f32 0.0, %v6929_v49  ;;  %v6942_v5 = vadd.f32 %v6716_v27, %v947_v18  ;;  %v960_v51 = vpop.f32.mrb[33].mxu0  ;;  %6043 = vmatprep.subr.msk.bf16.mxu1 %vm794_vm0, %v6921_v44 }
 0x12a   : > { %v6203_v6 = vpop.eup %6202  ;;  %v1210_v7 = vmul.f32 %v6201_v62, %v6793_v2  ;;  %6220 = vpow2.f32 %v1071_v33  ;;  %v1067_v8 = vmul.f32 1.442695, %v1003_v46  ;;  %v1296_v12 = vshrl.u32 %v6870_v34, 16  ;;  %v5374_v56 = vpop.f32.mrb[34].mxu0 }
 0x12b   : > { %v6205_v10 = vpop.eup %6204  ;;  %v1208_v55 = vmul.f32 %v6203_v6, %v6796_v26  ;;  %v1073_v11 = vmul.f32 1.442695, %v1006_v1  ;;  %v1004_v13 = vsub.f32 0.0, %v6942_v5  ;;  %v1299_v16 = vshll.u32 %v6870_v34, 16  ;;  %v963_v18 = vpop.f32.mrb[35].mxu0 }
 0x12c   : > { %v6207_v19 = vpop.eup %6206  ;;  %v6951_v21 = vpack.c.bf16 %v1210_v7, %v1209_v29  ;;  %v1109_v24 = vadd.f32 1.0, %v6205_v10  ;;  %6222 = vpow2.f32 %v1067_v8  ;;  %v1298_v2 = vrot.slane %v1296_v12, 7 }
 0x12d   : > { %v6209_v30 = vpop.eup %6208  ;;  %v6955_v32 = vpack.c.bf16 %v1208_v55, %v1207_v0  ;;  %v1107_v3 = vadd.f32 1.0, %v6207_v19  ;;  %6224 = vpow2.f32 %v1073_v11  ;;  %v1069_v26 = vmul.f32 1.442695, %v1004_v13 }
 0x12e   : > { %v6211_v9 = vpop.eup %6210  ;;  %6226 = vrcp.f32 %v1109_v24  ;;  %v1110_v35 = vadd.f32 1.0, %v6209_v30  ;;  %v1301_v42 = vor.u32 %v1299_v16, %v1298_v2  ;;  %v1303_v43 = vshrl.u32 %v6867_v63, 16 }
 0x12f   : > { %6228 = vrcp.f32 %v1107_v3  ;;  %v1108_v25 = vadd.f32 1.0, %v6211_v9  ;;  %v1306_v29 = vshll.u32 %v6867_v63, 16  ;;  %v6962_v33 = vadd.f32 %v6716_v27, %v960_v51  ;;  %5393 = vmatprep.mubr.msk.bf16.mxu0 %vm739_vm1, %v6955_v32 }
 0x130   : > { %v6213_v46 = vpop.eup %6212  ;;  %6230 = vrcp.f32 %v1110_v35  ;;  %v6968_v61 = vsel %vm6834_vm4, 0, %v1301_v42  ;;  %v1305_v62 = vrot.slane %v1303_v43, 7  ;;  %v6973_v0 = vadd.f32 %v6716_v27, %v963_v18  ;;  %5394 = vmatmul.mubr.msk.bf16.gmra.mrb[52].mxu0 %vm739_vm1, %v6951_v21 }
 0x131   : > { %v6215_v1 = vpop.eup %6214  ;;  %v1213_v51 = vmul.f32 %v6213_v46, %v6810_v39  ;;  %6232 = vrcp.f32 %v1108_v25  ;;  %5484 = vmatmul.mubr.msk.bf16.gmra.mrb[4].mxu1 %vm739_vm1, %v6968_v61  ;;  %v1007_v6 = vsub.f32 0.0, %v6962_v33  ;;  %v1310_v7 = vshrl.u32 %v6904_v28, 16 }
 0x132   : > { %v6217_v8 = vpop.eup %6216  ;;  %v1211_v56 = vmul.f32 %v6215_v1, %v6814_v41  ;;  %6234 = vpow2.f32 %v1069_v26  ;;  %v1308_v27 = vor.u32 %v1306_v29, %v1305_v62  ;;  %v1008_v10 = vsub.f32 0.0, %v6973_v0 }
 0x133   : > { %v6219_v55 = vpop.eup %6218  ;;  %v1214_v39 = vmul.f32 %v6217_v8, %v6830_v50  ;;  %v1075_v11 = vmul.f32 1.442695, %v1007_v6  ;;  %v1312_v13 = vrot.slane %v1310_v7, 7  ;;  %v1313_v18 = vshll.u32 %v6904_v28, 16 }
 0x134   : > { %v6221_v19 = vpop.eup %6220  ;;  %v1212_v24 = vmul.f32 %v6219_v55, %v6839_v57  ;;  %v6993_v41 = vsel %vm6834_vm4, 0, %v1308_v27  ;;  %v1077_v2 = vmul.f32 1.442695, %v1008_v10  ;;  %v1317_v30 = vshrl.u32 %v6899_v20, 16 }
 0x135   : > { %v6996_v3 = vpack.c.bf16 %v1214_v39, %v1213_v51  ;;  %v1113_v26 = vadd.f32 1.0, %v6221_v19  ;;  %5487 = vmatprep.mubr.msk.bf16.mxu1 %vm739_vm1, %v6993_v41  ;;  %6236 = vpow2.f32 %v1075_v11  ;;  %v1315_v50 = vor.u32 %v1313_v18, %v1312_v13 }
 0x136   : > { %v6223_v9 = vpop.eup %6222  ;;  %v7002_v35 = vpack.c.bf16 %v1212_v24, %v1211_v56  ;;  %6238 = vpow2.f32 %v1077_v2  ;;  %v1319_v57 = vrot.slane %v1317_v30, 7  ;;  %v1320_v42 = vshll.u32 %v6899_v20, 16 }
 0x137   : > { %v6225_v25 = vpop.eup %6224  ;;  %6240 = vrcp.f32 %v1113_v26  ;;  %v7009_v46 = vsel %vm6834_vm4, 0, %v1315_v50  ;;  %v1324_v62 = vshrl.u32 %v6955_v32, 16  ;;  %v1111_v51 = vadd.f32 1.0, %v6223_v9 }
 0x138   : > { %v6227_v1 = vpop.eup %6226  ;;  %v1114_v6 = vadd.f32 1.0, %v6225_v25  ;;  %v1322_v8 = vor.u32 %v1320_v42, %v1319_v57  ;;  %5397 = vmatprep.mubr.msk.bf16.mxu0 %vm739_vm1, %v7002_v35  ;;  %v8244_v56 = vshrl.u32 %v6951_v21, 16  ;;  %v1327_v55 = vshll.u32 %v6955_v32, 16 }
 0x139   : > { %v6229_v27 = vpop.eup %6228  ;;  %5488 = vmatmul.mubr.msk.bf16.gmra.mrb[8].mxu1 %vm739_vm1, %v7009_v46  ;;  %v1326_v10 = vrot.slane %v1324_v62, 7  ;;  %5398 = vmatmul.mubr.msk.bf16.gmra.mrb[56].mxu0 %vm739_vm1, %v6996_v3  ;;  %v1217_v11 = vmul.f32 %v6227_v1, %v6857_v15  ;;  %v8247_v50 = vshll.u32 %v6951_v21, 16  ;;  %v8246_v15 = vshrl.u32 %v7002_v35, 16 }
 0x13a   : > { %v6231_v39 = vpop.eup %6230  ;;  %6242 = vrcp.f32 %v1114_v6  ;;  %v7027_v13 = vsel %vm6834_vm4, 0, %v1322_v8  ;;  %v1333_v19 = vrot.slane %v8244_v56, 7  ;;  %v1215_v57 = vmul.f32 %v6229_v27, %v6865_v14 }
 0x13b   : > { %v6233_v24 = vpop.eup %6232  ;;  %v1218_v2 = vmul.f32 %v6231_v39, %v6874_v40  ;;  %5491 = vmatprep.mubr.msk.bf16.mxu1 %vm739_vm1, %v7027_v13  ;;  %v1329_v26 = vor.u32 %v1327_v55, %v1326_v10  ;;  %6244 = vrcp.f32 %v1111_v51  ;;  %v8245_v1 = vshrl.u32 %v6996_v3, 16 }
 0x13c   : > { %v6235_v9 = vpop.eup %6234  ;;  %v1216_v25 = vmul.f32 %v6233_v24, %v6877_v47  ;;  %v1336_v8 = vor.u32 %v8247_v50, %v1333_v19  ;;  %v1340_v10 = vrot.slane %v8246_v15, 7  ;;  %v1341_v47 = vshll.u32 %v7002_v35, 16 }
 0x13d   : > { %v7041_v6 = vpack.c.bf16 %v1218_v2, %v1217_v11  ;;  %v1112_v40 = vadd.f32 1.0, %v6235_v9  ;;  %v7051_v56 = vsel %vm6834_vm4, 0, %v1329_v26  ;;  %v1347_v51 = vrot.slane %v8245_v1, 7 }
 0x13e   : > { %v7047_v39 = vpack.c.bf16 %v1216_v25, %v1215_v57  ;;  %v7063_v26 = vsel %vm6834_vm4, 0, %v1336_v8  ;;  %v1343_v9 = vor.u32 %v1341_v47, %v1340_v10  ;;  %v1348_v57 = vshll.u32 %v6996_v3, 16 }
 0x13f   : > { %v6237_v14 = vpop.eup %6236  ;;  %6246 = vrcp.f32 %v1112_v40  ;;  %v1359_v25 = vshrl.u32 %v7041_v6, 16  ;;  %v1436_v1 = vrot.slane %v1285_v54, 1 }
 0x140   : > { %v6239_v27 = vpop.eup %6238  ;;  %v1115_v11 = vadd.f32 1.0, %v6237_v14  ;;  %5401 = vmatprep.mubr.msk.bf16.mxu0 %vm739_vm1, %v7047_v39  ;;  %v8250_v19 = vshrl.u32 %v7047_v39, 16  ;;  %v1350_v40 = vor.u32 %v1348_v57, %v1347_v51  ;;  %v1270_v14 = vrot.slane %v8248_v22, 7 }
 0x141   : > { %v6241_v24 = vpop.eup %6240  ;;  %v1116_v2 = vadd.f32 1.0, %v6239_v27  ;;  %5492 = vmatmul.mubr.msk.bf16.gmra.mrb[12].mxu1 %vm739_vm1, %v7051_v56  ;;  %5402 = vmatmul.mubr.msk.bf16.gmra.mrb[60].mxu0 %vm739_vm1, %v7041_v6  ;;  %v1355_v10 = vshll.u32 %v7047_v39, 16  ;;  %v7083_v51 = vsel %vm6834_vm4, 0, %v1343_v9  ;;  %v7091_v54 = vor.u32 %v1436_v1, %v1282_v53 }
 0x142   : > { %6248 = vrcp.f32 %v1115_v11  ;;  %5495 = vmatprep.mubr.msk.bf16.mxu1 %vm739_vm1, %v7063_v26  ;;  %v1354_v8 = vrot.slane %v8250_v19, 7  ;;  %v1438_v11 = vrot.slane %v1292_v17, 1  ;;  %v1221_v15 = vmul.f32 %v6241_v24, %v6902_v23 }
 0x143   : > { %6250 = vrcp.f32 %v1116_v2  ;;  %v1440_v2 = vrot.slane %v1299_v16, 1  ;;  %v1361_v19 = vrot.slane %v1359_v25, 7  ;;  %v1442_v23 = vrot.slane %v1306_v29, 1 }
 0x144   : > { %v6243_v27 = vpop.eup %6242  ;;  %v7095_v17 = vor.u32 %v1438_v11, %v1289_v60  ;;  %v1444_v24 = vrot.slane %v1313_v18, 1  ;;  %v1446_v53 = vrot.slane %v1320_v42, 1  ;;  %v1357_v1 = vor.u32 %v1355_v10, %v1354_v8 }
 0x145   : > { %v1222_v50 = vmul.f32 %v6243_v27, %v6929_v49  ;;  %v6245_v22 = vpop.eup %6244  ;;  %v7103_v16 = vor.u32 %v1440_v2, %v1296_v12  ;;  %v7111_v60 = vor.u32 %v1442_v23, %v1303_v43  ;;  %v1448_v29 = vrot.slane %v1327_v55, 1 }
 0x146   : > { %v7119_v12 = vsel %vm6834_vm4, 0, %v1350_v40  ;;  %v1362_v18 = vshll.u32 %v7041_v6, 16  ;;  %v7124_v42 = vor.u32 %v1444_v24, %v1310_v7  ;;  %v1219_v43 = vmul.f32 %v6245_v22, %v6916_v36 }
 0x147   : > { %v7099_v49 = vpack.c.bf16 %v1222_v50, %v1221_v15  ;;  %v7132_v55 = vor.u32 %v1446_v53, %v1317_v30  ;;  %v7136_v9 = vor.u32 %v1448_v29, %v1324_v62  ;;  %v7140_v7 = vsel %vm6834_vm4, 0, %v1270_v14 }
 0x148   : > { %v1364_v40 = vor.u32 %v1362_v18, %v1361_v19  ;;  %8254 = vst [vmem:[#allocation2_spill] sm:$0xff] %v7140_v7  ;;  %v8255_v22 = vshll.u32 %v6951_v21, 16  ;;  %v7148_v30 = vsel %vm6834_vm4, 0, %v1357_v1  ;;  %v1454_v62 = vrot.slane %v1348_v57, 1 }
 0x149   : > { %v6247_v50 = vpop.eup %6246  ;;  %5496 = vmatmul.mubr.msk.bf16.gmra.mrb[16].mxu1 %vm739_vm1, %v7083_v51  ;;  %v1373_v11 = vshrl.u32 %v7099_v49, 16  ;;  %v1376_v14 = vshll.u32 %v7099_v49, 16  ;;  %v8256_v23 = vshrl.u32 %v6951_v21, 16 }
 0x14a   : > { %v1220_v15 = vmul.f32 %v6247_v50, %v6942_v5  ;;  %5499 = vmatprep.mubr.msk.bf16.mxu1 %vm739_vm1, %v7119_v12  ;;  %v1450_v36 = vrot.slane %v8255_v22, 1  ;;  %v1452_v5 = vrot.slane %v1341_v47, 1  ;;  %v8257_v47 = vshrl.u32 %v7002_v35, 16 }
 0x14c   : > { %v6249_v27 = vpop.eup %6248  ;;  %v7144_v8 = vpack.c.bf16 %v1220_v15, %v1219_v43  ;;  %v7155_v24 = vor.u32 %v1450_v36, %v8256_v23  ;;  %v7159_v53 = vor.u32 %v1452_v5, %v8257_v47  ;;  %v1456_v43 = vrot.slane %v1355_v10, 1 }
 0x14d   : > { %v6251_v2 = vpop.eup %6250  ;;  %v1223_v19 = vmul.f32 %v6249_v27, %v6962_v33  ;;  %v8258_v33 = vshrl.u32 %v6996_v3, 16  ;;  %v1458_v36 = vrot.slane %v1362_v18, 1  ;;  %v1375_v5 = vrot.slane %v1373_v11, 7 }
 0x14e   : > { %v1224_v29 = vmul.f32 %v6251_v2, %v6973_v0  ;;  %5405 = vmatprep.mubr.msk.bf16.mxu0 %vm739_vm1, %v7144_v8  ;;  %v1366_v57 = vshrl.u32 %v7144_v8, 16  ;;  %v1369_v1 = vshll.u32 %v7144_v8, 16  ;;  %v7176_v0 = vsel %vm6834_vm4, 0, %v1364_v40 }
 0x14f   : > { %v7168_v50 = vor.u32 %v1454_v62, %v8258_v33  ;;  %5406 = vmatmul.mubr.msk.bf16.gmra.mrb[64].mxu0 %vm739_vm1, %v7099_v49  ;;  %v8259_v27 = vshrl.u32 %v7047_v39, 16  ;;  %v1462_v2 = vrot.slane %v1376_v14, 1  ;;  %v7192_v18 = vor.u32 %v1458_v36, %v1359_v25 }
 0x150   : > { %v7172_v15 = vpack.c.bf16 %v1224_v29, %v1223_v19  ;;  %v1368_v22 = vrot.slane %v1366_v57, 7  ;;  %5411 = vmatprep.mubr.msk.bf16.mxu0 %vm739_vm1, %v7140_v7  ;;  %v1460_v10 = vrot.slane %v1369_v1, 1  ;;  %v1490_v36 = vsel %vm7206_vm7, %v6862_v59, 0 }
 0x151   : > { %5500 = vmatmul.mubr.msk.bf16.gmra.mrb[20].mxu1 %vm739_vm1, %v7148_v30  ;;  %v7184_v62 = vor.u32 %v1456_v43, %v8259_v27  ;;  %v7196_v29 = vor.u32 %v1462_v2, %v1373_v11  ;;  %v1378_v43 = vor.u32 %v1376_v14, %v1375_v5  ;;  %v1964_v27 = vsel %vm794_vm0, %v6819_v37, 0  ;;  %v640_v2 = vld [vmem:[%s8238_s6 + $0x1c] sm:$0xf] }
 0x152   : > { %5503 = vmatprep.mubr.msk.bf16.mxu1 %vm739_vm1, %v7176_v0  ;;  %v1371_v40 = vor.u32 %v1369_v1, %v1368_v22  ;;  %v1380_v19 = vshrl.u32 %v7172_v15, 16  ;;  %v1383_v23 = vshll.u32 %v7172_v15, 16  ;;  %v7194_v47 = vor.u32 %v1460_v10, %v1366_v57 }
 0x153   : > { %v7220_v11 = vsel %vm6834_vm4, 0, %v1378_v43  ;;  %v7302_v5 = vsel %vm7206_vm7, %v7091_v54, 0  ;;  %v7313_v59 = vsel %vm7206_vm7, %v7095_v17, 0  ;;  %v7320_v54 = vsel %vm7206_vm7, %v7103_v16, 0 }
 0x154   : > { %v1464_v33 = vrot.slane %v1383_v23, 1  ;;  %v7202_v1 = vsel %vm6834_vm4, 0, %v1371_v40  ;;  %v1382_v22 = vrot.slane %v1380_v19, 7  ;;  %v7330_v17 = vsel %vm7206_vm7, %v7111_v60, 0 }
 0x155   : > { %v2759_v10 = vsel %vm794_vm0, %v639_v52, 0  ;;  %v7338_v16 = vsel %vm7206_vm7, %v7124_v42, 0  ;;  %v7353_v60 = vsel %vm7206_vm7, %v7132_v55, 0  ;;  %v7360_v42 = vsel %vm7206_vm7, %v7136_v9, 0 }
 0x156   : > { %v1465_v7 = vor.u32 %v1464_v33, %v1380_v19  ;;  %v7371_v55 = vsel %vm7206_vm7, %v7155_v24, 0  ;;  %v7378_v9 = vsel %vm7206_vm7, %v7159_v53, 0  ;;  %v7389_v24 = vsel %vm7206_vm7, %v7168_v50, 0 }
 0x157   : > { %5412 = vmatmul.mubr.msk.bf16.vlgmr.msra.gmra.mrb[36].mxu0 %vm739_vm1, %v6848_v4  ;;  %v1385_v4 = vor.u32 %v1383_v23, %v1382_v22  ;;  %v7396_v53 = vsel %vm7206_vm7, %v7184_v62, 0  ;;  %v7407_v50 = vsel %vm7206_vm7, %v7192_v18, 0  ;;  %v7414_v62 = vsel %vm7206_vm7, %v7194_v47, 0  ;;  %v641_v23 = vld [vmem:[%s8238_s6 + $0x20] sm:$0xf] }
 0x158   : > { %5415 = vmatprep.mubr.msk.bf16.mxu0 %vm739_vm1, %v6908_v31  ;;  %5444 = vmatpush3.bf16.msra.mxu0 %v1964_v27  ;;  %v7214_v37 = vsel %vm7206_vm7, %v1465_v7, 0  ;;  %v2560_v7 = vsel %vm794_vm0, %v6921_v44, 0  ;;  %v7425_v40 = vsel %vm7206_vm7, %v7196_v29, 0  ;;  %v2957_v19 = vsel %vm794_vm0, %v640_v2, 0 }
 0x159   : > { %5504 = vmatmul.mubr.msk.bf16.gmra.mrb[24].mxu1 %vm739_vm1, %v7202_v1  ;;  %v7226_v14 = vsel %vm6834_vm4, 0, %v1385_v4 }
 0x15a   : > { %5507 = vmatprep.mubr.msk.bf16.mxu1 %vm739_vm1, %v7220_v11 }
 0x15f   : > { %5416 = vmatmul.mubr.msk.bf16.gmra.mrb[40].mxu0 %vm739_vm1, %v6926_v48 }
 0x160   : > { %5419 = vmatprep.mubr.msk.bf16.mxu0 %vm739_vm1, %v6968_v61 }
 0x161   : > { %5508 = vmatmul.mubr.msk.bf16.gmra.mrb[28].mxu1 %vm739_vm1, %v7226_v14 }
 0x162   : > { %5513 = vmatprep.mubr.msk.bf16.mxu1 %vm739_vm1, %v6788_v58  ;;  %v8262_v58 = vmov 0  }
 0x163   : > { %v1432_v44 = vrot.slane %v8262_v58, 1 }
 0x165   : > { %v7285_v57 = vsel %vm7206_vm7, %v1432_v44, 0 }
 0x167   : > { %5420 = vmatmul.mubr.msk.bf16.gmra.mrb[44].mxu0 %vm739_vm1, %v6993_v41 }
 0x168   : > { %5423 = vmatprep.mubr.msk.bf16.mxu0 %vm739_vm1, %v7009_v46 }
 0x169   : > { %5514 = vmatmul.mubr.msk.bf16.vlgmr.msra.gmra.mrb[0].mxu1 %vm739_vm1, %v6826_v45 }
 0x16a   : > { %5546 = vmatpush3.bf16.msra.mxu1 %v2560_v7  ;;  %5517 = vmatprep.mubr.msk.bf16.mxu1 %vm739_vm1, %v6821_v38 }
 0x16b   : > { %6044 = vmatprep.subr.msk.bf16.mxu1 %vm794_vm0, %v639_v52 }
 0x16f   : > { %5424 = vmatmul.mubr.msk.bf16.gmra.mrb[48].mxu0 %vm739_vm1, %v7027_v13 }
 0x170   : > { %5427 = vmatprep.mubr.msk.bf16.mxu0 %vm739_vm1, %v7051_v56 }
 0x171   : > { %5518 = vmatmul.mubr.msk.bf16.gmra.mrb[4].mxu1 %vm739_vm1, %v6870_v34 }
 0x172   : > { %5521 = vmatprep.mubr.msk.bf16.mxu1 %vm739_vm1, %v6867_v63 }
 0x177   : > { %5428 = vmatmul.mubr.msk.bf16.gmra.mrb[52].mxu0 %vm739_vm1, %v7063_v26 }
 0x178   : > { %5431 = vmatprep.mubr.msk.bf16.mxu0 %vm739_vm1, %v7083_v51 }
 0x179   : > { %5522 = vmatmul.mubr.msk.bf16.gmra.mrb[8].mxu1 %vm739_vm1, %v6904_v28 }
 0x17a   : > { %5525 = vmatprep.mubr.msk.bf16.mxu1 %vm739_vm1, %v6899_v20 }
 0x17f   : > { %5432 = vmatmul.mubr.msk.bf16.gmra.mrb[56].mxu0 %vm739_vm1, %v7119_v12 }
 0x180   : > { %5435 = vmatprep.mubr.msk.bf16.mxu0 %vm739_vm1, %v7148_v30 }
 0x181   : > { %5526 = vmatmul.mubr.msk.bf16.gmra.mrb[12].mxu1 %vm739_vm1, %v6955_v32 }
 0x182   : > { %5529 = vmatprep.mubr.msk.bf16.mxu1 %vm739_vm1, %v6951_v21 }
 0x187   : > { %5436 = vmatmul.mubr.msk.bf16.gmra.mrb[60].mxu0 %vm739_vm1, %v7176_v0 }
 0x188   : > { %5439 = vmatprep.mubr.msk.bf16.mxu0 %vm739_vm1, %v7202_v1 }
 0x189   : > { %5530 = vmatmul.mubr.msk.bf16.gmra.mrb[16].mxu1 %vm739_vm1, %v7002_v35 }
 0x18a   : > { %5533 = vmatprep.mubr.msk.bf16.mxu1 %vm739_vm1, %v6996_v3 }
 0x18f   : > { %5440 = vmatmul.mubr.msk.bf16.gmra.mrb[64].mxu0 %vm739_vm1, %v7220_v11 }
 0x190   : > { %5445 = vmatprep.mubr.msk.bf16.mxu0 %vm739_vm1, %v7285_v57 }
 0x191   : > { %5534 = vmatmul.mubr.msk.bf16.gmra.mrb[20].mxu1 %vm739_vm1, %v7047_v39 }
 0x192   : > { %5537 = vmatprep.mubr.msk.bf16.mxu1 %vm739_vm1, %v7041_v6 }
 0x197   : > { %5446 = vmatmul.mubr.msk.bf16.vlgmr.msra.gmra.mrb[36].mxu0 %vm739_vm1, %v1490_v36 }
 0x198   : > { %5449 = vmatprep.mubr.msk.bf16.mxu0 %vm739_vm1, %v7302_v5 }
 0x199   : > { %5538 = vmatmul.mubr.msk.bf16.gmra.mrb[24].mxu1 %vm739_vm1, %v7144_v8 }
 0x19a   : > { %5541 = vmatprep.mubr.msk.bf16.mxu1 %vm739_vm1, %v7099_v49 }
 0x19f   : > { %5450 = vmatmul.mubr.msk.bf16.gmra.mrb[40].mxu0 %vm739_vm1, %v7313_v59 }
 0x1a0   : > { %5453 = vmatprep.mubr.msk.bf16.mxu0 %vm739_vm1, %v7320_v54 }
 0x1a1   : > { %5542 = vmatmul.mubr.msk.bf16.gmra.mrb[28].mxu1 %vm739_vm1, %v7172_v15 }
 0x1a2   : > { %5547 = vmatprep.mubr.msk.bf16.mxu1 %vm739_vm1, %v1490_v36  ;;  %v6098_v36 = vld [vmem:[%s6658_s17 + $0x30] sm:$0xff]  }
 0x1a7   : > { %5454 = vmatmul.mubr.msk.bf16.gmra.mrb[44].mxu0 %vm739_vm1, %v7330_v17 }
 0x1a8   : > { %5457 = vmatprep.mubr.msk.bf16.mxu0 %vm739_vm1, %v7338_v16 }
 0x1a9   : > { %5548 = vmatmul.mubr.msk.bf16.vlgmr.msra.gmra.mrb[0].mxu1 %vm739_vm1, %v7302_v5 }
 0x1aa   : > { %5580 = vmatpush3.bf16.msra.mxu1 %v2759_v10  ;;  %5551 = vmatprep.mubr.msk.bf16.mxu1 %vm739_vm1, %v7313_v59  ;;  %v6104_v10 = vld [vmem:[%s6658_s17 + $0x60] sm:$0xff]  }
 0x1ab   : > { %6045 = vmatprep.subr.msk.bf16.mxu1 %vm794_vm0, %v640_v2  ;;  %v6106_v2 = vld [vmem:[%s6658_s17 + $0x70] sm:$0xff]  }
 0x1af   : > { %5458 = vmatmul.mubr.msk.bf16.gmra.mrb[48].mxu0 %vm739_vm1, %v7353_v60 }
 0x1b0   : > { %5461 = vmatprep.mubr.msk.bf16.mxu0 %vm739_vm1, %v7360_v42 }
 0x1b1   : > { %5552 = vmatmul.mubr.msk.bf16.gmra.mrb[4].mxu1 %vm739_vm1, %v7320_v54 }
 0x1b2   : > { %5555 = vmatprep.mubr.msk.bf16.mxu1 %vm739_vm1, %v7330_v17 }
 0x1b7   : > { %5462 = vmatmul.mubr.msk.bf16.gmra.mrb[52].mxu0 %vm739_vm1, %v7371_v55 }
 0x1b8   : > { %5465 = vmatprep.mubr.msk.bf16.mxu0 %vm739_vm1, %v7378_v9 }
 0x1b9   : > { %5556 = vmatmul.mubr.msk.bf16.gmra.mrb[8].mxu1 %vm739_vm1, %v7338_v16 }
 0x1ba   : > { %5559 = vmatprep.mubr.msk.bf16.mxu1 %vm739_vm1, %v7353_v60 }
 0x1bf   : > { %5466 = vmatmul.mubr.msk.bf16.gmra.mrb[56].mxu0 %vm739_vm1, %v7389_v24 }
 0x1c0   : > { %5469 = vmatprep.mubr.msk.bf16.mxu0 %vm739_vm1, %v7396_v53 }
 0x1c1   : > { %5560 = vmatmul.mubr.msk.bf16.gmra.mrb[12].mxu1 %vm739_vm1, %v7360_v42 }
 0x1c2   : > { %5563 = vmatprep.mubr.msk.bf16.mxu1 %vm739_vm1, %v7371_v55 }
 0x1c7   : > { %5470 = vmatmul.mubr.msk.bf16.gmra.mrb[60].mxu0 %vm739_vm1, %v7407_v50 }
 0x1c8   : > { %5473 = vmatprep.mubr.msk.bf16.mxu0 %vm739_vm1, %v7414_v62 }
 0x1c9   : > { %5564 = vmatmul.mubr.msk.bf16.gmra.mrb[16].mxu1 %vm739_vm1, %v7378_v9 }
 0x1ca   : > { %5567 = vmatprep.mubr.msk.bf16.mxu1 %vm739_vm1, %v7389_v24 }
 0x1cf   : > { %5474 = vmatmul.mubr.msk.bf16.gmra.mrb[64].mxu0 %vm739_vm1, %v7425_v40 }
 0x1d1   : > { %5568 = vmatmul.mubr.msk.bf16.gmra.mrb[20].mxu1 %vm739_vm1, %v7396_v53 }
 0x1d2   : > { %5571 = vmatprep.mubr.msk.bf16.mxu1 %vm739_vm1, %v7407_v50 }
 0x1d9   : > { %5572 = vmatmul.mubr.msk.bf16.gmra.mrb[24].mxu1 %vm739_vm1, %v7414_v62 }
 0x1da   : > { %5575 = vmatprep.mubr.msk.bf16.mxu1 %vm739_vm1, %v7425_v40 }
 0x1e1   : > { %5576 = vmatmul.mubr.msk.bf16.gmra.mrb[28].mxu1 %vm739_vm1, %v7214_v37 }
 0x1e2   : > { %5581 = vmatprep.mubr.msk.bf16.mxu1 %vm739_vm1, %v6908_v31  ;;  %v8263_v31 = vld [vmem:[#allocation2_spill] sm:$0xff] }
 0x1e9   : > { %5582 = vmatmul.mubr.msk.bf16.vlgmr.msra.gmra.mrb[0].mxu1 %vm739_vm1, %v6926_v48  ;;  %v3726_v48 = vld [vmem:[%s8241_s9] sm:$0xf] }
 0x1ea   : > { %5614 = vmatpush3.bf16.msra.mxu1 %v2957_v19  ;;  %5585 = vmatprep.mubr.msk.bf16.mxu1 %vm739_vm1, %v6968_v61  ;;  %v6092_v61 = vld [vmem:[%s6658_s17] sm:$0xff]  }
 0x1eb   : > { %6046 = vmatprep.subr.msk.bf16.mxu1 %vm794_vm0, %v641_v23  ;;  %6047 = vmatprep.subr.msk.bf16.mxu0 %vm794_vm0, %v3726_v48 }
 0x1ec   : > { %5683 = vmatprep.mubr.msk.bf16.mxu0 %vm739_vm1, %v6092_v61 }
 0x1f1   : > { %5586 = vmatmul.mubr.msk.bf16.gmra.mrb[4].mxu1 %vm739_vm1, %v6993_v41  ;;  %v3725_v41 = vld [vmem:[%s8240_s8] sm:$0xf] }
 0x1f2   : > { %5589 = vmatprep.mubr.msk.bf16.mxu1 %vm739_vm1, %v7009_v46  ;;  %v3856_v46 = vsel %vm794_vm0, %v3726_v48, 0 }
 0x1f3   : > { %5682 = vmatpush3.bf16.msra.mxu0 %v3856_v46 }
 0x1f4   : > { %6048 = vmatprep.subr.msk.bf16.mxu0 %vm794_vm0, %v3725_v41 }
 0x1f9   : > { %5590 = vmatmul.mubr.msk.bf16.gmra.mrb[8].mxu1 %vm739_vm1, %v7027_v13  ;;  %v6094_v13 = vld [vmem:[%s6658_s17 + $0x10] sm:$0xff]  }
 0x1fa   : > { %5593 = vmatprep.mubr.msk.bf16.mxu1 %vm739_vm1, %v7051_v56  ;;  %v3156_v56 = vsel %vm794_vm0, %v641_v23, 0 }
 0x201   : > { %5594 = vmatmul.mubr.msk.bf16.gmra.mrb[12].mxu1 %vm739_vm1, %v7063_v26  ;;  %v4068_v26 = vsel %vm794_vm0, %v3725_v41, 0 }
 0x202   : > { %5597 = vmatprep.mubr.msk.bf16.mxu1 %vm739_vm1, %v7083_v51  ;;  %v6095_v51 = vld [vmem:[%s6658_s17 + $0x18] sm:$0xff]  }
 0x209   : > { %5598 = vmatmul.mubr.msk.bf16.gmra.mrb[16].mxu1 %vm739_vm1, %v7119_v12  ;;  %v6096_v12 = vld [vmem:[%s6658_s17 + $0x20] sm:$0xff]  }
 0x20a   : > { %5601 = vmatprep.mubr.msk.bf16.mxu1 %vm739_vm1, %v7148_v30 }
 0x211   : > { %5602 = vmatmul.mubr.msk.bf16.gmra.mrb[20].mxu1 %vm739_vm1, %v7176_v0 }
 0x212   : > { %5605 = vmatprep.mubr.msk.bf16.mxu1 %vm739_vm1, %v7202_v1 }
 0x219   : > { %5606 = vmatmul.mubr.msk.bf16.gmra.mrb[24].mxu1 %vm739_vm1, %v7220_v11 }
 0x21a   : > { %5609 = vmatprep.mubr.msk.bf16.mxu1 %vm739_vm1, %v7226_v14 }
 0x221   : > { %5610 = vmatmul.mubr.msk.bf16.gmra.mrb[28].mxu1 %vm739_vm1, %v8263_v31 }
 0x222   : > { %5615 = vmatprep.mubr.msk.bf16.mxu1 %vm739_vm1, %v6826_v45  ;;  %v6093_v45 = vld [vmem:[%s6658_s17 + $0x8] sm:$0xff]  }
 0x223   : > { %5684 = vmatmul.mubr.msk.bf16.vlgmr.msra.gmra.mrb[68].mxu0 %vm739_vm1, %v6093_v45 }
 0x224   : > { %5716 = vmatpush3.bf16.msra.mxu0 %v4068_v26  ;;  %5687 = vmatprep.mubr.msk.bf16.mxu0 %vm739_vm1, %v6094_v13 }
 0x229   : > { %5616 = vmatmul.mubr.msk.bf16.vlgmr.msra.gmra.mrb[0].mxu1 %vm739_vm1, %v6821_v38  ;;  %v6097_v38 = vld [vmem:[%s6658_s17 + $0x28] sm:$0xff]  }
 0x22a   : > { %5648 = vmatpush3.bf16.msra.mxu1 %v3156_v56  ;;  %5619 = vmatprep.mubr.msk.bf16.mxu1 %vm739_vm1, %v6870_v34 }
 0x22b   : > { %5688 = vmatmul.mubr.msk.bf16.gmra.mrb[72].mxu0 %vm739_vm1, %v6095_v51 }
 0x22c   : > { %5691 = vmatprep.mubr.msk.bf16.mxu0 %vm739_vm1, %v6096_v12 }
 0x231   : > { %5620 = vmatmul.mubr.msk.bf16.gmra.mrb[4].mxu1 %vm739_vm1, %v6867_v63 }
 0x232   : > { %5623 = vmatprep.mubr.msk.bf16.mxu1 %vm739_vm1, %v6904_v28 }
 0x233   : > { %5692 = vmatmul.mubr.msk.bf16.gmra.mrb[76].mxu0 %vm739_vm1, %v6097_v38 }
 0x234   : > { %5695 = vmatprep.mubr.msk.bf16.mxu0 %vm739_vm1, %v6098_v36 }
 0x239   : > { %5624 = vmatmul.mubr.msk.bf16.gmra.mrb[8].mxu1 %vm739_vm1, %v6899_v20 }
 0x23a   : > { %5627 = vmatprep.mubr.msk.bf16.mxu1 %vm739_vm1, %v6955_v32 }
 0x241   : > { %5628 = vmatmul.mubr.msk.bf16.gmra.mrb[12].mxu1 %vm739_vm1, %v6951_v21 }
 0x242   : > { %5631 = vmatprep.mubr.msk.bf16.mxu1 %vm739_vm1, %v7002_v35 }
 0x249   : > { %5632 = vmatmul.mubr.msk.bf16.gmra.mrb[16].mxu1 %vm739_vm1, %v6996_v3 }
 0x24a   : > { %5635 = vmatprep.mubr.msk.bf16.mxu1 %vm739_vm1, %v7047_v39 }
 0x251   : > { %5636 = vmatmul.mubr.msk.bf16.gmra.mrb[20].mxu1 %vm739_vm1, %v7041_v6 }
 0x252   : > { %5639 = vmatprep.mubr.msk.bf16.mxu1 %vm739_vm1, %v7144_v8 }
 0x259   : > { %5640 = vmatmul.mubr.msk.bf16.gmra.mrb[24].mxu1 %vm739_vm1, %v7099_v49 }
 0x25a   : > { %5643 = vmatprep.mubr.msk.bf16.mxu1 %vm739_vm1, %v7172_v15 }
 0x261   : > { %5644 = vmatmul.mubr.bf16.gmra.mrb[28].mxu1 %v8262_v58 }
 0x262   : > { %5649 = vmatprep.mubr.msk.bf16.mxu1 %vm739_vm1, %v7302_v5  ;;  %v6099_v5 = vld [vmem:[%s6658_s17 + $0x38] sm:$0xff]  }
 0x263   : > { %5696 = vmatmul.mubr.msk.bf16.gmra.mrb[80].mxu0 %vm739_vm1, %v6099_v5 }
 0x269   : > { %5650 = vmatmul.mubr.msk.bf16.vlgmr.msra.gmra.mrb[0].mxu1 %vm739_vm1, %v7313_v59  ;;  %v6100_v59 = vld [vmem:[%s6658_s17 + $0x40] sm:$0xff]  }
 0x26a   : > { %5653 = vmatprep.mubr.msk.bf16.mxu1 %vm739_vm1, %v7320_v54  ;;  %v7536_v63 = vpop.f32.mrb[36].mxu0  ;;  %5699 = vmatprep.mubr.msk.bf16.mxu0 %vm739_vm1, %v6100_v59  ;;  %v6102_v54 = vld [vmem:[%s6658_s17 + $0x50] sm:$0xff]  }
 0x26b   : > { %v7538_v34 = vpop.f32.mrb[37].mxu0 }
 0x26c   : > { %v7540_v20 = vpop.f32.mrb[38].mxu0 }
 0x26d   : > { %v7542_v28 = vpop.f32.mrb[39].mxu0 }
 0x271   : > { %5654 = vmatmul.mubr.msk.bf16.gmra.mrb[4].mxu1 %vm739_vm1, %v7330_v17  ;;  %v6103_v17 = vld [vmem:[%s6658_s17 + $0x58] sm:$0xff]  }
 0x272   : > { %5657 = vmatprep.mubr.msk.bf16.mxu1 %vm739_vm1, %v7338_v16  ;;  %v7548_v21 = vpop.f32.mrb[40].mxu0  ;;  %v6105_v16 = vld [vmem:[%s6658_s17 + $0x68] sm:$0xff]  }
 0x273   : > { %v7550_v32 = vpop.f32.mrb[41].mxu0 }
 0x274   : > { %v7552_v3 = vpop.f32.mrb[42].mxu0 }
 0x275   : > { %v7554_v35 = vpop.f32.mrb[43].mxu0 }
 0x279   : > { %5658 = vmatmul.mubr.msk.bf16.gmra.mrb[8].mxu1 %vm739_vm1, %v7353_v60  ;;  %v6107_v60 = vld [vmem:[%s6658_s17 + $0x78] sm:$0xff]  }
 0x27a   : > { %5661 = vmatprep.mubr.msk.bf16.mxu1 %vm739_vm1, %v7360_v42  ;;  %v7560_v6 = vpop.f32.mrb[44].mxu0  ;;  %v7649_v42 = vld [vmem:[%s8239_s7] ss:$0 sm:$0xff] }
 0x27b   : > { %v7562_v39 = vpop.f32.mrb[45].mxu0 }
 0x27c   : > { %v7564_v49 = vpop.f32.mrb[46].mxu0 }
 0x27d   : > { %v7566_v8 = vpop.f32.mrb[47].mxu0 }
 0x281   : > { %5662 = vmatmul.mubr.msk.bf16.gmra.mrb[12].mxu1 %vm739_vm1, %v7371_v55 }
 0x282   : > { %5665 = vmatprep.mubr.msk.bf16.mxu1 %vm739_vm1, %v7378_v9  ;;  %v7572_v30 = vpop.f32.mrb[48].mxu0 }
 0x283   : > { %v7574_v15 = vpop.f32.mrb[49].mxu0 }
 0x284   : > { %v7576_v0 = vpop.f32.mrb[50].mxu0 }
 0x285   : > { %v7578_v18 = vpop.f32.mrb[51].mxu0 }
 0x289   : > { %5666 = vmatmul.mubr.msk.bf16.gmra.mrb[16].mxu1 %vm739_vm1, %v7389_v24 }
 0x28a   : > { %5669 = vmatprep.mubr.msk.bf16.mxu1 %vm739_vm1, %v7396_v53  ;;  %v7584_v47 = vpop.f32.mrb[52].mxu0 }
 0x28b   : > { %v7586_v29 = vpop.f32.mrb[53].mxu0 }
 0x28c   : > { %v7588_v33 = vpop.f32.mrb[54].mxu0 }
 0x28d   : > { %v7590_v43 = vpop.f32.mrb[55].mxu0 }
 0x291   : > { %5670 = vmatmul.mubr.msk.bf16.gmra.mrb[20].mxu1 %vm739_vm1, %v7407_v50 }
 0x292   : > { %5673 = vmatprep.mubr.msk.bf16.mxu1 %vm739_vm1, %v7414_v62  ;;  %v7596_v27 = vpop.f32.mrb[56].mxu0 }
 0x293   : > { %v7598_v1 = vpop.f32.mrb[57].mxu0 }
 0x294   : > { %v7600_v22 = vpop.f32.mrb[58].mxu0 }
 0x295   : > { %v7602_v25 = vpop.f32.mrb[59].mxu0 }
 0x299   : > { %5674 = vmatmul.mubr.msk.bf16.gmra.mrb[24].mxu1 %vm739_vm1, %v7425_v40 }
 0x29a   : > { %5677 = vmatprep.mubr.msk.bf16.mxu1 %vm739_vm1, %v7214_v37  ;;  %v7608_v11 = vpop.f32.mrb[60].mxu0 }
 0x29b   : > { %v7610_v4 = vpop.f32.mrb[61].mxu0 }
 0x29c   : > { %v7612_v14 = vpop.f32.mrb[62].mxu0 }
 0x29d   : > { %v7614_v7 = vpop.f32.mrb[63].mxu0 }
 0x2a1   : > { %5678 = vmatmul.mubr.msk.bf16.gmra.mrb[28].mxu1 %vm739_vm1, %v7285_v57  ;;  %v6101_v57 = vld [vmem:[%s6658_s17 + $0x48] sm:$0xff]  }
 0x2a2   : > { %v7618_v52 = vpop.f32.mrb[64].mxu0  ;;  %5700 = vmatmul.mubr.msk.bf16.gmra.mrb[84].mxu0 %vm739_vm1, %v6101_v57 }
 0x2a3   : > { %v7620_v58 = vpop.f32.mrb[65].mxu0  ;;  %5703 = vmatprep.mubr.msk.bf16.mxu0 %vm739_vm1, %v6102_v54  ;;  %v7682_v54 = vld [vmem:[%s6638_s26 + $0x8] sm:$0xff]  }
 0x2a4   : > { %v7622_v37 = vpop.f32.mrb[66].mxu0 }
 0x2a5   : > { %v7624_v44 = vpop.f32.mrb[67].mxu0 }
 0x2aa   : > { %5704 = vmatmul.mubr.msk.bf16.gmra.mrb[88].mxu0 %vm739_vm1, %v6103_v17  ;;  %v7686_v17 = vld [vmem:[%s6638_s26] sm:$0xff]  }
 0x2ab   : > { %5707 = vmatprep.mubr.msk.bf16.mxu0 %vm739_vm1, %v6104_v10 }
 0x2b2   : > { %5708 = vmatmul.mubr.msk.bf16.gmra.mrb[92].mxu0 %vm739_vm1, %v6105_v16 }
 0x2b3   : > { %5711 = vmatprep.mubr.msk.bf16.mxu0 %vm739_vm1, %v6106_v2  ;;  %v3616_v2 = vunpack.c.h.bf16 %v7682_v54 }
 0x2ba   : > { %5712 = vmatmul.mubr.msk.bf16.gmra.mrb[96].mxu0 %vm739_vm1, %v6107_v60 }
 0x33c   : > { %v5651_v55 = vpop.f32.mrb[0].mxu1 }
 0x33d   : > { %v5749_v9 = vadd.f32 %v5651_v55, %v7536_v63  ;;  %v3192_v24 = vpop.f32.mrb[1].mxu1 }
 0x33e   : > { %v5750_v53 = vadd.f32 %v3192_v24, %v7538_v34  ;;  %v5652_v50 = vpop.f32.mrb[2].mxu1  ;;  %v7700_v24 = vld [vmem:[%s6638_s26 + $0x18] sm:$0xff]  }
 0x33f   : > { %v7654_v62 = vadd.f32 %v5749_v9, %v7649_v42  ;;  %v5751_v40 = vadd.f32 %v5652_v50, %v7540_v20  ;;  %v3195_v19 = vpop.f32.mrb[3].mxu1  ;;  %v7704_v50 = vld [vmem:[%s6638_s26 + $0x10] sm:$0xff]  }
 0x340   : > { %v7658_v23 = vadd.f32 %v5750_v53, %v7649_v42  ;;  %v5752_v31 = vadd.f32 %v3195_v19, %v7542_v28 }
 0x341   : > { %v3391_v48 = vsub.f32 0.0, %v7654_v62  ;;  %v7663_v61 = vadd.f32 %v5751_v40, %v7649_v42  ;;  %v7779_v40 = vld [vmem:[%s6638_s26 + $0x40] sm:$0xff]  }
 0x342   : > { %v3389_v41 = vsub.f32 0.0, %v7658_v23  ;;  %v7667_v46 = vadd.f32 %v5752_v31, %v7649_v42 }
 0x343   : > { %v3425_v56 = vmul.f32 1.442695, %v3391_v48  ;;  %v3392_v45 = vsub.f32 0.0, %v7663_v61 }
 0x344   : > { %v3421_v13 = vmul.f32 1.442695, %v3389_v41  ;;  %v3390_v26 = vsub.f32 0.0, %v7667_v46  ;;  %v5655_v51 = vpop.f32.mrb[4].mxu1 }
 0x345   : > { %6252 = vpow2.f32 %v3425_v56  ;;  %v3427_v12 = vmul.f32 1.442695, %v3392_v45  ;;  %v5753_v38 = vadd.f32 %v5655_v51, %v7548_v21  ;;  %v3208_v63 = vpop.f32.mrb[5].mxu1  ;;  %v7713_v51 = vld [vmem:[%s6638_s26 + $0x28] sm:$0xff]  }
 0x346   : > { %6254 = vpow2.f32 %v3421_v13  ;;  %v3423_v34 = vmul.f32 1.442695, %v3390_v26  ;;  %v5754_v20 = vadd.f32 %v3208_v63, %v7550_v32  ;;  %v5656_v28 = vpop.f32.mrb[6].mxu1  ;;  %v3615_v32 = vunpack.c.l.bf16 %v7682_v54 }
 0x347   : > { %6256 = vpow2.f32 %v3427_v12  ;;  %v7674_v36 = vadd.f32 %v5753_v38, %v7649_v42  ;;  %v5755_v5 = vadd.f32 %v5656_v28, %v7552_v3  ;;  %v3211_v59 = vpop.f32.mrb[7].mxu1  ;;  %v7747_v12 = vld [vmem:[%s6638_s26 + $0x30] sm:$0xff]  }
 0x348   : > { %6258 = vpow2.f32 %v3423_v34  ;;  %v7678_v57 = vadd.f32 %v5754_v20, %v7649_v42  ;;  %v5756_v21 = vadd.f32 %v3211_v59, %v7554_v35  ;;  %v7718_v20 = vld [vmem:[%s6638_s26 + $0x20] sm:$0xff]  }
 0x349   : > { %v3395_v16 = vsub.f32 0.0, %v7674_v36  ;;  %v7691_v3 = vadd.f32 %v5755_v5, %v7649_v42 }
 0x34a   : > { %v3393_v55 = vsub.f32 0.0, %v7678_v57  ;;  %v7697_v35 = vadd.f32 %v5756_v21, %v7649_v42 }
 0x34b   : > { %v3433_v9 = vmul.f32 1.442695, %v3395_v16  ;;  %v3396_v19 = vsub.f32 0.0, %v7691_v3 }
 0x34c   : > { %v3429_v31 = vmul.f32 1.442695, %v3393_v55  ;;  %v3394_v41 = vsub.f32 0.0, %v7697_v35  ;;  %v5659_v45 = vpop.f32.mrb[8].mxu1 }
 0x34d   : > { %6260 = vpow2.f32 %v3433_v9  ;;  %v3435_v13 = vmul.f32 1.442695, %v3396_v19  ;;  %v5757_v26 = vadd.f32 %v5659_v45, %v7560_v6  ;;  %v3224_v38 = vpop.f32.mrb[9].mxu1 }
 0x34e   : > { %6262 = vpow2.f32 %v3429_v31  ;;  %v3431_v63 = vmul.f32 1.442695, %v3394_v41  ;;  %v5758_v34 = vadd.f32 %v3224_v38, %v7562_v39  ;;  %v5660_v5 = vpop.f32.mrb[10].mxu1 }
 0x34f   : > { %v6253_v59 = vpop.eup %6252  ;;  %6264 = vpow2.f32 %v3435_v13  ;;  %v7722_v21 = vadd.f32 %v5757_v26, %v7649_v42  ;;  %v5759_v6 = vadd.f32 %v5660_v5, %v7564_v49  ;;  %v3227_v55 = vpop.f32.mrb[11].mxu1  ;;  %v7742_v49 = vld [vmem:[%s6638_s26 + $0x38] sm:$0xff]  }
 0x350   : > { %v6255_v9 = vpop.eup %6254  ;;  %v3487_v19 = vadd.f32 1.0, %v6253_v59  ;;  %6266 = vpow2.f32 %v3431_v63  ;;  %v7727_v39 = vadd.f32 %v5758_v34, %v7649_v42  ;;  %v5760_v31 = vadd.f32 %v3227_v55, %v7566_v8 }
 0x351   : > { %v6257_v41 = vpop.eup %6256  ;;  %v3485_v45 = vadd.f32 1.0, %v6255_v9  ;;  %v3399_v13 = vsub.f32 0.0, %v7722_v21  ;;  %v7732_v26 = vadd.f32 %v5759_v6, %v7649_v42 }
 0x352   : > { %v6259_v38 = vpop.eup %6258  ;;  %6268 = vrcp.f32 %v3487_v19  ;;  %v3488_v5 = vadd.f32 1.0, %v6257_v41  ;;  %v3397_v63 = vsub.f32 0.0, %v7727_v39  ;;  %v7737_v34 = vadd.f32 %v5760_v31, %v7649_v42 }
 0x353   : > { %6270 = vrcp.f32 %v3485_v45  ;;  %v3486_v8 = vadd.f32 1.0, %v6259_v38  ;;  %v3441_v59 = vmul.f32 1.442695, %v3399_v13  ;;  %v3400_v55 = vsub.f32 0.0, %v7732_v26 }
 0x354   : > { %6272 = vrcp.f32 %v3488_v5  ;;  %v3437_v9 = vmul.f32 1.442695, %v3397_v63  ;;  %v3398_v6 = vsub.f32 0.0, %v7737_v34  ;;  %v5663_v16 = vpop.f32.mrb[12].mxu1 }
 0x355   : > { %6274 = vrcp.f32 %v3486_v8  ;;  %v3443_v41 = vmul.f32 1.442695, %v3400_v55  ;;  %v5761_v28 = vadd.f32 %v5663_v16, %v7572_v30  ;;  %v3240_v31 = vpop.f32.mrb[13].mxu1  ;;  %v7772_v16 = vld [vmem:[%s6638_s26 + $0x48] sm:$0xff]  }
 0x356   : > { %6276 = vpow2.f32 %v3441_v59  ;;  %v3439_v13 = vmul.f32 1.442695, %v3398_v6  ;;  %v5762_v38 = vadd.f32 %v3240_v31, %v7574_v15  ;;  %v5664_v5 = vpop.f32.mrb[14].mxu1 }
 0x357   : > { %v6261_v56 = vpop.eup %6260  ;;  %6278 = vpow2.f32 %v3437_v9  ;;  %v7753_v19 = vadd.f32 %v5761_v28, %v7649_v42  ;;  %v5763_v8 = vadd.f32 %v5664_v5, %v7576_v0  ;;  %v3243_v30 = vpop.f32.mrb[15].mxu1 }
 0x358   : > { %v6263_v55 = vpop.eup %6262  ;;  %v3491_v48 = vadd.f32 1.0, %v6261_v56  ;;  %6280 = vpow2.f32 %v3443_v41  ;;  %v7758_v59 = vadd.f32 %v5762_v38, %v7649_v42  ;;  %v5764_v15 = vadd.f32 %v3243_v30, %v7578_v18 }
 0x359   : > { %v6265_v6 = vpop.eup %6264  ;;  %v3489_v31 = vadd.f32 1.0, %v6263_v55  ;;  %6282 = vpow2.f32 %v3439_v13  ;;  %v3403_v9 = vsub.f32 0.0, %v7753_v19  ;;  %v7763_v28 = vadd.f32 %v5763_v8, %v7649_v42 }
 0x35a   : > { %v6267_v0 = vpop.eup %6266  ;;  %6284 = vrcp.f32 %v3491_v48  ;;  %v3492_v5 = vadd.f32 1.0, %v6265_v6  ;;  %v3401_v56 = vsub.f32 0.0, %v7758_v59  ;;  %v7767_v41 = vadd.f32 %v5764_v15, %v7649_v42 }
 0x35b   : > { %6286 = vrcp.f32 %v3489_v31  ;;  %v3490_v38 = vadd.f32 1.0, %v6267_v0  ;;  %v3449_v18 = vmul.f32 1.442695, %v3403_v9  ;;  %v3404_v30 = vsub.f32 0.0, %v7763_v28 }
 0x35c   : > { %v6269_v13 = vpop.eup %6268  ;;  %6288 = vrcp.f32 %v3492_v5  ;;  %v3445_v55 = vmul.f32 1.442695, %v3401_v56  ;;  %v3402_v8 = vsub.f32 0.0, %v7767_v41  ;;  %v5667_v45 = vpop.f32.mrb[16].mxu1 }
 0x35d   : > { %v6271_v6 = vpop.eup %6270  ;;  %v3583_v15 = vmul.f32 %v6269_v13, %v7654_v62  ;;  %6290 = vrcp.f32 %v3490_v38  ;;  %v3451_v31 = vmul.f32 1.442695, %v3404_v30  ;;  %v5765_v9 = vadd.f32 %v5667_v45, %v7584_v47  ;;  %v3256_v0 = vpop.f32.mrb[17].mxu1 }
 0x35e   : > { %v6273_v63 = vpop.eup %6272  ;;  %6292 = vpow2.f32 %v3449_v18  ;;  %v3447_v5 = vmul.f32 1.442695, %v3402_v8  ;;  %v5766_v56 = vadd.f32 %v3256_v0, %v7586_v29  ;;  %v5668_v60 = vpop.f32.mrb[18].mxu1  ;;  %v3632_v47 = vunpack.c.h.bf16 %v7772_v16 }
 0x35f   : > { %v6275_v10 = vpop.eup %6274  ;;  %v3584_v48 = vmul.f32 %v6273_v63, %v7663_v61  ;;  %6294 = vpow2.f32 %v3445_v55  ;;  %v7784_v62 = vadd.f32 %v5765_v9, %v7649_v42  ;;  %v3259_v45 = vpop.f32.mrb[19].mxu1  ;;  %v7789_v18 = vadd.f32 %v3615_v32, %v3583_v15 }
 0x360   : > { %v6277_v38 = vpop.eup %6276  ;;  %v3581_v29 = vmul.f32 %v6271_v6, %v7658_v23  ;;  %6296 = vpow2.f32 %v3451_v31  ;;  %v7793_v30 = vadd.f32 %v5766_v56, %v7649_v42  ;;  %v3582_v9 = vmul.f32 %v6275_v10, %v7667_v46 }
 0x361   : > { %v6279_v13 = vpop.eup %6278  ;;  %v7797_v61 = vadd.f32 %v3616_v2, %v3584_v48  ;;  %v3495_v63 = vadd.f32 1.0, %v6277_v38  ;;  %6298 = vpow2.f32 %v3447_v5  ;;  %v3407_v55 = vsub.f32 0.0, %v7784_v62 }
 0x362   : > { %v6281_v8 = vpop.eup %6280  ;;  %v3493_v32 = vadd.f32 1.0, %v6279_v13  ;;  %v3405_v15 = vsub.f32 0.0, %v7793_v30  ;;  %v5767_v23 = vadd.f32 %v5668_v60, %v7588_v33  ;;  %v5768_v33 = vadd.f32 %v3259_v45, %v7590_v43 }
 0x363   : > { %v6283_v6 = vpop.eup %6282  ;;  %v3710_v31 = vpack.c.bf16 %v7797_v61, %v7789_v18  ;;  %6300 = vrcp.f32 %v3495_v63  ;;  %v3496_v54 = vadd.f32 1.0, %v6281_v8  ;;  %v3457_v2 = vmul.f32 1.442695, %v3407_v55 }
 0x364   : > { %v6285_v48 = vpop.eup %6284  ;;  %6302 = vrcp.f32 %v3493_v32  ;;  %v3494_v0 = vadd.f32 1.0, %v6283_v6  ;;  %v3453_v5 = vmul.f32 1.442695, %v3405_v15  ;;  %v7806_v56 = vadd.f32 %v5767_v23, %v7649_v42  ;;  %v5671_v46 = vpop.f32.mrb[20].mxu1 }
 0x365   : > { %v6287_v10 = vpop.eup %6286  ;;  %v3587_v38 = vmul.f32 %v6285_v48, %v7674_v36  ;;  %6304 = vrcp.f32 %v3496_v54  ;;  %v5769_v60 = vadd.f32 %v5671_v46, %v7596_v27  ;;  %v3272_v13 = vpop.f32.mrb[21].mxu1  ;;  %v3630_v8 = vunpack.c.h.bf16 %v7779_v40 }
 0x366   : > { %v6289_v63 = vpop.eup %6288  ;;  %6306 = vrcp.f32 %v3494_v0  ;;  %v3408_v55 = vsub.f32 0.0, %v7806_v56  ;;  %v5770_v32 = vadd.f32 %v3272_v13, %v7598_v1  ;;  %v5672_v15 = vpop.f32.mrb[22].mxu1  ;;  %v8264_v6 = vunpack.c.l.bf16 %v7686_v17 }
 0x367   : > { %v6291_v23 = vpop.eup %6290  ;;  %v8265_v36 = vunpack.c.h.bf16 %v7686_v17  ;;  %6308 = vpow2.f32 %v3457_v2  ;;  %v7819_v43 = vadd.f32 %v5768_v33, %v7649_v42  ;;  %v3275_v27 = vpop.f32.mrb[23].mxu1  ;;  %v8266_v48 = vunpack.c.l.bf16 %v7700_v24 }
 0x368   : > { %v3645_v53 = vadd.f32 %v8264_v6, %v3581_v29  ;;  %v6293_v45 = vpop.eup %6292  ;;  %v3585_v1 = vmul.f32 %v6287_v10, %v7678_v57  ;;  %6310 = vpow2.f32 %v3453_v5  ;;  %v3459_v46 = vmul.f32 1.442695, %v3408_v55 }
 0x369   : > { %v3646_v54 = vadd.f32 %v8265_v36, %v3582_v9  ;;  %v7823_v0 = vadd.f32 %v8266_v48, %v3587_v38  ;;  %v6295_v13 = vpop.eup %6294  ;;  %v3588_v29 = vmul.f32 %v6289_v63, %v7691_v3  ;;  %v3499_v6 = vadd.f32 1.0, %v6293_v45 }
 0x36a   : > { %v3406_v17 = vsub.f32 0.0, %v7819_v43  ;;  %v7829_v9 = vadd.f32 %v5769_v60, %v7649_v42  ;;  %v6297_v2 = vpop.eup %6296  ;;  %v3586_v33 = vmul.f32 %v6291_v23, %v7697_v35  ;;  %v3497_v36 = vadd.f32 1.0, %v6295_v13 }
 0x36b   : > { %6312 = vpow2.f32 %v3459_v46  ;;  %v7833_v38 = vadd.f32 %v5770_v32, %v7649_v42  ;;  %v6299_v57 = vpop.eup %6298  ;;  %v3500_v5 = vadd.f32 1.0, %v6297_v2  ;;  %v5771_v60 = vadd.f32 %v5672_v15, %v7600_v22 }
 0x36c   : > { %6314 = vrcp.f32 %v3499_v6  ;;  %v3455_v10 = vmul.f32 1.442695, %v3406_v17  ;;  %v3411_v3 = vsub.f32 0.0, %v7829_v9  ;;  %v3498_v63 = vadd.f32 1.0, %v6299_v57  ;;  %v5675_v45 = vpop.f32.mrb[24].mxu1 }
 0x36d   : > { %6316 = vrcp.f32 %v3497_v36  ;;  %v3409_v55 = vsub.f32 0.0, %v7833_v38  ;;  %v6301_v48 = vpop.eup %6300  ;;  %v3709_v23 = vpack.c.bf16 %v3646_v54, %v3645_v53  ;;  %v5772_v32 = vadd.f32 %v3275_v27, %v7602_v25  ;;  %v3288_v46 = vpop.f32.mrb[25].mxu1 }
 0x36e   : > { %6318 = vrcp.f32 %v3500_v5  ;;  %v3465_v35 = vmul.f32 1.442695, %v3411_v3  ;;  %v6303_v13 = vpop.eup %6302  ;;  %v3591_v6 = vmul.f32 %v6301_v48, %v7722_v21  ;;  %v7841_v2 = vadd.f32 %v5771_v60, %v7649_v42  ;;  %v5676_v36 = vpop.f32.mrb[26].mxu1 }
 0x36f   : > { %6320 = vrcp.f32 %v3498_v63  ;;  %v3461_v17 = vmul.f32 1.442695, %v3409_v55  ;;  %v6305_v57 = vpop.eup %6304  ;;  %v8267_v22 = vunpack.c.l.bf16 %v7704_v50  ;;  %5717 = vmatprep.mubr.msk.bf16.mxu0 %vm739_vm1, %v3709_v23  ;;  %v7847_v53 = vadd.f32 %v5772_v32, %v7649_v42  ;;  %v3291_v54 = vpop.f32.mrb[27].mxu1 }
 0x370   : > { %6322 = vpow2.f32 %v3455_v10  ;;  %v5773_v25 = vadd.f32 %v5675_v45, %v7608_v11  ;;  %v6307_v21 = vpop.eup %6306  ;;  %v8268_v27 = vunpack.c.h.bf16 %v7700_v24  ;;  %v8269_v3 = vunpack.c.h.bf16 %v7704_v50  ;;  %5718 = vmatmul.mubr.msk.bf16.vlgmr.msra.gmra.mrb[68].mxu0 %vm739_vm1, %v3710_v31 }
 0x371   : > { %v3649_v15 = vadd.f32 %v8267_v22, %v3585_v1  ;;  %6324 = vpow2.f32 %v3465_v35  ;;  %v3412_v1 = vsub.f32 0.0, %v7841_v2  ;;  %v6309_v10 = vpop.eup %6308  ;;  %v8270_v11 = vunpack.c.l.bf16 %v7713_v51 }
 0x372   : > { %v7852_v5 = vadd.f32 %v8268_v27, %v3588_v29  ;;  %v3650_v63 = vadd.f32 %v8269_v3, %v3586_v33  ;;  %v3589_v24 = vmul.f32 %v6303_v13, %v7727_v39  ;;  %6326 = vpow2.f32 %v3461_v17  ;;  %v6311_v50 = vpop.eup %6310 }
 0x373   : > { %v7863_v55 = vadd.f32 %v8270_v11, %v3591_v6  ;;  %v3410_v29 = vsub.f32 0.0, %v7847_v53  ;;  %v3592_v33 = vmul.f32 %v6305_v57, %v7732_v26  ;;  %v3503_v60 = vadd.f32 1.0, %v6309_v10 }
 0x374   : > { %v3467_v45 = vmul.f32 1.442695, %v3412_v1  ;;  %v7869_v48 = vadd.f32 %v5773_v25, %v7649_v42  ;;  %v3590_v18 = vmul.f32 %v6307_v21, %v7737_v34  ;;  %v3501_v61 = vadd.f32 1.0, %v6311_v50  ;;  %v5679_v6 = vpop.f32.mrb[28].mxu1 }
 0x375   : > { %v3463_v31 = vmul.f32 1.442695, %v3410_v29  ;;  %v5774_v35 = vadd.f32 %v3288_v46, %v7610_v4  ;;  %v6313_v23 = vpop.eup %6312  ;;  %6328 = vrcp.f32 %v3503_v60  ;;  %v5775_v32 = vadd.f32 %v5676_v36, %v7612_v14  ;;  %v3304_v22 = vpop.f32.mrb[29].mxu1 }
 0x376   : > { %v3415_v39 = vsub.f32 0.0, %v7869_v48  ;;  %v3711_v13 = vpack.c.bf16 %v3650_v63, %v3649_v15  ;;  %v6315_v26 = vpop.eup %6314  ;;  %6330 = vrcp.f32 %v3501_v61  ;;  %v3504_v17 = vadd.f32 1.0, %v6313_v23  ;;  %v5680_v14 = vpop.f32.mrb[30].mxu1 }
 0x377   : > { %v7876_v57 = vadd.f32 %v5774_v35, %v7649_v42  ;;  %v5776_v34 = vadd.f32 %v3291_v54, %v7614_v7  ;;  %v6317_v25 = vpop.eup %6316  ;;  %v3595_v4 = vmul.f32 %v6315_v26, %v7753_v19  ;;  %6332 = vpow2.f32 %v3467_v45  ;;  %v3307_v54 = vpop.f32.mrb[31].mxu1 }
 0x378   : > { %v3473_v46 = vmul.f32 1.442695, %v3415_v39  ;;  %v7881_v21 = vadd.f32 %v5775_v32, %v7649_v42  ;;  %5721 = vmatprep.mubr.msk.bf16.mxu0 %vm739_vm1, %v3711_v13  ;;  %v6319_v36 = vpop.eup %6318  ;;  %v8271_v15 = vunpack.c.l.bf16 %v7718_v20  ;;  %6334 = vrcp.f32 %v3504_v17 }
 0x379   : > { %v3413_v3 = vsub.f32 0.0, %v7876_v57  ;;  %v7888_v7 = vadd.f32 %v5776_v34, %v7649_v42  ;;  %v6321_v19 = vpop.eup %6320  ;;  %v8272_v63 = vunpack.c.h.bf16 %v7713_v51  ;;  %v8273_v10 = vunpack.c.h.bf16 %v7718_v20 }
 0x37a   : > { %v3653_v27 = vadd.f32 %v8271_v15, %v3589_v24  ;;  %6336 = vpow2.f32 %v3463_v31  ;;  %v3416_v29 = vsub.f32 0.0, %v7881_v21  ;;  %v6323_v50 = vpop.eup %6322  ;;  %v8274_v24 = vunpack.c.l.bf16 %v7742_v49 }
 0x37b   : > { %v7892_v1 = vadd.f32 %v8272_v63, %v3592_v33  ;;  %v3654_v11 = vadd.f32 %v8273_v10, %v3590_v18  ;;  %v3593_v45 = vmul.f32 %v6317_v25, %v7758_v59  ;;  %6338 = vpow2.f32 %v3473_v46  ;;  %v6325_v35 = vpop.eup %6324 }
 0x37c   : > { %v7899_v60 = vadd.f32 %v8274_v24, %v3595_v4  ;;  %v3469_v61 = vmul.f32 1.442695, %v3413_v3  ;;  %v3596_v51 = vmul.f32 %v6319_v36, %v7763_v28  ;;  %v3594_v33 = vmul.f32 %v6321_v19, %v7767_v41  ;;  %v6327_v18 = vpop.eup %6326 }
 0x37d   : > { %v3502_v23 = vadd.f32 1.0, %v6323_v50  ;;  %v3414_v20 = vsub.f32 0.0, %v7888_v7  ;;  %v3507_v31 = vadd.f32 1.0, %v6325_v35  ;;  %v3475_v39 = vmul.f32 1.442695, %v3416_v29 }
 0x37e   : > { %6340 = vpow2.f32 %v3469_v61  ;;  %v3712_v32 = vpack.c.bf16 %v7852_v5, %v7823_v0  ;;  %v3505_v13 = vadd.f32 1.0, %v6327_v18  ;;  %v5777_v26 = vadd.f32 %v5679_v6, %v7618_v52 }
 0x37f   : > { %6342 = vrcp.f32 %v3502_v23  ;;  %v3471_v59 = vmul.f32 1.442695, %v3414_v20  ;;  %v5778_v28 = vadd.f32 %v3304_v22, %v7620_v58  ;;  %v5779_v41 = vadd.f32 %v5680_v14, %v7622_v37  ;;  %v6329_v34 = vpop.eup %6328 }
 0x380   : > { %6344 = vrcp.f32 %v3507_v31  ;;  %5722 = vmatmul.mubr.msk.bf16.gmra.mrb[72].mxu0 %vm739_vm1, %v3712_v32  ;;  %v3713_v17 = vpack.c.bf16 %v3654_v11, %v3653_v27  ;;  %v7912_v25 = vadd.f32 %v5777_v26, %v7649_v42  ;;  %v5780_v0 = vadd.f32 %v3307_v54, %v7624_v44  ;;  %v6331_v4 = vpop.eup %6330 }
 0x381   : > { %6346 = vrcp.f32 %v3505_v13  ;;  %v3714_v5 = vpack.c.bf16 %v7892_v1, %v7863_v55  ;;  %v8275_v52 = vunpack.c.h.bf16 %v7742_v49  ;;  %v7922_v58 = vadd.f32 %v5778_v28, %v7649_v42  ;;  %v6333_v22 = vpop.eup %6332 }
 0x382   : > { %6348 = vpow2.f32 %v3475_v39  ;;  %v7925_v37 = vadd.f32 %v5779_v41, %v7649_v42  ;;  %5725 = vmatprep.mubr.msk.bf16.mxu0 %vm739_vm1, %v3713_v17  ;;  %v3599_v44 = vmul.f32 %v6329_v34, %v7784_v62  ;;  %v3419_v55 = vsub.f32 0.0, %v7912_v25  ;;  %v6335_v49 = vpop.eup %6334  ;;  %v6518_v17 = vld [vmem:[%s6638_s26 + $0x58] sm:$0xff]  }
 0x383   : > { %v7919_v6 = vadd.f32 %v8275_v52, %v3596_v51  ;;  %6350 = vpow2.f32 %v3471_v59  ;;  %v7931_v46 = vadd.f32 %v5780_v0, %v7649_v42  ;;  %v8276_v14 = vunpack.c.h.bf16 %v7747_v12  ;;  %v6519_v52 = vld [vmem:[%s6638_s26 + $0x50] sm:$0xff]  }
 0x384   : > { %v3508_v15 = vadd.f32 1.0, %v6333_v22  ;;  %v3417_v27 = vsub.f32 0.0, %v7922_v58  ;;  %v3420_v3 = vsub.f32 0.0, %v7925_v37  ;;  %v6337_v54 = vpop.eup %6336  ;;  %v8277_v19 = vunpack.c.l.bf16 %v7747_v12 }
 0x385   : > { %v3658_v36 = vadd.f32 %v8276_v14, %v3594_v33  ;;  %v3600_v62 = vmul.f32 %v6335_v49, %v7806_v56  ;;  %v3481_v1 = vmul.f32 1.442695, %v3419_v55  ;;  %v3418_v10 = vsub.f32 0.0, %v7931_v46  ;;  %v6339_v42 = vpop.eup %6338 }
 0x386   : > { %v3657_v63 = vadd.f32 %v8277_v19, %v3593_v45  ;;  %v3597_v11 = vmul.f32 %v6331_v4, %v7793_v30  ;;  %6352 = vrcp.f32 %v3508_v15  ;;  %v3506_v29 = vadd.f32 1.0, %v6337_v54 }
 0x387   : > { %v3477_v50 = vmul.f32 1.442695, %v3417_v27  ;;  %v8278_v24 = vunpack.c.l.bf16 %v7772_v16  ;;  %v7948_v35 = vadd.f32 %v3632_v47, %v3600_v62  ;;  %v3511_v12 = vadd.f32 1.0, %v6339_v42  ;;  %v6520_v42 = vld [vmem:[%s6638_s26 + $0x68] sm:$0xff]  }
 0x388   : > { %6354 = vpow2.f32 %v3481_v1  ;;  %v6341_v56 = vpop.eup %6340  ;;  %v3483_v45 = vmul.f32 1.442695, %v3420_v3  ;;  %5726 = vmatmul.mubr.msk.bf16.gmra.mrb[76].mxu0 %vm739_vm1, %v3714_v5  ;;  %v3715_v51 = vpack.c.bf16 %v3658_v36, %v3657_v63  ;;  %v3716_v30 = vpack.c.bf16 %v7919_v6, %v7899_v60 }
 0x389   : > { %v7944_v61 = vadd.f32 %v8278_v24, %v3599_v44  ;;  %6356 = vrcp.f32 %v3506_v29  ;;  %v6343_v33 = vpop.eup %6342  ;;  %v3509_v23 = vadd.f32 1.0, %v6341_v56  ;;  %v3479_v20 = vmul.f32 1.442695, %v3418_v10 }
 0x38a   : > { %6358 = vrcp.f32 %v3511_v12  ;;  %v6345_v47 = vpop.eup %6344  ;;  %v3598_v18 = vmul.f32 %v6343_v33, %v7819_v43  ;;  %5729 = vmatprep.mubr.msk.bf16.mxu0 %vm739_vm1, %v3715_v51  ;;  %v8279_v32 = vunpack.c.l.bf16 %v7779_v40  ;;  %v3635_v34 = vunpack.c.l.bf16 %v6518_v17 }
 0x38b   : > { %v3718_v16 = vpack.c.bf16 %v7948_v35, %v7944_v61  ;;  %6360 = vpow2.f32 %v3477_v50  ;;  %v6347_v31 = vpop.eup %6346  ;;  %v3603_v43 = vmul.f32 %v6345_v47, %v7829_v9  ;;  %v3636_v0 = vunpack.c.h.bf16 %v6518_v17  ;;  %v6521_v61 = vld [vmem:[%s6638_s26 + $0x60] sm:$0xff]  }
 0x38c   : > { %6362 = vrcp.f32 %v3509_v23  ;;  %v6349_v39 = vpop.eup %6348  ;;  %v3661_v60 = vadd.f32 %v8279_v32, %v3597_v11  ;;  %v3662_v13 = vadd.f32 %v3630_v8, %v3598_v18  ;;  %v3601_v4 = vmul.f32 %v6347_v31, %v7833_v38  ;;  %v6522_v31 = vld [vmem:[%s6638_s26 + $0x78] sm:$0xff]  }
 0x38d   : > { %6364 = vpow2.f32 %v3483_v45  ;;  %v6351_v59 = vpop.eup %6350  ;;  %v3512_v26 = vadd.f32 1.0, %v6349_v39  ;;  %v3633_v6 = vunpack.c.l.bf16 %v6519_v52  ;;  %v3634_v22 = vunpack.c.h.bf16 %v6519_v52 }
 0x38e   : > { %6366 = vpow2.f32 %v3479_v20  ;;  %v3510_v28 = vadd.f32 1.0, %v6351_v59  ;;  %v3717_v41 = vpack.c.bf16 %v3662_v13, %v3661_v60  ;;  %v3667_v49 = vadd.f32 %v3635_v34, %v3603_v43  ;;  %v6523_v60 = vld [vmem:[%s6638_s26 + $0x70] sm:$0xff]  }
 0x38f   : > { %6368 = vrcp.f32 %v3512_v26  ;;  %v3665_v15 = vadd.f32 %v3633_v6, %v3601_v4  ;;  %v3639_v11 = vunpack.c.l.bf16 %v6520_v42  ;;  %v3640_v29 = vunpack.c.h.bf16 %v6520_v42 }
 0x390   : > { %v6353_v5 = vpop.eup %6352  ;;  %6370 = vrcp.f32 %v3510_v28  ;;  %5730 = vmatmul.mubr.msk.bf16.gmra.mrb[80].mxu0 %vm739_vm1, %v3716_v30  ;;  %v3637_v35 = vunpack.c.l.bf16 %v6521_v61  ;;  %v3638_v12 = vunpack.c.h.bf16 %v6521_v61  ;;  %v3644_v39 = vunpack.c.h.bf16 %v6522_v31 }
 0x391   : > { %v3604_v8 = vmul.f32 %v6353_v5, %v7841_v2  ;;  %5733 = vmatprep.mubr.msk.bf16.mxu0 %vm739_vm1, %v3717_v41  ;;  %v3641_v13 = vunpack.c.l.bf16 %v6523_v60  ;;  %v3642_v59 = vunpack.c.h.bf16 %v6523_v60 }
 0x392   : > { %v6355_v40 = vpop.eup %6354 }
 0x393   : > { %v6357_v44 = vpop.eup %6356  ;;  %v3515_v9 = vadd.f32 1.0, %v6355_v40  ;;  %v3668_v14 = vadd.f32 %v3636_v0, %v3604_v8 }
 0x394   : > { %v6359_v55 = vpop.eup %6358  ;;  %v3602_v36 = vmul.f32 %v6357_v44, %v7847_v53 }
 0x395   : > { %v6361_v38 = vpop.eup %6360  ;;  %6372 = vrcp.f32 %v3515_v9  ;;  %v3720_v19 = vpack.c.bf16 %v3668_v14, %v3667_v49  ;;  %v3607_v10 = vmul.f32 %v6359_v55, %v7869_v48 }
 0x396   : > { %v6363_v27 = vpop.eup %6362  ;;  %v3666_v3 = vadd.f32 %v3634_v22, %v3602_v36  ;;  %v3513_v54 = vadd.f32 1.0, %v6361_v38 }
 0x397   : > { %v6365_v2 = vpop.eup %6364  ;;  %v3605_v24 = vmul.f32 %v6363_v27, %v7876_v57  ;;  %v3671_v51 = vadd.f32 %v3639_v11, %v3607_v10 }
 0x398   : > { %v6367_v63 = vpop.eup %6366  ;;  %6374 = vrcp.f32 %v3513_v54  ;;  %v3516_v62 = vadd.f32 1.0, %v6365_v2  ;;  %v3719_v1 = vpack.c.bf16 %v3666_v3, %v3665_v15  ;;  %5734 = vmatmul.mubr.msk.bf16.gmra.mrb[84].mxu0 %vm739_vm1, %v3718_v16 }
 0x399   : > { %v3514_v50 = vadd.f32 1.0, %v6367_v63  ;;  %v6369_v53 = vpop.eup %6368  ;;  %v3669_v33 = vadd.f32 %v3637_v35, %v3605_v24 }
 0x39a   : > { %6376 = vrcp.f32 %v3516_v62  ;;  %5737 = vmatprep.mubr.msk.bf16.mxu0 %vm739_vm1, %v3719_v1  ;;  %v6371_v56 = vpop.eup %6370  ;;  %v3608_v45 = vmul.f32 %v6369_v53, %v7881_v21  ;;  %v3643_v21 = vunpack.c.l.bf16 %v6522_v31 }
 0x39b   : > { %6378 = vrcp.f32 %v3514_v50  ;;  %v3606_v48 = vmul.f32 %v6371_v56, %v7888_v7 }
 0x39c   : > { %v3672_v30 = vadd.f32 %v3640_v29, %v3608_v45 }
 0x39d   : > { %v3670_v23 = vadd.f32 %v3638_v12, %v3606_v48 }
 0x39e   : > { %v3722_v20 = vpack.c.bf16 %v3672_v30, %v3671_v51 }
 0x39f   : > { %v6373_v57 = vpop.eup %6372  ;;  %v3721_v16 = vpack.c.bf16 %v3670_v23, %v3669_v33 }
 0x3a0   : > { %5738 = vmatmul.mubr.msk.bf16.gmra.mrb[88].mxu0 %vm739_vm1, %v3720_v19  ;;  %v3611_v18 = vmul.f32 %v6373_v57, %v7912_v25 }
 0x3a1   : > { %5741 = vmatprep.mubr.msk.bf16.mxu0 %vm739_vm1, %v3721_v16 }
 0x3a2   : > { %v6375_v47 = vpop.eup %6374  ;;  %v3675_v43 = vadd.f32 %v3643_v21, %v3611_v18 }
 0x3a3   : > { %v3609_v7 = vmul.f32 %v6375_v47, %v7922_v58  ;;  %v7991_v58 = vld [vmem:[%s8242_s10] ss:$0 sm:$0xff] }
 0x3a4   : > { %v6377_v32 = vpop.eup %6376 }
 0x3a5   : > { %v6379_v26 = vpop.eup %6378  ;;  %v3612_v28 = vmul.f32 %v6377_v32, %v7925_v37  ;;  %v3673_v34 = vadd.f32 %v3641_v13, %v3609_v7 }
 0x3a6   : > { %v3610_v41 = vmul.f32 %v6379_v26, %v7931_v46 }
 0x3a7   : > { %v3676_v17 = vadd.f32 %v3644_v39, %v3612_v28 }
 0x3a8   : > { %v3674_v0 = vadd.f32 %v3642_v59, %v3610_v41  ;;  %5742 = vmatmul.mubr.msk.bf16.gmra.mrb[92].mxu0 %vm739_vm1, %v3722_v20 }
 0x3a9   : > { %v3724_v25 = vpack.c.bf16 %v3676_v17, %v3675_v43 }
 0x3aa   : > { %v3723_v5 = vpack.c.bf16 %v3674_v0, %v3673_v34 }
 0x3ac   : > { %5745 = vmatprep.mubr.msk.bf16.mxu0 %vm739_vm1, %v3723_v5 }
 0x3b0   : > { %5746 = vmatmul.mubr.msk.bf16.gmra.mrb[96].mxu0 %vm739_vm1, %v3724_v25 }
 0x443   : > { %v5719_v37 = vpop.f32.mrb[68].mxu0 }
 0x444   : > { %v7994_v46 = vadd.f32 %v5719_v37, %v7991_v58  ;;  %v4104_v4 = vpop.f32.mrb[69].mxu0 }
 0x445   : > { %v7997_v52 = vadd.f32 %v7991_v58, %v4104_v4  ;;  %v5720_v6 = vpop.f32.mrb[70].mxu0 }
 0x446   : > { %v4272_v40 = vsub.f32 0.0, %v7994_v46  ;;  %v8001_v8 = vadd.f32 %v5720_v6, %v7991_v58  ;;  %v4107_v22 = vpop.f32.mrb[71].mxu0 }
 0x447   : > { %v4270_v44 = vsub.f32 0.0, %v7997_v52  ;;  %v8005_v9 = vadd.f32 %v7991_v58, %v4107_v22 }
 0x448   : > { %v4306_v55 = vmul.f32 1.442695, %v4272_v40  ;;  %v4273_v49 = vsub.f32 0.0, %v8001_v8 }
 0x449   : > { %v4302_v14 = vmul.f32 1.442695, %v4270_v44  ;;  %v4271_v36 = vsub.f32 0.0, %v8005_v9 }
 0x44a   : > { %6380 = vpow2.f32 %v4306_v55  ;;  %v4308_v38 = vmul.f32 1.442695, %v4273_v49 }
 0x44b   : > { %6382 = vpow2.f32 %v4302_v14  ;;  %v4304_v15 = vmul.f32 1.442695, %v4271_v36 }
 0x44c   : > { %6384 = vpow2.f32 %v4308_v38 }
 0x44d   : > { %6386 = vpow2.f32 %v4304_v15 }
 0x453   : > { %v5723_v27 = vpop.f32.mrb[72].mxu0 }
 0x454   : > { %v8010_v3 = vadd.f32 %v5723_v27, %v7991_v58  ;;  %v4120_v54 = vpop.f32.mrb[73].mxu0  ;;  %v6381_v10 = vpop.eup %6380 }
 0x455   : > { %v8013_v19 = vadd.f32 %v7991_v58, %v4120_v54  ;;  %v5724_v2 = vpop.f32.mrb[74].mxu0  ;;  %v6383_v29 = vpop.eup %6382  ;;  %v4368_v50 = vadd.f32 1.0, %v6381_v10 }
 0x456   : > { %v4276_v63 = vsub.f32 0.0, %v8010_v3  ;;  %v8017_v62 = vadd.f32 %v5724_v2, %v7991_v58  ;;  %v4123_v1 = vpop.f32.mrb[75].mxu0  ;;  %v6385_v24 = vpop.eup %6384  ;;  %v4366_v61 = vadd.f32 1.0, %v6383_v29 }
 0x457   : > { %v4274_v42 = vsub.f32 0.0, %v8013_v19  ;;  %v8021_v11 = vadd.f32 %v7991_v58, %v4123_v1  ;;  %v6387_v12 = vpop.eup %6386  ;;  %6388 = vrcp.f32 %v4368_v50  ;;  %v4369_v56 = vadd.f32 1.0, %v6385_v24 }
 0x458   : > { %v4277_v53 = vsub.f32 0.0, %v8017_v62  ;;  %v4314_v45 = vmul.f32 1.442695, %v4276_v63  ;;  %6390 = vrcp.f32 %v4366_v61  ;;  %v4367_v48 = vadd.f32 1.0, %v6387_v12 }
 0x459   : > { %v4275_v35 = vsub.f32 0.0, %v8021_v11  ;;  %v4310_v51 = vmul.f32 1.442695, %v4274_v42  ;;  %6392 = vrcp.f32 %v4369_v56 }
 0x45a   : > { %v4316_v33 = vmul.f32 1.442695, %v4277_v53  ;;  %6394 = vrcp.f32 %v4367_v48 }
 0x45b   : > { %v5727_v30 = vpop.f32.mrb[76].mxu0  ;;  %v4312_v57 = vmul.f32 1.442695, %v4275_v35  ;;  %6396 = vpow2.f32 %v4314_v45 }
 0x45c   : > { %v8026_v23 = vadd.f32 %v5727_v30, %v7991_v58  ;;  %v4136_v20 = vpop.f32.mrb[77].mxu0  ;;  %6398 = vpow2.f32 %v4310_v51 }
 0x45d   : > { %v8029_v16 = vadd.f32 %v7991_v58, %v4136_v20  ;;  %v5728_v47 = vpop.f32.mrb[78].mxu0  ;;  %6400 = vpow2.f32 %v4316_v33 }
 0x45e   : > { %v4280_v18 = vsub.f32 0.0, %v8026_v23  ;;  %v8033_v31 = vadd.f32 %v5728_v47, %v7991_v58  ;;  %v4139_v21 = vpop.f32.mrb[79].mxu0  ;;  %6402 = vpow2.f32 %v4312_v57 }
 0x45f   : > { %v4278_v39 = vsub.f32 0.0, %v8029_v16  ;;  %v8037_v32 = vadd.f32 %v7991_v58, %v4139_v21 }
 0x460   : > { %v4322_v7 = vmul.f32 1.442695, %v4280_v18  ;;  %v4281_v60 = vsub.f32 0.0, %v8033_v31 }
 0x461   : > { %v4318_v13 = vmul.f32 1.442695, %v4278_v39  ;;  %v4279_v59 = vsub.f32 0.0, %v8037_v32  ;;  %v6389_v43 = vpop.eup %6388 }
 0x462   : > { %6404 = vpow2.f32 %v4322_v7  ;;  %v4324_v26 = vmul.f32 1.442695, %v4281_v60  ;;  %v6391_v0 = vpop.eup %6390  ;;  %v4464_v25 = vmul.f32 %v6389_v43, %v7994_v46 }
 0x463   : > { %6406 = vpow2.f32 %v4318_v13  ;;  %v4320_v28 = vmul.f32 1.442695, %v4279_v59  ;;  %v5731_v41 = vpop.f32.mrb[80].mxu0  ;;  %v6393_v4 = vpop.eup %6392  ;;  %v4462_v6 = vmul.f32 %v6391_v0, %v7997_v52 }
 0x464   : > { %6408 = vpow2.f32 %v4324_v26  ;;  %v8042_v17 = vadd.f32 %v5731_v41, %v7991_v58  ;;  %v4152_v34 = vpop.f32.mrb[81].mxu0  ;;  %v6395_v46 = vpop.eup %6394  ;;  %v5100_v44 = vpack.c.bf16 %v4464_v25, %v4464_v25  ;;  %v4465_v55 = vmul.f32 %v6393_v4, %v8001_v8 }
 0x465   : > { %6410 = vpow2.f32 %v4320_v28  ;;  %v8046_v5 = vadd.f32 %v7991_v58, %v4152_v34  ;;  %v5732_v37 = vpop.f32.mrb[82].mxu0  ;;  %v6397_v14 = vpop.eup %6396  ;;  %v5098_v36 = vpack.c.bf16 %v4462_v6, %v4462_v6  ;;  %v4463_v38 = vmul.f32 %v6395_v46, %v8005_v9 }
 0x466   : > { %v4284_v40 = vsub.f32 0.0, %v8042_v17  ;;  %v4155_v22 = vpop.f32.mrb[83].mxu0  ;;  %v8058_v49 = vadd.f32 %v5732_v37, %v7991_v58  ;;  %v6399_v52 = vpop.eup %6398  ;;  %4625 = vst.msk [vmem:[%s8052_s24 + $0x8] sm:$0xf] %vm4622_vm8, %v5100_v44  ;;  %v5101_v54 = vpack.c.bf16 %v4465_v55, %v4465_v55  ;;  %v4372_v2 = vadd.f32 1.0, %v6397_v14 }
 0x467   : > { %v4282_v27 = vsub.f32 0.0, %v8046_v5  ;;  %v8065_v63 = vadd.f32 %v7991_v58, %v4155_v22  ;;  %v6401_v8 = vpop.eup %6400  ;;  %4623 = vst.msk [vmem:[%s8052_s24] sm:$0xf] %vm4622_vm8, %v5098_v36  ;;  %v5099_v1 = vpack.c.bf16 %v4463_v38, %v4463_v38  ;;  %v4370_v10 = vadd.f32 1.0, %v6399_v52 }
 0x468   : > { %v4330_v15 = vmul.f32 1.442695, %v4284_v40  ;;  %v6403_v42 = vpop.eup %6402  ;;  %4626 = vst.msk [vmem:[%s8052_s24 + $0xc] sm:$0xf] %vm4622_vm8, %v5101_v54  ;;  %v4373_v9 = vadd.f32 1.0, %v6401_v8  ;;  %v4285_v29 = vsub.f32 0.0, %v8058_v49 }
 0x469   : > { %4624 = vst.msk [vmem:[%s8052_s24 + $0x4] sm:$0xf] %vm4622_vm8, %v5099_v1  ;;  %v4371_v24 = vadd.f32 1.0, %v6403_v42  ;;  %v4326_v61 = vmul.f32 1.442695, %v4282_v27  ;;  %v4283_v48 = vsub.f32 0.0, %v8065_v63 }
 0x46a   : > { %6412 = vpow2.f32 %v4330_v15  ;;  %v4332_v7 = vmul.f32 1.442695, %v4285_v29 }
 0x46b   : > { %6414 = vrcp.f32 %v4372_v2  ;;  %v5735_v50 = vpop.f32.mrb[84].mxu0  ;;  %v4328_v28 = vmul.f32 1.442695, %v4283_v48 }
 0x46c   : > { %v6405_v53 = vpop.eup %6404  ;;  %6416 = vrcp.f32 %v4370_v10  ;;  %v8075_v35 = vadd.f32 %v5735_v50, %v7991_v58  ;;  %v4168_v12 = vpop.f32.mrb[85].mxu0 }
 0x46d   : > { %v6407_v56 = vpop.eup %6406  ;;  %6418 = vrcp.f32 %v4373_v9  ;;  %v4376_v45 = vadd.f32 1.0, %v6405_v53  ;;  %v8079_v51 = vadd.f32 %v7991_v58, %v4168_v12  ;;  %v5736_v30 = vpop.f32.mrb[86].mxu0 }
 0x46e   : > { %v6409_v33 = vpop.eup %6408  ;;  %6420 = vrcp.f32 %v4371_v24  ;;  %v4374_v20 = vadd.f32 1.0, %v6407_v56  ;;  %v4288_v57 = vsub.f32 0.0, %v8075_v35  ;;  %v8083_v47 = vadd.f32 %v5736_v30, %v7991_v58  ;;  %v4171_v18 = vpop.f32.mrb[87].mxu0 }
 0x46f   : > { %v6411_v21 = vpop.eup %6410  ;;  %6422 = vrcp.f32 %v4376_v45  ;;  %v4377_v39 = vadd.f32 1.0, %v6409_v33  ;;  %v8086_v60 = vadd.f32 %v7991_v58, %v4171_v18  ;;  %v4286_v59 = vsub.f32 0.0, %v8079_v51 }
 0x470   : > { %6424 = vrcp.f32 %v4374_v20  ;;  %v4375_v13 = vadd.f32 1.0, %v6411_v21  ;;  %v4289_v26 = vsub.f32 0.0, %v8083_v47  ;;  %v4338_v43 = vmul.f32 1.442695, %v4288_v57 }
 0x471   : > { %6426 = vrcp.f32 %v4377_v39  ;;  %v4287_v41 = vsub.f32 0.0, %v8086_v60  ;;  %v4334_v25 = vmul.f32 1.442695, %v4286_v59 }
 0x472   : > { %6428 = vrcp.f32 %v4375_v13  ;;  %v4340_v37 = vmul.f32 1.442695, %v4289_v26 }
 0x473   : > { %6430 = vpow2.f32 %v4326_v61  ;;  %v5739_v34 = vpop.f32.mrb[88].mxu0  ;;  %v4336_v46 = vmul.f32 1.442695, %v4287_v41 }
 0x474   : > { %v6413_v0 = vpop.eup %6412  ;;  %6432 = vpow2.f32 %v4332_v7  ;;  %v8092_v4 = vadd.f32 %v5739_v34, %v7991_v58  ;;  %v4184_v6 = vpop.f32.mrb[89].mxu0 }
 0x475   : > { %v6415_v40 = vpop.eup %6414  ;;  %v4380_v22 = vadd.f32 1.0, %v6413_v0  ;;  %6434 = vpow2.f32 %v4328_v28  ;;  %v8095_v44 = vadd.f32 %v7991_v58, %v4184_v6  ;;  %v5740_v55 = vpop.f32.mrb[90].mxu0 }
 0x476   : > { %v6417_v14 = vpop.eup %6416  ;;  %v4468_v36 = vmul.f32 %v6415_v40, %v8010_v3  ;;  %6436 = vpow2.f32 %v4338_v43  ;;  %v4292_v38 = vsub.f32 0.0, %v8092_v4  ;;  %v8100_v15 = vadd.f32 %v5740_v55, %v7991_v58  ;;  %v4187_v27 = vpop.f32.mrb[91].mxu0 }
 0x477   : > { %v6419_v52 = vpop.eup %6418  ;;  %v4466_v54 = vmul.f32 %v6417_v14, %v8013_v19  ;;  %6438 = vrcp.f32 %v4380_v22  ;;  %v4290_v2 = vsub.f32 0.0, %v8095_v44  ;;  %v8105_v8 = vadd.f32 %v7991_v58, %v4187_v27 }
 0x478   : > { %v6421_v1 = vpop.eup %6420  ;;  %v5104_v10 = vpack.c.bf16 %v4468_v36, %v4468_v36  ;;  %v4469_v3 = vmul.f32 %v6419_v52, %v8017_v62  ;;  %6440 = vpow2.f32 %v4334_v25  ;;  %v4346_v42 = vmul.f32 1.442695, %v4292_v38 }
 0x479   : > { %v6423_v9 = vpop.eup %6422  ;;  %v5102_v29 = vpack.c.bf16 %v4466_v54, %v4466_v54  ;;  %v4467_v50 = vmul.f32 %v6421_v1, %v8021_v11  ;;  %6442 = vpow2.f32 %v4340_v37  ;;  %v4342_v19 = vmul.f32 1.442695, %v4290_v2 }
 0x47a   : > { %v6425_v53 = vpop.eup %6424  ;;  %4629 = vst.msk [vmem:[%s8052_s24 + $0x18] sm:$0xf] %vm4622_vm8, %v5104_v10  ;;  %v5105_v24 = vpack.c.bf16 %v4469_v3, %v4469_v3  ;;  %v4472_v61 = vmul.f32 %v6423_v9, %v8026_v23  ;;  %6444 = vpow2.f32 %v4336_v46  ;;  %v4293_v12 = vsub.f32 0.0, %v8100_v15 }
 0x47b   : > { %v6427_v62 = vpop.eup %6426  ;;  %4627 = vst.msk [vmem:[%s8052_s24 + $0x10] sm:$0xf] %vm4622_vm8, %v5102_v29  ;;  %v5103_v56 = vpack.c.bf16 %v4467_v50, %v4467_v50  ;;  %v4470_v45 = vmul.f32 %v6425_v53, %v8029_v16  ;;  %6446 = vpow2.f32 %v4346_v42  ;;  %v4291_v11 = vsub.f32 0.0, %v8105_v8  ;;  %v5743_v48 = vpop.f32.mrb[92].mxu0 }
 0x47c   : > { %v6429_v30 = vpop.eup %6428  ;;  %4630 = vst.msk [vmem:[%s8052_s24 + $0x1c] sm:$0xf] %vm4622_vm8, %v5105_v24  ;;  %v5108_v33 = vpack.c.bf16 %v4472_v61, %v4472_v61  ;;  %v4473_v23 = vmul.f32 %v6427_v62, %v8033_v31  ;;  %6448 = vpow2.f32 %v4342_v19  ;;  %v4348_v20 = vmul.f32 1.442695, %v4293_v12  ;;  %v4200_v57 = vpop.f32.mrb[93].mxu0 }
 0x47d   : > { %v6431_v18 = vpop.eup %6430  ;;  %4628 = vst.msk [vmem:[%s8052_s24 + $0x14] sm:$0xf] %vm4622_vm8, %v5103_v56  ;;  %v5106_v21 = vpack.c.bf16 %v4470_v45, %v4470_v45  ;;  %v4471_v16 = vmul.f32 %v6429_v30, %v8037_v32  ;;  %v4344_v39 = vmul.f32 1.442695, %v4291_v11  ;;  %v8124_v7 = vadd.f32 %v5743_v48, %v7991_v58  ;;  %v5744_v13 = vpop.f32.mrb[94].mxu0 }
 0x47e   : > { %v6433_v59 = vpop.eup %6432  ;;  %4633 = vst.msk [vmem:[%s8052_s24 + $0x28] sm:$0xf] %vm4622_vm8, %v5108_v33  ;;  %v5109_v31 = vpack.c.bf16 %v4473_v23, %v4473_v23  ;;  %v4378_v26 = vadd.f32 1.0, %v6431_v18  ;;  %6450 = vpow2.f32 %v4348_v20  ;;  %v8129_v28 = vadd.f32 %v7991_v58, %v4200_v57  ;;  %v4203_v41 = vpop.f32.mrb[95].mxu0 }
 0x47f   : > { %v6435_v43 = vpop.eup %6434  ;;  %4631 = vst.msk [vmem:[%s8052_s24 + $0x20] sm:$0xf] %vm4622_vm8, %v5106_v21  ;;  %v5107_v32 = vpack.c.bf16 %v4471_v16, %v4471_v16  ;;  %v4381_v34 = vadd.f32 1.0, %v6433_v59  ;;  %6452 = vpow2.f32 %v4344_v39  ;;  %v4296_v0 = vsub.f32 0.0, %v8124_v7 }
 0x480   : > { %v6437_v25 = vpop.eup %6436  ;;  %4634 = vst.msk [vmem:[%s8052_s24 + $0x2c] sm:$0xf] %vm4622_vm8, %v5109_v31  ;;  %6454 = vrcp.f32 %v4378_v26  ;;  %v4379_v37 = vadd.f32 1.0, %v6435_v43  ;;  %v4294_v6 = vsub.f32 0.0, %v8129_v28  ;;  %v8138_v40 = vadd.f32 %v5744_v13, %v7991_v58 }
 0x481   : > { %v6439_v22 = vpop.eup %6438  ;;  %4632 = vst.msk [vmem:[%s8052_s24 + $0x24] sm:$0xf] %vm4622_vm8, %v5107_v32  ;;  %6456 = vrcp.f32 %v4381_v34  ;;  %v4384_v46 = vadd.f32 1.0, %v6437_v25  ;;  %v4354_v55 = vmul.f32 1.442695, %v4296_v0  ;;  %v8143_v14 = vadd.f32 %v7991_v58, %v4203_v41 }
 0x482   : > { %v6441_v36 = vpop.eup %6440  ;;  %v4476_v38 = vmul.f32 %v6439_v22, %v8042_v17  ;;  %6458 = vrcp.f32 %v4379_v37  ;;  %v4350_v54 = vmul.f32 1.442695, %v4294_v6  ;;  %v4297_v42 = vsub.f32 0.0, %v8138_v40 }
 0x483   : > { %v6443_v27 = vpop.eup %6442  ;;  %6460 = vrcp.f32 %v4384_v46  ;;  %v4382_v52 = vadd.f32 1.0, %v6441_v36  ;;  %v5747_v2 = vpop.f32.mrb[96].mxu0  ;;  %v4295_v19 = vsub.f32 0.0, %v8143_v14 }
 0x484   : > { %v6445_v1 = vpop.eup %6444  ;;  %v5112_v10 = vpack.c.bf16 %v4476_v38, %v4476_v38  ;;  %v4385_v3 = vadd.f32 1.0, %v6443_v27  ;;  %6462 = vpow2.f32 %v4354_v55  ;;  %v4216_v9 = vpop.f32.mrb[97].mxu0  ;;  %v8149_v17 = vadd.f32 %v5747_v2, %v7991_v58 }
 0x485   : > { %v6447_v29 = vpop.eup %6446  ;;  %6464 = vrcp.f32 %v4382_v52  ;;  %v4383_v50 = vadd.f32 1.0, %v6445_v1  ;;  %v5748_v53 = vpop.f32.mrb[98].mxu0  ;;  %v8154_v12 = vadd.f32 %v7991_v58, %v4216_v9  ;;  %v4356_v57 = vmul.f32 1.442695, %v4297_v42 }
 0x486   : > { %v6449_v24 = vpop.eup %6448  ;;  %4637 = vst.msk [vmem:[%s8052_s24 + $0x38] sm:$0xf] %vm4622_vm8, %v5112_v10  ;;  %6466 = vrcp.f32 %v4385_v3  ;;  %v4388_v61 = vadd.f32 1.0, %v6447_v29  ;;  %v8157_v62 = vadd.f32 %v5748_v53, %v7991_v58  ;;  %v4219_v56 = vpop.f32.mrb[99].mxu0  ;;  %v4300_v11 = vsub.f32 0.0, %v8149_v17 }
 0x487   : > { %6468 = vrcp.f32 %v4383_v50  ;;  %v4386_v45 = vadd.f32 1.0, %v6449_v24  ;;  %v8161_v48 = vadd.f32 %v7991_v58, %v4219_v56  ;;  %v4298_v33 = vsub.f32 0.0, %v8154_v12 }
 0x488   : > { %v6451_v30 = vpop.eup %6450  ;;  %6470 = vrcp.f32 %v4388_v61  ;;  %v4352_v16 = vmul.f32 1.442695, %v4295_v19  ;;  %v4301_v39 = vsub.f32 0.0, %v8157_v62  ;;  %v4362_v58 = vmul.f32 1.442695, %v4300_v11 }
 0x489   : > { %v6453_v23 = vpop.eup %6452  ;;  %6472 = vrcp.f32 %v4386_v45  ;;  %v4389_v20 = vadd.f32 1.0, %v6451_v30  ;;  %v4299_v31 = vsub.f32 0.0, %v8161_v48  ;;  %v4358_v43 = vmul.f32 1.442695, %v4298_v33 }
 0x48a   : > { %v6455_v18 = vpop.eup %6454  ;;  %v4387_v21 = vadd.f32 1.0, %v6453_v23  ;;  %6474 = vpow2.f32 %v4350_v54  ;;  %v4364_v6 = vmul.f32 1.442695, %v4301_v39 }
 0x48b   : > { %v6457_v13 = vpop.eup %6456  ;;  %v4474_v59 = vmul.f32 %v6455_v18, %v8046_v5  ;;  %6476 = vrcp.f32 %v4389_v20  ;;  %v4360_v55 = vmul.f32 1.442695, %v4299_v31 }
 0x48c   : > { %v6459_v26 = vpop.eup %6458  ;;  %v4477_v41 = vmul.f32 %v6457_v13, %v8058_v49  ;;  %6478 = vrcp.f32 %v4387_v21 }
 0x48d   : > { %v6461_v32 = vpop.eup %6460  ;;  %v5110_v34 = vpack.c.bf16 %v4474_v59, %v4474_v59  ;;  %v4475_v0 = vmul.f32 %v6459_v26, %v8065_v63  ;;  %6480 = vpow2.f32 %v4356_v57 }
 0x48e   : > { %v6463_v25 = vpop.eup %6462  ;;  %v5113_v37 = vpack.c.bf16 %v4477_v41, %v4477_v41  ;;  %v4480_v5 = vmul.f32 %v6461_v32, %v8075_v35  ;;  %6482 = vpow2.f32 %v4352_v16 }
 0x48f   : > { %v6465_v22 = vpop.eup %6464  ;;  %4635 = vst.msk [vmem:[%s8052_s24 + $0x30] sm:$0xf] %vm4622_vm8, %v5110_v34  ;;  %v5111_v49 = vpack.c.bf16 %v4475_v0, %v4475_v0  ;;  %v4392_v46 = vadd.f32 1.0, %v6463_v25  ;;  %6484 = vpow2.f32 %v4362_v58 }
 0x490   : > { %v6467_v36 = vpop.eup %6466  ;;  %4638 = vst.msk [vmem:[%s8052_s24 + $0x3c] sm:$0xf] %vm4622_vm8, %v5113_v37  ;;  %v5116_v63 = vpack.c.bf16 %v4480_v5, %v4480_v5  ;;  %v4478_v38 = vmul.f32 %v6465_v22, %v8079_v51  ;;  %6486 = vpow2.f32 %v4358_v43 }
 0x491   : > { %v6469_v27 = vpop.eup %6468  ;;  %4636 = vst.msk [vmem:[%s8052_s24 + $0x34] sm:$0xf] %vm4622_vm8, %v5111_v49  ;;  %v4481_v35 = vmul.f32 %v6467_v36, %v8083_v47  ;;  %6488 = vrcp.f32 %v4392_v46 }
 0x492   : > { %v6471_v52 = vpop.eup %6470  ;;  %4641 = vst.msk [vmem:[%s8052_s24 + $0x48] sm:$0xf] %vm4622_vm8, %v5116_v63  ;;  %v5114_v54 = vpack.c.bf16 %v4478_v38, %v4478_v38  ;;  %v4479_v2 = vmul.f32 %v6469_v27, %v8086_v60  ;;  %6490 = vpow2.f32 %v4364_v6 }
 0x493   : > { %v6473_v1 = vpop.eup %6472  ;;  %v5117_v10 = vpack.c.bf16 %v4481_v35, %v4481_v35  ;;  %v4484_v51 = vmul.f32 %v6471_v52, %v8092_v4  ;;  %6492 = vpow2.f32 %v4360_v55 }
 0x494   : > { %v6475_v3 = vpop.eup %6474  ;;  %4639 = vst.msk [vmem:[%s8052_s24 + $0x40] sm:$0xf] %vm4622_vm8, %v5114_v54  ;;  %v5115_v47 = vpack.c.bf16 %v4479_v2, %v4479_v2  ;;  %v4482_v42 = vmul.f32 %v6473_v1, %v8095_v44 }
 0x495   : > { %v6477_v9 = vpop.eup %6476  ;;  %4642 = vst.msk [vmem:[%s8052_s24 + $0x4c] sm:$0xf] %vm4622_vm8, %v5117_v10  ;;  %v5120_v29 = vpack.c.bf16 %v4484_v51, %v4484_v51  ;;  %v4390_v50 = vadd.f32 1.0, %v6475_v3 }
 0x496   : > { %v6479_v60 = vpop.eup %6478  ;;  %4640 = vst.msk [vmem:[%s8052_s24 + $0x44] sm:$0xf] %vm4622_vm8, %v5115_v47  ;;  %v5118_v19 = vpack.c.bf16 %v4482_v42, %v4482_v42  ;;  %v4485_v4 = vmul.f32 %v6477_v9, %v8100_v15 }
 0x497   : > { %v6481_v53 = vpop.eup %6480  ;;  %4645 = vst.msk [vmem:[%s8052_s24 + $0x58] sm:$0xf] %vm4622_vm8, %v5120_v29  ;;  %v4483_v24 = vmul.f32 %v6479_v60, %v8105_v8  ;;  %6494 = vrcp.f32 %v4390_v50 }
 0x498   : > { %v6483_v44 = vpop.eup %6482  ;;  %4643 = vst.msk [vmem:[%s8052_s24 + $0x50] sm:$0xf] %vm4622_vm8, %v5118_v19  ;;  %v5121_v61 = vpack.c.bf16 %v4485_v4, %v4485_v4  ;;  %v4393_v56 = vadd.f32 1.0, %v6481_v53 }
 0x499   : > { %v6485_v45 = vpop.eup %6484  ;;  %v5119_v11 = vpack.c.bf16 %v4483_v24, %v4483_v24  ;;  %v4391_v30 = vadd.f32 1.0, %v6483_v44 }
 0x49a   : > { %v6487_v33 = vpop.eup %6486  ;;  %4646 = vst.msk [vmem:[%s8052_s24 + $0x5c] sm:$0xf] %vm4622_vm8, %v5121_v61  ;;  %6496 = vrcp.f32 %v4393_v56  ;;  %v4396_v15 = vadd.f32 1.0, %v6485_v45 }
 0x49b   : > { %v6489_v23 = vpop.eup %6488  ;;  %4644 = vst.msk [vmem:[%s8052_s24 + $0x54] sm:$0xf] %vm4622_vm8, %v5119_v11  ;;  %6498 = vrcp.f32 %v4391_v30  ;;  %v4394_v8 = vadd.f32 1.0, %v6487_v33 }
 0x49c   : > { %v6491_v20 = vpop.eup %6490  ;;  %v4488_v57 = vmul.f32 %v6489_v23, %v8124_v7  ;;  %6500 = vrcp.f32 %v4396_v15 }
 0x49d   : > { %v6493_v18 = vpop.eup %6492  ;;  %6502 = vrcp.f32 %v4394_v8  ;;  %v4397_v21 = vadd.f32 1.0, %v6491_v20 }
 0x49e   : > { %v5124_v16 = vpack.c.bf16 %v4488_v57, %v4488_v57  ;;  %v4395_v39 = vadd.f32 1.0, %v6493_v18 }
 0x49f   : > { %6504 = vrcp.f32 %v4397_v21 }
 0x4a0   : > { %4649 = vst.msk [vmem:[%s8052_s24 + $0x68] sm:$0xf] %vm4622_vm8, %v5124_v16  ;;  %6506 = vrcp.f32 %v4395_v39 }
 0x4a1   : > { %v6495_v13 = vpop.eup %6494 }
 0x4a2   : > { %v4486_v59 = vmul.f32 %v6495_v13, %v8129_v28 }
 0x4a4   : > { %v6497_v58 = vpop.eup %6496  ;;  %v5122_v31 = vpack.c.bf16 %v4486_v59, %v4486_v59 }
 0x4a5   : > { %v6499_v26 = vpop.eup %6498  ;;  %v4489_v7 = vmul.f32 %v6497_v58, %v8138_v40 }
 0x4a6   : > { %v6501_v41 = vpop.eup %6500  ;;  %4647 = vst.msk [vmem:[%s8052_s24 + $0x60] sm:$0xf] %vm4622_vm8, %v5122_v31  ;;  %v4487_v43 = vmul.f32 %v6499_v26, %v8143_v14 }
 0x4a7   : > { %v6503_v32 = vpop.eup %6502  ;;  %v5125_v34 = vpack.c.bf16 %v4489_v7, %v4489_v7  ;;  %v4492_v0 = vmul.f32 %v6501_v41, %v8149_v17 }
 0x4a8   : > { %v5123_v28 = vpack.c.bf16 %v4487_v43, %v4487_v43  ;;  %v4490_v25 = vmul.f32 %v6503_v32, %v8154_v12 }
 0x4a9   : > { %v6505_v37 = vpop.eup %6504  ;;  %4650 = vst.msk [vmem:[%s8052_s24 + $0x6c] sm:$0xf] %vm4622_vm8, %v5125_v34  ;;  %v5128_v40 = vpack.c.bf16 %v4492_v0, %v4492_v0 }
 0x4aa   : > { %v6507_v5 = vpop.eup %6506  ;;  %4648 = vst.msk [vmem:[%s8052_s24 + $0x64] sm:$0xf] %vm4622_vm8, %v5123_v28  ;;  %v5126_v6 = vpack.c.bf16 %v4490_v25, %v4490_v25  ;;  %v4493_v22 = vmul.f32 %v6505_v37, %v8157_v62 }
 0x4ab   : > { %4653 = vst.msk [vmem:[%s8052_s24 + $0x78] sm:$0xf] %vm4622_vm8, %v5128_v40  ;;  %v4491_v14 = vmul.f32 %v6507_v5, %v8161_v48 }
 0x4ac   : > { %4651 = vst.msk [vmem:[%s8052_s24 + $0x70] sm:$0xf] %vm4622_vm8, %v5126_v6  ;;  %v5129_v17 = vpack.c.bf16 %v4493_v22, %v4493_v22 }
 0x4ad   : > { %v5127_v49 = vpack.c.bf16 %v4491_v14, %v4491_v14 }
 0x4ae   : > { %4654 = vst.msk [vmem:[%s8052_s24 + $0x7c] sm:$0xf] %vm4622_vm8, %v5129_v17 }
 0x4af   : > { %4652 = vst.msk [vmem:[%s8052_s24 + $0x74] sm:$0xf] %vm4622_vm8, %v5127_v49 }
 0x4b0 PF: > { %s21_s19 = sadd.s32 1, %s6546_s19   ;;  %s8280_s17 = smov %s6542_s18 }
 0x4b1   : > { %p18_p5 = scmp.ge.s32.totalorder %s21_s19, 4   ;;  %s8281_s18 = smov %s8283_s20 }
 0x4b3   :  { %20 = sbr.rel (!%p18_p5) target bundleno = 2 (0x2), region = 103 }

</bundles_post_ra>
